<compile_context>
chip_gen: v7x
topology: tpu7x:2x2x1
jax: 0.10.0
libtpu: 0.0.40
codegen_flags: <defaults>
</compile_context>

<pallas_src>
import functools

import jax
import jax.numpy as jnp
from jax.experimental import pallas as pl
from jax.experimental.pallas import tpu as pltpu

EPS = 1e-5      # BatchNorm2d default eps
LANE = 128


def _round_up(x, m):
    return ((x + m - 1) // m) * m


# ---------------------------------------------------------------------------
# Kernels
# ---------------------------------------------------------------------------
def _head_kernel_nostate(x_ref, w0_ref, wih_ref, blstm_ref, whead_ref, bhead_ref,
                         boxcls_ref, h_ref, c_ref, *, gate_dtype):
    """state is None: h0 = c0 = 0, so skip h0@whh and f*c0 entirely."""
    chp = h_ref.shape[-1]
    cdt = wih_ref.dtype

    # Conv1x1 (+ folded BatchNorm scale); conv/BN bias folded into blstm.
    y = jnp.dot(x_ref[...], w0_ref[...], preferred_element_type=jnp.float32)
    gates = jnp.dot(y.astype(cdt), wih_ref[...],
                    preferred_element_type=jnp.float32) + blstm_ref[...]

    ga = gates.astype(gate_dtype)          # EUP work in gate_dtype (bf16 on v6e/v7x)
    # PyTorch LSTMCell gate order: i, f, g, o  (f gate irrelevant: c0 == 0)
    i = jax.nn.sigmoid(ga[:, 0 * chp:1 * chp]).astype(jnp.float32)
    g = jnp.tanh(ga[:, 2 * chp:3 * chp]).astype(jnp.float32)
    o = jax.nn.sigmoid(ga[:, 3 * chp:4 * chp]).astype(jnp.float32)
    c = i * g                              # f32 accumulation
    h = o * jnp.tanh(c.astype(gate_dtype)).astype(jnp.float32)

    # Fused box/cls heads -> one lane-dense, compute_dtype output slab.
    boxcls = jnp.dot(h.astype(cdt), whead_ref[...],
                     preferred_element_type=jnp.float32) + bhead_ref[...]
    boxcls_ref[...] = boxcls.astype(boxcls_ref.dtype)
    h_ref[...] = h.astype(h_ref.dtype)
    c_ref[...] = c.astype(c_ref.dtype)     # f32 cell state


def _head_kernel_state(x_ref, h0_ref, c0_ref, w0_ref, wih_ref, whh_ref, blstm_ref,
                       whead_ref, bhead_ref, boxcls_ref, h_ref, c_ref, *, gate_dtype):
    """Stateful path: two accumulating MXU dots (no scratch slab round-trip)."""
    chp = h_ref.shape[-1]
    cdt = wih_ref.dtype

    y = jnp.dot(x_ref[...], w0_ref[...], preferred_element_type=jnp.float32)
    gates = (jnp.dot(y.astype(cdt), wih_ref[...], preferred_element_type=jnp.float32)
             + jnp.dot(h0_ref[...], whh_ref[...], preferred_element_type=jnp.float32)
             + blstm_ref[...])

    ga = gates.astype(gate_dtype)
    i = jax.nn.sigmoid(ga[:, 0 * chp:1 * chp]).astype(jnp.float32)
    f = jax.nn.sigmoid(ga[:, 1 * chp:2 * chp]).astype(jnp.float32)
    g = jnp.tanh(ga[:, 2 * chp:3 * chp]).astype(jnp.float32)
    o = jax.nn.sigmoid(ga[:, 3 * chp:4 * chp]).astype(jnp.float32)
    c = f * c0_ref[...] + i * g            # c0 is f32; f32 accumulation
    h = o * jnp.tanh(c.astype(gate_dtype)).astype(jnp.float32)

    boxcls = jnp.dot(h.astype(cdt), whead_ref[...],
                     preferred_element_type=jnp.float32) + bhead_ref[...]
    boxcls_ref[...] = boxcls.astype(boxcls_ref.dtype)
    h_ref[...] = h.astype(h_ref.dtype)
    c_ref[...] = c.astype(c_ref.dtype)


# ---------------------------------------------------------------------------
# Wrapper-side parameter folding / padding
# ---------------------------------------------------------------------------
def _fold_and_pad_params(params, compute_dtype):
    w0 = params["w0"]
    cin, ch = w0.shape
    box_out = params["wbox"].shape[1]
    cls_out = params["wcls"].shape[1]
    chp = _round_up(ch, LANE)
    headp = _round_up(box_out + cls_out, LANE)

    # Fold BatchNorm (eval) + conv bias:  y = x @ w0' + b0';  b0' folded into blstm.
    scale = params["gamma"] * jax.lax.rsqrt(params["var"] + EPS)       # (1, Ch)
    w0f = w0 * scale                                                   # (Cin, Ch)
    b0f = (params["b0"] - params["mean"]) * scale + params["beta"]     # (1, Ch)
    blstm_f = params["blstm"] + b0f @ params["wih"]                    # (1, 4*Ch)

    def pad_gate_cols(w):  # remap each gate block [i|f|g|o] to its 128-padded slot
        k = w.shape[0]
        w = w.reshape(k, 4, ch)
        w = jnp.pad(w, ((0, 0), (0, 0), (0, chp - ch)))
        return w.reshape(k, 4 * chp)

    wih_p = jnp.pad(pad_gate_cols(params["wih"]), ((0, chp - ch), (0, 0)))  # (Chp, 4Chp)
    whh_p = jnp.pad(pad_gate_cols(params["whh"]), ((0, chp - ch), (0, 0)))  # (Chp, 4Chp)
    blstm_p = pad_gate_cols(blstm_f)                                        # (1, 4Chp)
    w0p = jnp.pad(w0f, ((0, 0), (0, chp - ch)))                             # (Cin, Chp)

    whead = jnp.concatenate([params["wbox"], params["wcls"]], axis=1)       # (Ch, bo+co)
    whead = jnp.pad(whead, ((0, chp - ch), (0, headp - (box_out + cls_out))))
    bhead = jnp.concatenate([params["bbox"], params["bcls"]], axis=1)
    bhead = jnp.pad(bhead, ((0, 0), (0, headp - (box_out + cls_out))))

    folded = {
        "w0": w0p.astype(compute_dtype),
        "wih": wih_p.astype(compute_dtype),
        "whh": whh_p.astype(compute_dtype),
        "blstm": blstm_p.astype(jnp.float32),
        "whead": whead.astype(compute_dtype),
        "bhead": bhead.astype(jnp.float32),
    }
    return folded, ch, chp, box_out, cls_out, headp


def _full(a):
    nd = a.ndim
    return pl.BlockSpec(a.shape, lambda i, _nd=nd: (0,) * _nd)


# ---------------------------------------------------------------------------
# Forward
# ---------------------------------------------------------------------------
def head_gen_forward(x_nchw, params, state=None, *, tile_rows=512,
                     compute_dtype=jnp.bfloat16, gate_dtype=jnp.bfloat16):
    """Pallas implementation of the canonical HeadGen forward.

    x_nchw : (B, Cin, H, W) float32
    state  : None, or the (h, c) slab tuple returned by a previous call
             (h: (N_pad, Ch_pad) compute_dtype, c: (N_pad, Ch_pad) float32).
             State layout is tied to B*H*W and tile_rows; keep them fixed.
    returns (box, cls, state) with box=(B, box_out, H, W), cls=(B, cls_out, H, W).

    On v5e pass gate_dtype=jnp.float32 (no bf16 EUP/VPU); keep compute_dtype=bf16
    (the MXU runs bf16 natively on all generations).
    """
    B, Cin, H, W = x_nchw.shape
    N = B * H * W
    folded, ch, chp, box_out, cls_out, headp = _fold_and_pad_params(params, compute_dtype)

    n_pad = _round_up(N, tile_rows)
    xr = jnp.transpose(x_nchw, (0, 2, 3, 1)).reshape(N, Cin)
    if n_pad != N:
        xr = jnp.pad(xr, ((0, n_pad - N), (0, 0)))
    xr = xr.astype(compute_dtype)

    grid = (n_pad // tile_rows,)
    row = lambda c: pl.BlockSpec((tile_rows, c), lambda i: (i, 0))

    out_shape = (
        jax.ShapeDtypeStruct((n_pad, headp), compute_dtype),      # fused box|cls slab
        jax.ShapeDtypeStruct((n_pad, chp), compute_dtype),        # h state slab
        jax.ShapeDtypeStruct((n_pad, chp), jnp.float32),          # c state slab (f32)
    )
    out_specs = [row(headp), row(chp), row(chp)]

    # Rough per-call VMEM residency (double-buffered row blocks + weights); raise the
    # scoped limit only if it exceeds the 32 MiB default.  v7x physical VMEM is 64 MiB:
    # prefer shrinking tile_rows there instead of raising the limit past ~48 MiB.
    cbytes = jnp.dtype(compute_dtype).itemsize
    row_bytes = tile_rows * (Cin * cbytes + headp * cbytes + chp * cbytes + chp * 4
                             + (chp * cbytes + chp * 4 if state is not None else 0))
    w_bytes = sum(int(v.size) * jnp.dtype(v.dtype).itemsize for v in folded.values())
    vmem_est = 2 * row_bytes + 2 * w_bytes + (1 << 20)
    cp_kwargs = dict(dimension_semantics=("parallel",))
    if vmem_est > (32 << 20):
        cp_kwargs["vmem_limit_bytes"] = int(min(vmem_est, 96 << 20))
    cparams = pltpu.CompilerParams(**cp_kwargs)
    # NOTE: the constant-index weight blocks could use pipeline_mode=pl.Buffered(1) to
    # avoid double-buffering; negligible at chp=128, so left at the default here.

    if state is None:
        boxcls, h, c = pl.pallas_call(
            functools.partial(_head_kernel_nostate, gate_dtype=gate_dtype),
            out_shape=out_shape,
            grid_spec=pltpu.PrefetchScalarGridSpec(
                num_scalar_prefetch=0,
                grid=grid,
                in_specs=[row(Cin), _full(folded["w0"]), _full(folded["wih"]),
                          _full(folded["blstm"]), _full(folded["whead"]),
                          _full(folded["bhead"])],
                out_specs=out_specs,
            ),
            compiler_params=cparams,
        )(xr, folded["w0"], folded["wih"], folded["blstm"],
          folded["whead"], folded["bhead"])
    else:
        h0, c0 = state
        assert h0.shape == (n_pad, chp) and c0.shape == (n_pad, chp), (
            "state layout mismatch: the recurrent state is tied to B*H*W (rounded up "
            "to tile_rows) and the padded hidden width; keep them fixed across steps")
        h0 = h0.astype(compute_dtype)
        c0 = c0.astype(jnp.float32)
        boxcls, h, c = pl.pallas_call(
            functools.partial(_head_kernel_state, gate_dtype=gate_dtype),
            out_shape=out_shape,
            grid_spec=pltpu.PrefetchScalarGridSpec(
                num_scalar_prefetch=0,
                grid=grid,
                in_specs=[row(Cin), row(chp), row(chp), _full(folded["w0"]),
                          _full(folded["wih"]), _full(folded["whh"]),
                          _full(folded["blstm"]), _full(folded["whead"]),
                          _full(folded["bhead"])],
                out_specs=out_specs,
            ),
            # Donate the recurrent state slabs: h0 -> h, c0 -> c.
            input_output_aliases={1: 1, 2: 2},
            compiler_params=cparams,
        )(xr, h0, c0, folded["w0"], folded["wih"], folded["whh"],
          folded["blstm"], folded["whead"], folded["bhead"])

    box = boxcls[:N, :box_out].astype(jnp.float32)
    cls = boxcls[:N, box_out:box_out + cls_out].astype(jnp.float32)
    to_nchw = lambda t: jnp.transpose(t.reshape(B, H, W, -1), (0, 3, 1, 2))
    return to_nchw(box), to_nchw(cls), (h, c)


# ---------------------------------------------------------------------------
# Raw (PyTorch-layout) parameters + pure-JAX reference
# ---------------------------------------------------------------------------
def make_params(key, in_channels, hidden, box_out, cls_out):
    ks = jax.random.split(key, 8)
    s = 0.1
    return {
        "w0": s * jax.random.normal(ks[0], (in_channels, hidden), jnp.float32),
        "b0": jnp.zeros((1, hidden), jnp.float32),
        # BatchNorm2d (eval mode): weight=1, bias=0, running mean=0, var=1
        "gamma": jnp.ones((1, hidden), jnp.float32),
        "beta": jnp.zeros((1, hidden), jnp.float32),
        "mean": jnp.zeros((1, hidden), jnp.float32),
        "var": jnp.ones((1, hidden), jnp.float32),
        "wih": s * jax.random.normal(ks[1], (hidden, 4 * hidden), jnp.float32),
        "whh": s * jax.random.normal(ks[2], (hidden, 4 * hidden), jnp.float32),
        "blstm": s * jax.random.normal(ks[3], (1, 4 * hidden), jnp.float32),
        "wbox": s * jax.random.normal(ks[4], (hidden, box_out), jnp.float32),
        "bbox": s * jax.random.normal(ks[5], (1, box_out), jnp.float32),
        "wcls": s * jax.random.normal(ks[6], (hidden, cls_out), jnp.float32),
        "bcls": s * jax.random.normal(ks[7], (1, cls_out), jnp.float32),
    }


def head_gen_reference(x_nchw, params, state=None):
    """Pure-JAX f32 reference (handles the stateful path too)."""
    B, Cin, H, W = x_nchw.shape
    N = B * H * W
    ch = params["w0"].shape[1]
    x = jnp.transpose(x_nchw, (0, 2, 3, 1)).reshape(N, Cin)
    y = x @ params["w0"] + params["b0"]
    y = (y - params["mean"]) / jnp.sqrt(params["var"] + EPS) * params["gamma"] + params["beta"]
    if state is None:
        h0 = jnp.zeros((N, ch), jnp.float32)
        c0 = jnp.zeros((N, ch), jnp.float32)
    else:
        h0, c0 = state
    gates = y @ params["wih"] + h0 @ params["whh"] + params["blstm"]
    i, f, g, o = jnp.split(gates, 4, axis=-1)
    c = jax.nn.sigmoid(f) * c0 + jax.nn.sigmoid(i) * jnp.tanh(g)
    h = jax.nn.sigmoid(o) * jnp.tanh(c)
    box = h @ params["wbox"] + params["bbox"]
    cls = h @ params["wcls"] + params["bcls"]
    to = lambda t: jnp.transpose(t.reshape(B, H, W, -1), (0, 3, 1, 2))
    return to(box), to(cls), (h, c)


if __name__ == "__main__":
    B, Cin, H, W = 2, 4, 16, 16            # N = B*H*W = 1024 rows -> 2 grid steps @512
    hidden, box_out, cls_out = 32, 8, 16

    key = jax.random.PRNGKey(0)
    kx1, kx2, kp = jax.random.split(key, 3)
    x1 = jax.random.normal(kx1, (B, Cin, H, W), jnp.float32)
    x2 = jax.random.normal(kx2, (B, Cin, H, W), jnp.float32)
    params = make_params(kp, Cin, hidden, box_out, cls_out)

    fwd = jax.jit(functools.partial(head_gen_forward, tile_rows=512,
                                    compute_dtype=jnp.bfloat16,
                                    gate_dtype=jnp.bfloat16))

    # step 1 (state=None path) and step 2 (stateful path)
    box1, cls1, st1 = fwd(x1, params, None)
    box2, cls2, st2 = fwd(x2, params, st1)
    jax.block_until_ready((box1, cls1, box2, cls2, st2))

    rbox1, rcls1, rst1 = head_gen_reference(x1, params, None)
    rbox2, rcls2, _ = head_gen_reference(x2, params, rst1)

    assert box1.shape == (B, box_out, H, W) and cls1.shape == (B, cls_out, H, W)
    assert box2.shape == (B, box_out, H, W) and cls2.shape == (B, cls_out, H, W)
    # bf16 weights/activations/gate-nonlinearities with f32 accumulation -> loose tol.
    assert jnp.allclose(box1, rbox1, atol=3e-2, rtol=3e-2)
    assert jnp.allclose(cls1, rcls1, atol=3e-2, rtol=3e-2)
    assert jnp.allclose(box2, rbox2, atol=3e-2, rtol=3e-2)
    assert jnp.allclose(cls2, rcls2, atol=3e-2, rtol=3e-2)
    print("KERNEL_OK")
</pallas_src>

<mosaic_0001>
module attributes {stable_mosaic.version = 11 : i64} {
  func.func @_head_kernel_nostate(%arg0: i32, %arg1: memref<512x4xbf16, #tpu.memory_space<vmem>>, %arg2: memref<4x128xbf16, #tpu.memory_space<vmem>>, %arg3: memref<128x512xbf16, #tpu.memory_space<vmem>>, %arg4: memref<1x512xf32, #tpu.memory_space<vmem>>, %arg5: memref<128x128xbf16, #tpu.memory_space<vmem>>, %arg6: memref<1x128xf32, #tpu.memory_space<vmem>>, %arg7: memref<512x128xbf16, #tpu.memory_space<vmem>>, %arg8: memref<512x128xbf16, #tpu.memory_space<vmem>>, %arg9: memref<512x128xf32, #tpu.memory_space<vmem>>) attributes {dimension_semantics = [#tpu.dimension_semantics<parallel>], iteration_bounds = array<i64: 1>, scalar_prefetch = 0 : i64, scratch_operands = 0 : i64, tpu.core_type = #tpu.core_type<tc>, window_params = [{transform_indices = @transform_0, window_bounds = array<i64: 512, 4>}, {pipeline_mode = #tpu.pipeline_mode<synchronous>, transform_indices = @transform_1, window_bounds = array<i64: 4, 128>}, {pipeline_mode = #tpu.pipeline_mode<synchronous>, transform_indices = @transform_2, window_bounds = array<i64: 128, 512>}, {pipeline_mode = #tpu.pipeline_mode<synchronous>, transform_indices = @transform_3, window_bounds = array<i64: 1, 512>}, {pipeline_mode = #tpu.pipeline_mode<synchronous>, transform_indices = @transform_4, window_bounds = array<i64: 128, 128>}, {pipeline_mode = #tpu.pipeline_mode<synchronous>, transform_indices = @transform_5, window_bounds = array<i64: 1, 128>}, {transform_indices = @transform_6, window_bounds = array<i64: 512, 128>}, {transform_indices = @transform_7, window_bounds = array<i64: 512, 128>}, {transform_indices = @transform_8, window_bounds = array<i64: 512, 128>}]} {
    %c0 = arith.constant 0 : index
    %c0_0 = arith.constant 0 : index
    %0 = vector.load %arg1[%c0, %c0_0] : memref<512x4xbf16, #tpu.memory_space<vmem>>, vector<512x4xbf16>
    %c0_1 = arith.constant 0 : index
    %c0_2 = arith.constant 0 : index
    %1 = vector.load %arg2[%c0_1, %c0_2] : memref<4x128xbf16, #tpu.memory_space<vmem>>, vector<4x128xbf16>
    %cst = arith.constant dense<0.000000e+00> : vector<512x128xf32>
    %2 = tpu.matmul %0, %1, %cst {dimension_numbers = #tpu.dot_dimension_numbers<[1], [0], [0], [1], [0, 0, 1, 1], [], []>} : vector<512x4xbf16>, vector<4x128xbf16>, vector<512x128xf32> -> vector<512x128xf32>
    %3 = arith.truncf %2 : vector<512x128xf32> to vector<512x128xbf16>
    %c0_3 = arith.constant 0 : index
    %c0_4 = arith.constant 0 : index
    %4 = vector.load %arg3[%c0_3, %c0_4] : memref<128x512xbf16, #tpu.memory_space<vmem>>, vector<128x512xbf16>
    %cst_5 = arith.constant dense<0.000000e+00> : vector<512x512xf32>
    %5 = tpu.matmul %3, %4, %cst_5 {dimension_numbers = #tpu.dot_dimension_numbers<[1], [0], [0], [1], [0, 0, 1, 1], [], []>} : vector<512x128xbf16>, vector<128x512xbf16>, vector<512x512xf32> -> vector<512x512xf32>
    %c0_6 = arith.constant 0 : index
    %c0_7 = arith.constant 0 : index
    %6 = vector.load %arg4[%c0_6, %c0_7] : memref<1x512xf32, #tpu.memory_space<vmem>>, vector<1x512xf32>
    %7 = vector.broadcast %6 : vector<1x512xf32> to vector<512x512xf32>
    %8 = arith.addf %5, %7 : vector<512x512xf32>
    %9 = arith.truncf %8 : vector<512x512xf32> to vector<512x512xbf16>
    %10 = vector.extract_strided_slice %9 {offsets = [0, 0], sizes = [512, 128], strides = [1, 1]} : vector<512x512xbf16> to vector<512x128xbf16>
    %11 = arith.negf %10 : vector<512x128xbf16>
    %12 = math.exp %11 : vector<512x128xbf16>
    %cst_8 = arith.constant 1.000000e+00 : bf16
    %13 = vector.broadcast %cst_8 : bf16 to vector<512x128xbf16>
    %14 = arith.addf %13, %12 : vector<512x128xbf16>
    %15 = arith.divf %13, %14 : vector<512x128xbf16>
    %16 = arith.extf %15 : vector<512x128xbf16> to vector<512x128xf32>
    %17 = vector.extract_strided_slice %9 {offsets = [0, 256], sizes = [512, 128], strides = [1, 1]} : vector<512x512xbf16> to vector<512x128xbf16>
    %18 = math.tanh %17 : vector<512x128xbf16>
    %19 = arith.extf %18 : vector<512x128xbf16> to vector<512x128xf32>
    %20 = vector.extract_strided_slice %9 {offsets = [0, 384], sizes = [512, 128], strides = [1, 1]} : vector<512x512xbf16> to vector<512x128xbf16>
    %21 = arith.negf %20 : vector<512x128xbf16>
    %22 = math.exp %21 : vector<512x128xbf16>
    %cst_9 = arith.constant 1.000000e+00 : bf16
    %23 = vector.broadcast %cst_9 : bf16 to vector<512x128xbf16>
    %24 = arith.addf %23, %22 : vector<512x128xbf16>
    %25 = arith.divf %23, %24 : vector<512x128xbf16>
    %26 = arith.extf %25 : vector<512x128xbf16> to vector<512x128xf32>
    %27 = arith.mulf %16, %19 : vector<512x128xf32>
    %28 = arith.truncf %27 : vector<512x128xf32> to vector<512x128xbf16>
    %29 = math.tanh %28 : vector<512x128xbf16>
    %30 = arith.extf %29 : vector<512x128xbf16> to vector<512x128xf32>
    %31 = arith.mulf %26, %30 : vector<512x128xf32>
    %32 = arith.truncf %31 : vector<512x128xf32> to vector<512x128xbf16>
    %c0_10 = arith.constant 0 : index
    %c0_11 = arith.constant 0 : index
    %33 = vector.load %arg5[%c0_10, %c0_11] : memref<128x128xbf16, #tpu.memory_space<vmem>>, vector<128x128xbf16>
    %cst_12 = arith.constant dense<0.000000e+00> : vector<512x128xf32>
    %34 = tpu.matmul %32, %33, %cst_12 {dimension_numbers = #tpu.dot_dimension_numbers<[1], [0], [0], [1], [0, 0, 1, 1], [], []>} : vector<512x128xbf16>, vector<128x128xbf16>, vector<512x128xf32> -> vector<512x128xf32>
    %c0_13 = arith.constant 0 : index
    %c0_14 = arith.constant 0 : index
    %35 = vector.load %arg6[%c0_13, %c0_14] : memref<1x128xf32, #tpu.memory_space<vmem>>, vector<1x128xf32>
    %36 = vector.broadcast %35 : vector<1x128xf32> to vector<512x128xf32>
    %37 = arith.addf %34, %36 : vector<512x128xf32>
    %38 = arith.truncf %37 : vector<512x128xf32> to vector<512x128xbf16>
    %c0_15 = arith.constant 0 : index
    %c0_16 = arith.constant 0 : index
    %39 = vector.load %arg7[%c0_15, %c0_16] : memref<512x128xbf16, #tpu.memory_space<vmem>>, vector<512x128xbf16>
    tpu.vector_store %arg7[%c0_15, %c0_16], %38 {strides = array<i32>} : memref<512x128xbf16, #tpu.memory_space<vmem>>, vector<512x128xbf16>,
    %40 = arith.truncf %31 : vector<512x128xf32> to vector<512x128xbf16>
    %c0_17 = arith.constant 0 : index
    %c0_18 = arith.constant 0 : index
    %41 = vector.load %arg8[%c0_17, %c0_18] : memref<512x128xbf16, #tpu.memory_space<vmem>>, vector<512x128xbf16>
    tpu.vector_store %arg8[%c0_17, %c0_18], %40 {strides = array<i32>} : memref<512x128xbf16, #tpu.memory_space<vmem>>, vector<512x128xbf16>,
    %c0_19 = arith.constant 0 : index
    %c0_20 = arith.constant 0 : index
    %42 = vector.load %arg9[%c0_19, %c0_20] : memref<512x128xf32, #tpu.memory_space<vmem>>, vector<512x128xf32>
    tpu.vector_store %arg9[%c0_19, %c0_20], %27 {strides = array<i32>} : memref<512x128xf32, #tpu.memory_space<vmem>>, vector<512x128xf32>,
    return
  }
  func.func @transform_0(%arg0: i32) -> (i32, i32) {
    %c0_i32 = arith.constant 0 : i32
    %c0_i32_0 = arith.constant 0 : i32
    return %arg0, %c0_i32 : i32, i32
  }
  func.func @transform_1(%arg0: i32) -> (i32, i32) {
    %c0_i32 = arith.constant 0 : i32
    %c0_i32_0 = arith.constant 0 : i32
    %c0_i32_1 = arith.constant 0 : i32
    return %c0_i32, %c0_i32_0 : i32, i32
  }
  func.func @transform_2(%arg0: i32) -> (i32, i32) {
    %c0_i32 = arith.constant 0 : i32
    %c0_i32_0 = arith.constant 0 : i32
    %c0_i32_1 = arith.constant 0 : i32
    return %c0_i32, %c0_i32_0 : i32, i32
  }
  func.func @transform_3(%arg0: i32) -> (i32, i32) {
    %c0_i32 = arith.constant 0 : i32
    %c0_i32_0 = arith.constant 0 : i32
    %c0_i32_1 = arith.constant 0 : i32
    return %c0_i32, %c0_i32_0 : i32, i32
  }
  func.func @transform_4(%arg0: i32) -> (i32, i32) {
    %c0_i32 = arith.constant 0 : i32
    %c0_i32_0 = arith.constant 0 : i32
    %c0_i32_1 = arith.constant 0 : i32
    return %c0_i32, %c0_i32_0 : i32, i32
  }
  func.func @transform_5(%arg0: i32) -> (i32, i32) {
    %c0_i32 = arith.constant 0 : i32
    %c0_i32_0 = arith.constant 0 : i32
    %c0_i32_1 = arith.constant 0 : i32
    return %c0_i32, %c0_i32_0 : i32, i32
  }
  func.func @transform_6(%arg0: i32) -> (i32, i32) {
    %c0_i32 = arith.constant 0 : i32
    %c0_i32_0 = arith.constant 0 : i32
    return %arg0, %c0_i32 : i32, i32
  }
  func.func @transform_7(%arg0: i32) -> (i32, i32) {
    %c0_i32 = arith.constant 0 : i32
    %c0_i32_0 = arith.constant 0 : i32
    return %arg0, %c0_i32 : i32, i32
  }
  func.func @transform_8(%arg0: i32) -> (i32, i32) {
    %c0_i32 = arith.constant 0 : i32
    %c0_i32_0 = arith.constant 0 : i32
    return %arg0, %c0_i32 : i32, i32
  }
}

</mosaic_0001>

<bundles_post_ra>
// kernel: head_gen_forward.1
= control target key start
LH: loop header
LB: loop body
LE: loop exit
PB: predicated region body
PF: predicated region fallthrough
CT: control target
= control target key end

     0   :  { %14 = vsyncpa [#allocation3], 0  ;;  %vm352_vm0 = vcmask 1041408   ;;  %vm255_vm1 = vcmask 31744   ;;  %s6652_s0 = inlined_call_operand.vmem [shape: bf16[512,4], index: 0, kind: input, shape index: {}]   ;;  %s6653_s1 = inlined_call_operand.vmem [shape: bf16[4,128], index: 1, kind: input, shape index: {}]   ;;  %s6654_s2 = inlined_call_operand.vmem [shape: bf16[128,512], index: 2, kind: input, shape index: {}]   ;;  %s6655_s3 = inlined_call_operand.vmem [shape: f32[1,512], index: 3, kind: input, shape index: {}]   ;;  %s6656_s4 = inlined_call_operand.vmem [shape: bf16[128,128], index: 4, kind: input, shape index: {}]   ;;  %s6657_s5 = inlined_call_operand.vmem [shape: f32[1,128], index: 5, kind: input, shape index: {}]   ;;  %s6658_s6 = inlined_call_operand.vmem [shape: bf16[512,128], index: 6, kind: output, shape index: {0}]   ;;  %s6659_s7 = inlined_call_operand.hbm [shape: bf16[512,128], index: 7, kind: output, shape index: {1}]   ;;  %s6660_s8 = inlined_call_operand.hbm [shape: f32[512,128], index: 8, kind: output, shape index: {2}]  }
   0x1   :  { %v94_v0 = vld [vmem:[%s6653_s1] sm:$0x3]  ;;  %v4703_v3 = vld [vmem:[%s6652_s0 + $0x8] sm:$0xff]   ;;  %v4704_v4 = vld [vmem:[%s6652_s0 + $0x10] sm:$0xff]  }
   0x2   :  { %v4702_v1 = vld [vmem:[%s6652_s0] sm:$0xff]   ;;  %4694 = vmatprep.subr.msk.bf16.mxu0 %vm352_vm0, %v94_v0  ;;  %v354_v2 = vsel %vm352_vm0, %v94_v0, 0  ;;  %v4705_v5 = vld [vmem:[%s6652_s0 + $0x18] sm:$0xff]   ;;  %v4707_v9 = vld [vmem:[%s6652_s0 + $0x28] sm:$0xff]  }
   0x3   :  { %4533 = vmatpush3.bf16.msra.mxu0 %v354_v2  ;;  %4534 = vmatprep.mubr.msk.bf16.mxu0 %vm255_vm1, %v4702_v1  ;;  %v4706_v6 = vld [vmem:[%s6652_s0 + $0x20] sm:$0xff]   ;;  %v4716_v7 = vld [vmem:[%s6654_s2 + $0x8] ss:$16 sps:$4 sm:$0xff]   ;;  %v4718_v8 = vld [vmem:[%s6654_s2 + $0xc] ss:$16 sps:$4 sm:$0xff]  }
   0x4   :  { %v4708_v10 = vld [vmem:[%s6652_s0 + $0x30] sm:$0xff]   ;;  %1175 = vmatprep.subr.bf16.mxu0 %v4718_v8  ;;  %v4721_v11 = vld [vmem:[%s6654_s2 + $0x28] ss:$16 sps:$4 sm:$0xff]   ;;  %v4723_v12 = vld [vmem:[%s6654_s2 + $0x2c] ss:$16 sps:$4 sm:$0xff]  }
   0x5   :  { %v4726_v13 = vld [vmem:[%s6654_s2 + $0x48] ss:$16 sps:$4 sm:$0xff]   ;;  %v4728_v14 = vld [vmem:[%s6654_s2 + $0x4c] ss:$16 sps:$4 sm:$0xff]   ;;  %v4710_v16 = vld [vmem:[%s6652_s0 + $0x40] sm:$0xff]  }
   0x6   :  { %4535 = vmatmul.mubr.msk.bf16.vlgmr.msra.gmra.mrb[0].mxu0 %vm255_vm1, %v4703_v3  ;;  %v4709_v15 = vld [vmem:[%s6652_s0 + $0x38] sm:$0xff]   ;;  %v4711_v21 = vld [vmem:[%s6652_s0 + $0x48] sm:$0xff]   ;;  %v4712_v22 = vld [vmem:[%s6652_s0 + $0x50] sm:$0xff]  }
   0x7   :  { %4538 = vmatprep.mubr.msk.bf16.mxu0 %vm255_vm1, %v4704_v4  ;;  %1176 = vmatpush1.bf16.msra.mxu0 %v4716_v7  ;;  %v4733_v17 = vld [vmem:[%s6654_s2 + $0x6c] ss:$16 sps:$4 sm:$0xff]   ;;  %v4731_v18 = vld [vmem:[%s6654_s2 + $0x68] ss:$16 sps:$4 sm:$0xff]   ;;  %v4743_v23 = vld [vmem:[%s6654_s2 + $0x4] ss:$16 sps:$4 sm:$0xff]  }
   0x8   :  { %1177 = vmatprep.subr.bf16.mxu0 %v4723_v12  ;;  %v4738_v19 = vld [vmem:[%s6654_s2 + $0x8c] ss:$16 sps:$4 sm:$0xff]   ;;  %v4736_v20 = vld [vmem:[%s6654_s2 + $0x88] ss:$16 sps:$4 sm:$0xff]   ;;  %v4748_v26 = vld [vmem:[%s6654_s2] ss:$16 sps:$4 sm:$0xff]   ;;  %886 = vmatprep.subr.bf16.mxu1 %v4743_v23 }
   0x9   :  { %v4745_v24 = vld [vmem:[%s6654_s2 + $0xa8] ss:$16 sps:$4 sm:$0xff]   ;;  %v4747_v25 = vld [vmem:[%s6654_s2 + $0xac] ss:$16 sps:$4 sm:$0xff]   ;;  %v4749_v27 = vld [vmem:[%s6654_s2 + $0x24] ss:$16 sps:$4 sm:$0xff]   ;;  %887 = vmatpush1.bf16.msra.mxu1 %v4748_v26 }
   0xa   :  { %v4751_v28 = vld [vmem:[%s6654_s2 + $0x20] ss:$16 sps:$4 sm:$0xff]   ;;  %888 = vmatprep.subr.bf16.mxu1 %v4749_v27  ;;  %v4754_v29 = vld [vmem:[%s6654_s2 + $0x44] ss:$16 sps:$4 sm:$0xff]   ;;  %v4713_v30 = vld [vmem:[%s6652_s0 + $0x58] sm:$0xff]  }
   0xb   :  { %1178 = vmatpush1.bf16.msra.mxu0 %v4721_v11  ;;  %v4714_v31 = vld [vmem:[%s6652_s0 + $0x60] sm:$0xff]   ;;  %v4764_v34 = vld [vmem:[%s6654_s2 + $0xc8] ss:$16 sps:$4 sm:$0xff]   ;;  %v4766_v36 = vld [vmem:[%s6654_s2 + $0xcc] ss:$16 sps:$4 sm:$0xff]  }
   0xc   :  { %1179 = vmatprep.subr.bf16.mxu0 %v4728_v14  ;;  %v4756_v32 = vld [vmem:[%s6654_s2 + $0x40] ss:$16 sps:$4 sm:$0xff]   ;;  %v4757_v33 = vld [vmem:[%s6654_s2 + $0x64] ss:$16 sps:$4 sm:$0xff]   ;;  %v4715_v38 = vld [vmem:[%s6652_s0 + $0x68] sm:$0xff]  }
   0xd   :  { %889 = vmatpush1.bf16.msra.mxu1 %v4751_v28  ;;  %v4759_v35 = vld [vmem:[%s6654_s2 + $0x60] ss:$16 sps:$4 sm:$0xff]   ;;  %v4762_v37 = vld [vmem:[%s6654_s2 + $0x84] ss:$16 sps:$4 sm:$0xff]   ;;  %v4720_v44 = vld [vmem:[%s6652_s0 + $0x78] sm:$0xff]  }
   0xe   :  { %4539 = vmatmul.mubr.msk.bf16.gmra.mrb[4].mxu0 %vm255_vm1, %v4705_v5  ;;  %890 = vmatprep.subr.bf16.mxu1 %v4754_v29  ;;  %v4719_v39 = vld [vmem:[%s6652_s0 + $0x70] sm:$0xff]   ;;  %v4724_v45 = vld [vmem:[%s6652_s0 + $0x80] sm:$0xff]  }
   0xf   :  { %4542 = vmatprep.mubr.msk.bf16.mxu0 %vm255_vm1, %v4706_v6  ;;  %1180 = vmatpush1.bf16.msra.mxu0 %v4726_v13  ;;  %v4767_v40 = vld [vmem:[%s6654_s2 + $0x80] ss:$16 sps:$4 sm:$0xff]   ;;  %v4768_v41 = vld [vmem:[%s6654_s2 + $0xa4] ss:$16 sps:$4 sm:$0xff]  }
  0x10   :  { %1181 = vmatprep.subr.bf16.mxu0 %v4733_v17  ;;  %v4770_v42 = vld [vmem:[%s6654_s2 + $0xa0] ss:$16 sps:$4 sm:$0xff]   ;;  %v4773_v43 = vld [vmem:[%s6654_s2 + $0xc4] ss:$16 sps:$4 sm:$0xff]  }
  0x11   :  { %891 = vmatpush1.bf16.msra.mxu1 %v4756_v32  ;;  %v4775_v46 = vld [vmem:[%s6654_s2 + $0xc0] ss:$16 sps:$4 sm:$0xff]  }
  0x12   :  { %892 = vmatprep.subr.bf16.mxu1 %v4757_v33 }
  0x13   :  { %1182 = vmatpush1.bf16.msra.mxu0 %v4731_v18 }
  0x14   :  { %1183 = vmatprep.subr.bf16.mxu0 %v4738_v19 }
  0x15   :  { %893 = vmatpush1.bf16.msra.mxu1 %v4759_v35 }
  0x16   :  { %4543 = vmatmul.mubr.msk.bf16.gmra.mrb[8].mxu0 %vm255_vm1, %v4707_v9  ;;  %894 = vmatprep.subr.bf16.mxu1 %v4762_v37 }
  0x17   :  { %4546 = vmatprep.mubr.msk.bf16.mxu0 %vm255_vm1, %v4708_v10  ;;  %1184 = vmatpush1.bf16.msra.mxu0 %v4736_v20 }
  0x18   :  { %1185 = vmatprep.subr.bf16.mxu0 %v4747_v25 }
  0x19   :  { %895 = vmatpush1.bf16.msra.mxu1 %v4767_v40 }
  0x1a   :  { %896 = vmatprep.subr.bf16.mxu1 %v4768_v41 }
  0x1b   :  { %1186 = vmatpush1.bf16.msra.mxu0 %v4745_v24 }
  0x1c   :  { %1187 = vmatprep.subr.bf16.mxu0 %v4766_v36 }
  0x1d   :  { %897 = vmatpush1.bf16.msra.mxu1 %v4770_v42 }
  0x1e   :  { %4547 = vmatmul.mubr.msk.bf16.gmra.mrb[12].mxu0 %vm255_vm1, %v4709_v15 }
  0x1f   :  { %4550 = vmatprep.mubr.msk.bf16.mxu0 %vm255_vm1, %v4710_v16  ;;  %1188 = vmatpush1.bf16.msra.mxu0 %v4764_v34 }
  0x26   :  { %4551 = vmatmul.mubr.msk.bf16.gmra.mrb[16].mxu0 %vm255_vm1, %v4711_v21 }
  0x27   :  { %4554 = vmatprep.mubr.msk.bf16.mxu0 %vm255_vm1, %v4712_v22 }
  0x2e   :  { %4555 = vmatmul.mubr.msk.bf16.gmra.mrb[20].mxu0 %vm255_vm1, %v4713_v30 }
  0x2f   :  { %4558 = vmatprep.mubr.msk.bf16.mxu0 %vm255_vm1, %v4714_v31 }
  0x36   :  { %4559 = vmatmul.mubr.msk.bf16.gmra.mrb[24].mxu0 %vm255_vm1, %v4715_v38 }
  0x37   :  { %4562 = vmatprep.mubr.msk.bf16.mxu0 %vm255_vm1, %v4719_v39 }
  0x38   :  { %15 = vsyncpa [#allocation5], 0  ;;  %898 = vmatprep.subr.bf16.mxu1 %v4773_v43  ;;  %v4725_v47 = vld [vmem:[%s6652_s0 + $0x88] sm:$0xff]   ;;  %v4729_v48 = vld [vmem:[%s6652_s0 + $0x90] sm:$0xff]   ;;  %v5222_v59 = vmov 0   ;;  %s5223_s1 = smov [#allocation2]  }
  0x39   :  { %899 = vmatpush1.bf16.msra.mxu1 %v4775_v46  ;;  %v4730_v49 = vld [vmem:[%s6652_s0 + $0x98] sm:$0xff]   ;;  %v4734_v50 = vld [vmem:[%s6652_s0 + $0xa0] sm:$0xff]   ;;  %v4735_v51 = vld [vmem:[%s6652_s0 + $0xa8] sm:$0xff]   ;;  %918 = vmatprep.mubr.bf16.mxu1 %v5222_v59  ;;  %s3623_s13 = sshll.u32 %s5223_s1, 4  ;;  %s3624_s13 = int_to_ptr.vmem [resolvable:$true] %s3623_s13 }
  0x3a   :  { %v4739_v52 = vld [vmem:[%s6652_s0 + $0xb0] sm:$0xff]   ;;  %v4780_v54 = vld [vmem:[%s6654_s2 + $0xec] ss:$16 sps:$4 sm:$0xff]   ;;  %v4778_v56 = vld [vmem:[%s6654_s2 + $0xe8] ss:$16 sps:$4 sm:$0xff]   ;;  %s5174_s16 = scalar_lea.vmem %s3624_s13, 4096  ;;  %p5179_p1 = scmp.lt.s32.totalorder %s3624_s13, %s3624_s13 }
  0x3b   :  { %v4776_v53 = vld [vmem:[%s6654_s2 + $0xe4] ss:$16 sps:$4 sm:$0xff]   ;;  %v4740_v55 = vld [vmem:[%s6652_s0 + $0xb8] sm:$0xff]   ;;  %v4781_v57 = vld [vmem:[%s6654_s2 + $0xe0] ss:$16 sps:$4 sm:$0xff]   ;;  %1189 = vmatprep.subr.bf16.mxu0 %v4780_v54  ;;  %p5175_p0 = scmp.ne.s32.totalorder %s3624_s13, %s5174_s16  ;;  %p5180_p2 = scmp.lt.s32.totalorder %s5174_s16, %s5174_s16 }
  0x3c   :  { %v4741_v58 = vld [vmem:[%s6652_s0 + $0xc0] sm:$0xff]   ;;  %900 = vmatprep.subr.bf16.mxu1 %v4776_v53  ;;  %1190 = vmatpush1.bf16.msra.mxu0 %v4778_v56  ;;  %v4742_v60 = vld [vmem:[%s6652_s0 + $0xc8] sm:$0xff]   ;;  %v4752_v61 = vld [vmem:[%s6652_s0 + $0xd0] sm:$0xff]  }
  0x3d   :  { %901 = vmatpush1.bf16.msra.mxu1 %v4781_v57  ;;  %v4753_v62 = vld [vmem:[%s6652_s0 + $0xd8] sm:$0xff]   ;;  %v4760_v63 = vld [vmem:[%s6652_s0 + $0xe0] sm:$0xff]   ;;  %v4761_v0 = vld [vmem:[%s6652_s0 + $0xe8] sm:$0xff]   ;;  %p5181_p3 = por %p5180_p2, %p5179_p1 }
  0x3e   :  { %4563 = vmatmul.mubr.msk.bf16.gmra.mrb[28].mxu0 %vm255_vm1, %v4720_v44  ;;  %v4771_v1 = vld [vmem:[%s6652_s0 + $0xf0] sm:$0xff]   ;;  %v4772_v2 = vld [vmem:[%s6652_s0 + $0xf8] sm:$0xff]   ;;  %v4782_v21 = vld [vmem:[%s6656_s4] sm:$0xff]  }
  0x3f   :  { %4566 = vmatprep.mubr.msk.bf16.mxu0 %vm255_vm1, %v4724_v45  ;;  %4678 = vmatprep.subr.bf16.mxu1 %v4782_v21  ;;  %v4783_v46 = vld [vmem:[%s6656_s4 + $0x8] sm:$0xff]   ;;  %p5182_p4 = pnand %p5181_p3, %p5175_p0 }
  0x40   :  { %4598 = vmatprep.subr.bf16.mxu0 %v4782_v21 }
  0x46   :  { %4567 = vmatmul.mubr.msk.bf16.gmra.mrb[32].mxu0 %vm255_vm1, %v4725_v47 }
  0x47   :  { %4570 = vmatprep.mubr.msk.bf16.mxu0 %vm255_vm1, %v4729_v48 }
  0x4e   :  { %4571 = vmatmul.mubr.msk.bf16.gmra.mrb[36].mxu0 %vm255_vm1, %v4730_v49 }
  0x4f   :  { %4574 = vmatprep.mubr.msk.bf16.mxu0 %vm255_vm1, %v4734_v50 }
  0x56   :  { %4575 = vmatmul.mubr.msk.bf16.gmra.mrb[40].mxu0 %vm255_vm1, %v4735_v51 }
  0x57   :  { %4578 = vmatprep.mubr.msk.bf16.mxu0 %vm255_vm1, %v4739_v52 }
  0x5e   :  { %4579 = vmatmul.mubr.msk.bf16.gmra.mrb[44].mxu0 %vm255_vm1, %v4740_v55 }
  0x5f   :  { %4582 = vmatprep.mubr.msk.bf16.mxu0 %vm255_vm1, %v4741_v58 }
  0x66   :  { %4583 = vmatmul.mubr.msk.bf16.gmra.mrb[48].mxu0 %vm255_vm1, %v4742_v60 }
  0x67   :  { %4586 = vmatprep.mubr.msk.bf16.mxu0 %vm255_vm1, %v4752_v61 }
  0x6e   :  { %4587 = vmatmul.mubr.msk.bf16.gmra.mrb[52].mxu0 %vm255_vm1, %v4753_v62 }
  0x6f   :  { %4590 = vmatprep.mubr.msk.bf16.mxu0 %vm255_vm1, %v4760_v63 }
  0x76   :  { %4591 = vmatmul.mubr.msk.bf16.gmra.mrb[56].mxu0 %vm255_vm1, %v4761_v0 }
  0x77   :  { %4594 = vmatprep.mubr.msk.bf16.mxu0 %vm255_vm1, %v4771_v1 }
  0x7e   :  { %4595 = vmatmul.mubr.msk.bf16.gmra.mrb[60].mxu0 %vm255_vm1, %v4772_v2 }
  0x7f   :  { %1207 = vmatprep.mubr.bf16.mxu0 %v5222_v59 }
  0xd9   :  { %v4536_v3 = vpop.f32.mrb[0].mxu0 }
  0xda   :  { %v390_v4 = vpop.f32.mrb[1].mxu0 }
  0xdb   :  { %v4537_v5 = vpop.f32.mrb[2].mxu0 }
  0xdc   :  { %v646_v6 = vpack.c.bf16 %v4537_v5, %v4536_v3  ;;  %v393_v7 = vpop.f32.mrb[3].mxu0 }
  0xdd   :  { %v645_v8 = vpack.c.bf16 %v393_v7, %v390_v4 }
  0xdf   :  { %919 = vmatmul.mubr.bf16.vlgmr.msra.gmra.mrb[0].mxu1 %v645_v8  ;;  %1208 = vmatmul.mubr.bf16.vlgmr.msra.gmra.mrb[64].mxu0 %v645_v8 }
  0xe0   :  { %926 = vmatprep.mubr.bf16.mxu1 %v5222_v59  ;;  %1217 = vmatprep.mubr.bf16.mxu0 %v5222_v59 }
  0xe1   :  { %v4540_v9 = vpop.f32.mrb[4].mxu0  ;;  %4686 = vmatpush3.bf16.msra.mxu1 %v4782_v21  ;;  %4599 = vmatpush3.bf16.msra.mxu0 %v4782_v21 }
  0xe2   :  { %v406_v10 = vpop.f32.mrb[5].mxu0  ;;  %4679 = vmatprep.subr.bf16.mxu1 %v4783_v46  ;;  %4600 = vmatprep.subr.bf16.mxu0 %v4783_v46 }
  0xe3   :  { %v4541_v11 = vpop.f32.mrb[6].mxu0 }
  0xe4   :  { %v648_v12 = vpack.c.bf16 %v4541_v11, %v4540_v9  ;;  %v409_v13 = vpop.f32.mrb[7].mxu0 }
  0xe5   :  { %v647_v14 = vpack.c.bf16 %v409_v13, %v406_v10  ;;  %4687 = vmatpush3.bf16.msra.mxu1 %v4783_v46  ;;  %4601 = vmatpush3.bf16.msra.mxu0 %v4783_v46 }
  0xe7   :  { %927 = vmatmul.mubr.bf16.gmra.mrb[4].mxu1 %v646_v6  ;;  %1218 = vmatmul.mubr.bf16.gmra.mrb[68].mxu0 %v646_v6 }
  0xe8   :  { %934 = vmatprep.mubr.bf16.mxu1 %v5222_v59  ;;  %1227 = vmatprep.mubr.bf16.mxu0 %v5222_v59 }
  0xe9   :  { %v4544_v15 = vpop.f32.mrb[8].mxu0 }
  0xea   :  { %v422_v16 = vpop.f32.mrb[9].mxu0 }
  0xeb   :  { %v4545_v17 = vpop.f32.mrb[10].mxu0 }
  0xec   :  { %v650_v18 = vpack.c.bf16 %v4545_v17, %v4544_v15  ;;  %v425_v19 = vpop.f32.mrb[11].mxu0 }
  0xed   :  { %v649_v20 = vpack.c.bf16 %v425_v19, %v422_v16 }
  0xef   :  { %935 = vmatmul.mubr.bf16.gmra.mrb[8].mxu1 %v647_v14  ;;  %1228 = vmatmul.mubr.bf16.gmra.mrb[72].mxu0 %v647_v14 }
  0xf0   :  { %942 = vmatprep.mubr.bf16.mxu1 %v5222_v59  ;;  %1237 = vmatprep.mubr.bf16.mxu0 %v5222_v59 }
  0xf1   :  { %v4548_v22 = vpop.f32.mrb[12].mxu0 }
  0xf2   :  { %v438_v23 = vpop.f32.mrb[13].mxu0 }
  0xf3   :  { %v4549_v24 = vpop.f32.mrb[14].mxu0 }
  0xf4   :  { %v652_v25 = vpack.c.bf16 %v4549_v24, %v4548_v22  ;;  %v441_v26 = vpop.f32.mrb[15].mxu0 }
  0xf5   :  { %v651_v27 = vpack.c.bf16 %v441_v26, %v438_v23 }
  0xf7   :  { %943 = vmatmul.mubr.bf16.gmra.mrb[12].mxu1 %v648_v12  ;;  %1238 = vmatmul.mubr.bf16.gmra.mrb[76].mxu0 %v648_v12 }
  0xf8   :  { %950 = vmatprep.mubr.bf16.mxu1 %v5222_v59  ;;  %1247 = vmatprep.mubr.bf16.mxu0 %v5222_v59 }
  0xf9   :  { %v4552_v28 = vpop.f32.mrb[16].mxu0 }
  0xfa   :  { %v454_v29 = vpop.f32.mrb[17].mxu0 }
  0xfb   :  { %v4553_v30 = vpop.f32.mrb[18].mxu0 }
  0xfc   :  { %v654_v31 = vpack.c.bf16 %v4553_v30, %v4552_v28  ;;  %v457_v32 = vpop.f32.mrb[19].mxu0 }
  0xfd   :  { %v653_v33 = vpack.c.bf16 %v457_v32, %v454_v29 }
  0xff   :  { %951 = vmatmul.mubr.bf16.gmra.mrb[16].mxu1 %v649_v20  ;;  %1248 = vmatmul.mubr.bf16.gmra.mrb[80].mxu0 %v649_v20 }
 0x100   :  { %958 = vmatprep.mubr.bf16.mxu1 %v5222_v59  ;;  %1257 = vmatprep.mubr.bf16.mxu0 %v5222_v59 }
 0x101   :  { %v4556_v34 = vpop.f32.mrb[20].mxu0 }
 0x102   :  { %v470_v35 = vpop.f32.mrb[21].mxu0 }
 0x103   :  { %v4557_v36 = vpop.f32.mrb[22].mxu0 }
 0x104   :  { %v5516_v37 = vpack.c.bf16 %v4557_v36, %v4556_v34  ;;  %v473_v38 = vpop.f32.mrb[23].mxu0 }
 0x105   :  { %v655_v39 = vpack.c.bf16 %v473_v38, %v470_v35  ;;  %v4784_v38 = vld [vmem:[%s6656_s4 + $0x10] sm:$0xff]  }
 0x106   :  { %4680 = vmatprep.subr.bf16.mxu1 %v4784_v38  ;;  %4602 = vmatprep.subr.bf16.mxu0 %v4784_v38 }
 0x107   :  { %959 = vmatmul.mubr.bf16.gmra.mrb[20].mxu1 %v650_v18  ;;  %1258 = vmatmul.mubr.bf16.gmra.mrb[84].mxu0 %v650_v18 }
 0x108   :  { %966 = vmatprep.mubr.bf16.mxu1 %v5222_v59  ;;  %1267 = vmatprep.mubr.bf16.mxu0 %v5222_v59 }
 0x109   :  { %v4560_v40 = vpop.f32.mrb[24].mxu0  ;;  %4688 = vmatpush3.bf16.msra.mxu1 %v4784_v38  ;;  %4603 = vmatpush3.bf16.msra.mxu0 %v4784_v38 }
 0x10a   :  { %v486_v41 = vpop.f32.mrb[25].mxu0 }
 0x10b   :  { %v4561_v42 = vpop.f32.mrb[26].mxu0 }
 0x10c   :  { %v5520_v43 = vpack.c.bf16 %v4561_v42, %v4560_v40  ;;  %v489_v44 = vpop.f32.mrb[27].mxu0  ;;  %v4786_v40 = vld [vmem:[%s6656_s4 + $0x20] sm:$0xff]   ;;  %v4788_v42 = vld [vmem:[%s6656_s4 + $0x30] sm:$0xff]  }
 0x10d   :  { %v5522_v45 = vpack.c.bf16 %v489_v44, %v486_v41  ;;  %v4787_v41 = vld [vmem:[%s6656_s4 + $0x28] sm:$0xff]   ;;  %v711_v44 = vlaneseq }
 0x10f   :  { %967 = vmatmul.mubr.bf16.gmra.mrb[24].mxu1 %v651_v27  ;;  %1268 = vmatmul.mubr.bf16.gmra.mrb[88].mxu0 %v651_v27 }
 0x110   :  { %974 = vmatprep.mubr.bf16.mxu1 %v5222_v59  ;;  %1277 = vmatprep.mubr.bf16.mxu0 %v5222_v59 }
 0x111   :  { %v4564_v47 = vpop.f32.mrb[28].mxu0 }
 0x112   :  { %v502_v48 = vpop.f32.mrb[29].mxu0 }
 0x113   :  { %v4565_v49 = vpop.f32.mrb[30].mxu0 }
 0x114   :  { %v5529_v50 = vpack.c.bf16 %v4565_v49, %v4564_v47  ;;  %v505_v51 = vpop.f32.mrb[31].mxu0 }
 0x115   :  { %v5531_v52 = vpack.c.bf16 %v505_v51, %v502_v48  ;;  %v709_v48 = vld [vmem:[%s6655_s3] sm:$0xf] }
 0x117   :  { %975 = vmatmul.mubr.bf16.gmra.mrb[28].mxu1 %v652_v25  ;;  %1278 = vmatmul.mubr.bf16.gmra.mrb[92].mxu0 %v652_v25 }
 0x118   :  { %982 = vmatprep.mubr.bf16.mxu1 %v5222_v59  ;;  %1287 = vmatprep.mubr.bf16.mxu0 %v5222_v59 }
 0x119   :  { %v4568_v53 = vpop.f32.mrb[32].mxu0 }
 0x11a   :  { %v518_v54 = vpop.f32.mrb[33].mxu0 }
 0x11b   :  { %v4569_v55 = vpop.f32.mrb[34].mxu0 }
 0x11c   :  { %v5535_v56 = vpack.c.bf16 %v4569_v55, %v4568_v53  ;;  %v521_v57 = vpop.f32.mrb[35].mxu0 }
 0x11d   :  { %v5537_v58 = vpack.c.bf16 %v521_v57, %v518_v54 }
 0x11f   :  { %983 = vmatmul.mubr.bf16.gmra.mrb[32].mxu1 %v653_v33  ;;  %1288 = vmatmul.mubr.bf16.gmra.mrb[96].mxu0 %v653_v33 }
 0x120   :  { %990 = vmatprep.mubr.bf16.mxu1 %v5222_v59  ;;  %1297 = vmatprep.mubr.bf16.mxu0 %v5222_v59 }
 0x121   :  { %v4572_v60 = vpop.f32.mrb[36].mxu0 }
 0x122   :  { %v534_v61 = vpop.f32.mrb[37].mxu0 }
 0x123   :  { %v4573_v62 = vpop.f32.mrb[38].mxu0 }
 0x124   :  { %v5541_v63 = vpack.c.bf16 %v4573_v62, %v4572_v60  ;;  %v537_v0 = vpop.f32.mrb[39].mxu0 }
 0x125   :  { %v5543_v1 = vpack.c.bf16 %v537_v0, %v534_v61 }
 0x127   :  { %991 = vmatmul.mubr.bf16.gmra.mrb[36].mxu1 %v654_v31  ;;  %1298 = vmatmul.mubr.bf16.gmra.mrb[100].mxu0 %v654_v31 }
 0x128   :  { %998 = vmatprep.mubr.bf16.mxu1 %v5222_v59  ;;  %1307 = vmatprep.mubr.bf16.mxu0 %v5222_v59 }
 0x129   :  { %v4576_v2 = vpop.f32.mrb[40].mxu0 }
 0x12a   :  { %v550_v3 = vpop.f32.mrb[41].mxu0 }
 0x12b   :  { %v4577_v4 = vpop.f32.mrb[42].mxu0 }
 0x12c   :  { %v5547_v5 = vpack.c.bf16 %v4577_v4, %v4576_v2  ;;  %v553_v6 = vpop.f32.mrb[43].mxu0 }
 0x12d   :  { %v5549_v7 = vpack.c.bf16 %v553_v6, %v550_v3 }
 0x12f   :  { %999 = vmatmul.mubr.bf16.gmra.mrb[40].mxu1 %v655_v39  ;;  %1308 = vmatmul.mubr.bf16.gmra.mrb[104].mxu0 %v655_v39  ;;  %v4785_v39 = vld [vmem:[%s6656_s4 + $0x18] sm:$0xff]  }
 0x130   :  { %1006 = vmatprep.mubr.bf16.mxu1 %v5222_v59  ;;  %1317 = vmatprep.mubr.bf16.mxu0 %v5222_v59 }
 0x131   :  { %v4580_v8 = vpop.f32.mrb[44].mxu0  ;;  %4681 = vmatprep.subr.bf16.mxu1 %v4785_v39  ;;  %4604 = vmatprep.subr.bf16.mxu0 %v4785_v39 }
 0x132   :  { %v566_v9 = vpop.f32.mrb[45].mxu0  ;;  %4689 = vmatpush3.bf16.msra.mxu1 %v4785_v39  ;;  %4605 = vmatpush3.bf16.msra.mxu0 %v4785_v39 }
 0x133   :  { %v4581_v10 = vpop.f32.mrb[46].mxu0  ;;  %4606 = vmatprep.subr.bf16.mxu0 %v4786_v40  ;;  %4682 = vmatprep.subr.bf16.mxu1 %v4786_v40 }
 0x134   :  { %v5553_v11 = vpack.c.bf16 %v4581_v10, %v4580_v8  ;;  %v569_v12 = vpop.f32.mrb[47].mxu0 }
 0x135   :  { %v5555_v13 = vpack.c.bf16 %v569_v12, %v566_v9 }
 0x136   :  { %4607 = vmatpush3.bf16.msra.mxu0 %v4786_v40  ;;  %4690 = vmatpush3.bf16.msra.mxu1 %v4786_v40 }
 0x137   :  { %1007 = vmatmul.mubr.bf16.gmra.mrb[44].mxu1 %v5516_v37  ;;  %1318 = vmatmul.mubr.bf16.gmra.mrb[108].mxu0 %v5516_v37 }
 0x138   :  { %1014 = vmatprep.mubr.bf16.mxu1 %v5222_v59  ;;  %1327 = vmatprep.mubr.bf16.mxu0 %v5222_v59 }
 0x139   :  { %v4584_v14 = vpop.f32.mrb[48].mxu0  ;;  %4608 = vmatprep.subr.bf16.mxu0 %v4787_v41  ;;  %4683 = vmatprep.subr.bf16.mxu1 %v4787_v41 }
 0x13a   :  { %v582_v15 = vpop.f32.mrb[49].mxu0  ;;  %4609 = vmatpush3.bf16.msra.mxu0 %v4787_v41  ;;  %4691 = vmatpush3.bf16.msra.mxu1 %v4787_v41 }
 0x13b   :  { %v4585_v16 = vpop.f32.mrb[50].mxu0  ;;  %4610 = vmatprep.subr.bf16.mxu0 %v4788_v42  ;;  %4684 = vmatprep.subr.bf16.mxu1 %v4788_v42 }
 0x13c   :  { %v5561_v17 = vpack.c.bf16 %v4585_v16, %v4584_v14  ;;  %v585_v18 = vpop.f32.mrb[51].mxu0 }
 0x13d   :  { %v5563_v19 = vpack.c.bf16 %v585_v18, %v582_v15 }
 0x13e   :  { %4611 = vmatpush3.bf16.msra.mxu0 %v4788_v42  ;;  %4692 = vmatpush3.bf16.msra.mxu1 %v4788_v42 }
 0x13f   :  { %1015 = vmatmul.mubr.bf16.gmra.mrb[48].mxu1 %v5522_v45  ;;  %1328 = vmatmul.mubr.bf16.gmra.mrb[112].mxu0 %v5522_v45  ;;  %v712_v45 = vshrl.u32 %v711_v44, 7 }
 0x140   :  { %1022 = vmatprep.mubr.bf16.mxu1 %v5222_v59  ;;  %1337 = vmatprep.mubr.bf16.mxu0 %v5222_v59 }
 0x141   :  { %v4588_v20 = vpop.f32.mrb[52].mxu0  ;;  %v713_v46 = vsub.s32 0, %v712_v45  ;;  %v717_v47 = vsub.s32 2, %v712_v45  ;;  %v721_v49 = vsub.s32 3, %v712_v45 }
 0x142   :  { %v598_v21 = vpop.f32.mrb[53].mxu0 }
 0x143   :  { %v4589_v22 = vpop.f32.mrb[54].mxu0  ;;  %v5660_v51 = vrot.slane %v709_v48, %v717_v47  ;;  %v5662_v54 = vrot.slane %v709_v48, %v721_v49 }
 0x144   :  { %v5569_v23 = vpack.c.bf16 %v4589_v22, %v4588_v20  ;;  %v601_v24 = vpop.f32.mrb[55].mxu0 }
 0x145   :  { %v5571_v25 = vpack.c.bf16 %v601_v24, %v598_v21 }
 0x147   :  { %1023 = vmatmul.mubr.bf16.gmra.mrb[52].mxu1 %v5520_v43  ;;  %1338 = vmatmul.mubr.bf16.gmra.mrb[116].mxu0 %v5520_v43  ;;  %v4789_v43 = vld [vmem:[%s6656_s4 + $0x38] sm:$0xff]  }
 0x148   :  { %1030 = vmatprep.mubr.bf16.mxu1 %v5222_v59  ;;  %1347 = vmatprep.mubr.bf16.mxu0 %v5222_v59 }
 0x149   :  { %v4592_v26 = vpop.f32.mrb[56].mxu0  ;;  %4612 = vmatprep.subr.bf16.mxu0 %v4789_v43  ;;  %4685 = vmatprep.subr.bf16.mxu1 %v4789_v43 }
 0x14a   :  { %v614_v27 = vpop.f32.mrb[57].mxu0  ;;  %4613 = vmatpush3.bf16.msra.mxu0 %v4789_v43  ;;  %4693 = vmatpush3.bf16.msra.mxu1 %v4789_v43 }
 0x14b   :  { %v4593_v28 = vpop.f32.mrb[58].mxu0 }
 0x14c   :  { %v5577_v29 = vpack.c.bf16 %v4593_v28, %v4592_v26  ;;  %v617_v30 = vpop.f32.mrb[59].mxu0 }
 0x14d   :  { %v5579_v31 = vpack.c.bf16 %v617_v30, %v614_v27 }
 0x14f   :  { %1031 = vmatmul.mubr.bf16.gmra.mrb[56].mxu1 %v5531_v52  ;;  %1348 = vmatmul.mubr.bf16.gmra.mrb[120].mxu0 %v5531_v52 }
 0x150   :  { %1038 = vmatprep.mubr.bf16.mxu1 %v5222_v59  ;;  %1357 = vmatprep.mubr.bf16.mxu0 %v5222_v59 }
 0x151   :  { %v4596_v32 = vpop.f32.mrb[60].mxu0 }
 0x152   :  { %v630_v33 = vpop.f32.mrb[61].mxu0 }
 0x153   :  { %v4597_v34 = vpop.f32.mrb[62].mxu0 }
 0x154   :  { %v5585_v35 = vpack.c.bf16 %v4597_v34, %v4596_v32  ;;  %v633_v36 = vpop.f32.mrb[63].mxu0 }
 0x155   :  { %v5587_v37 = vpack.c.bf16 %v633_v36, %v630_v33 }
 0x157   :  { %1039 = vmatmul.mubr.bf16.gmra.mrb[60].mxu1 %v5529_v50  ;;  %1358 = vmatmul.mubr.bf16.gmra.mrb[124].mxu0 %v5529_v50  ;;  %v5658_v50 = vrot.slane %v709_v48, %v713_v46 }
 0x158   :  { %1046 = vmatprep.mubr.bf16.mxu1 %v5222_v59  ;;  %1367 = vmatprep.mubr.bf16.mxu0 %v5222_v59 }
 0x15f   :  { %1047 = vmatmul.mubr.bf16.gmra.mrb[64].mxu1 %v5537_v58  ;;  %1368 = vmatmul.mubr.bf16.gmra.mrb[128].mxu0 %v5537_v58 }
 0x160   :  { %1054 = vmatprep.mubr.bf16.mxu1 %v5222_v59  ;;  %1377 = vmatprep.mubr.bf16.mxu0 %v5222_v59 }
 0x167   :  { %1055 = vmatmul.mubr.bf16.gmra.mrb[68].mxu1 %v5535_v56  ;;  %1378 = vmatmul.mubr.bf16.gmra.mrb[132].mxu0 %v5535_v56 }
 0x168   :  { %1062 = vmatprep.mubr.bf16.mxu1 %v5222_v59  ;;  %1387 = vmatprep.mubr.bf16.mxu0 %v5222_v59 }
 0x16f   :  { %1063 = vmatmul.mubr.bf16.gmra.mrb[72].mxu1 %v5543_v1  ;;  %1388 = vmatmul.mubr.bf16.gmra.mrb[136].mxu0 %v5543_v1 }
 0x170   :  { %1070 = vmatprep.mubr.bf16.mxu1 %v5222_v59  ;;  %1397 = vmatprep.mubr.bf16.mxu0 %v5222_v59 }
 0x177   :  { %1071 = vmatmul.mubr.bf16.gmra.mrb[76].mxu1 %v5541_v63  ;;  %1398 = vmatmul.mubr.bf16.gmra.mrb[140].mxu0 %v5541_v63 }
 0x178   :  { %1078 = vmatprep.mubr.bf16.mxu1 %v5222_v59  ;;  %1407 = vmatprep.mubr.bf16.mxu0 %v5222_v59 }
 0x17f   :  { %1079 = vmatmul.mubr.bf16.gmra.mrb[80].mxu1 %v5549_v7  ;;  %1408 = vmatmul.mubr.bf16.gmra.mrb[144].mxu0 %v5549_v7 }
 0x180   :  { %1086 = vmatprep.mubr.bf16.mxu1 %v5222_v59  ;;  %1417 = vmatprep.mubr.bf16.mxu0 %v5222_v59 }
 0x187   :  { %1087 = vmatmul.mubr.bf16.gmra.mrb[84].mxu1 %v5547_v5  ;;  %1418 = vmatmul.mubr.bf16.gmra.mrb[148].mxu0 %v5547_v5 }
 0x188   :  { %1094 = vmatprep.mubr.bf16.mxu1 %v5222_v59  ;;  %1427 = vmatprep.mubr.bf16.mxu0 %v5222_v59 }
 0x18f   :  { %1095 = vmatmul.mubr.bf16.gmra.mrb[88].mxu1 %v5555_v13  ;;  %1428 = vmatmul.mubr.bf16.gmra.mrb[152].mxu0 %v5555_v13 }
 0x190   :  { %1102 = vmatprep.mubr.bf16.mxu1 %v5222_v59  ;;  %1437 = vmatprep.mubr.bf16.mxu0 %v5222_v59 }
 0x197   :  { %1103 = vmatmul.mubr.bf16.gmra.mrb[92].mxu1 %v5553_v11  ;;  %1438 = vmatmul.mubr.bf16.gmra.mrb[156].mxu0 %v5553_v11 }
 0x198   :  { %1110 = vmatprep.mubr.bf16.mxu1 %v5222_v59  ;;  %1447 = vmatprep.mubr.bf16.mxu0 %v5222_v59 }
 0x19f   :  { %1111 = vmatmul.mubr.bf16.gmra.mrb[96].mxu1 %v5563_v19  ;;  %1448 = vmatmul.mubr.bf16.gmra.mrb[160].mxu0 %v5563_v19 }
 0x1a0   :  { %1118 = vmatprep.mubr.bf16.mxu1 %v5222_v59  ;;  %1457 = vmatprep.mubr.bf16.mxu0 %v5222_v59 }
 0x1a7   :  { %1119 = vmatmul.mubr.bf16.gmra.mrb[100].mxu1 %v5561_v17  ;;  %1458 = vmatmul.mubr.bf16.gmra.mrb[164].mxu0 %v5561_v17 }
 0x1a8   :  { %1126 = vmatprep.mubr.bf16.mxu1 %v5222_v59  ;;  %1467 = vmatprep.mubr.bf16.mxu0 %v5222_v59 }
 0x1af   :  { %1127 = vmatmul.mubr.bf16.gmra.mrb[104].mxu1 %v5571_v25  ;;  %1468 = vmatmul.mubr.bf16.gmra.mrb[168].mxu0 %v5571_v25 }
 0x1b0   :  { %1134 = vmatprep.mubr.bf16.mxu1 %v5222_v59  ;;  %1477 = vmatprep.mubr.bf16.mxu0 %v5222_v59 }
 0x1b2   :  { %v920_v52 = vpop.f32.mrb[0].mxu1  ;;  %v1209_v53 = vpop.f32.mrb[64].mxu0 }
 0x1b3   :  { %v922_v55 = vpop.f32.mrb[1].mxu1  ;;  %v1211_v56 = vpop.f32.mrb[65].mxu0  ;;  %v921_v60 = vadd.f32 %v920_v52, %v5658_v50  ;;  %v1210_v61 = vadd.f32 %v1209_v53, %v5660_v51 }
 0x1b4   :  { %v923_v57 = vpop.f32.mrb[2].mxu1  ;;  %v1213_v58 = vpop.f32.mrb[66].mxu0  ;;  %v1212_v2 = vadd.f32 %v1211_v56, %v5662_v54 }
 0x1b5   :  { %v924_v62 = vadd.f32 %v923_v57, %v5658_v50  ;;  %v1214_v63 = vadd.f32 %v1213_v58, %v5660_v51  ;;  %v925_v0 = vpop.f32.mrb[3].mxu1  ;;  %v1215_v1 = vpop.f32.mrb[67].mxu0 }
 0x1b6   :  { %v1216_v3 = vadd.f32 %v1215_v1, %v5662_v54 }
 0x1b7   :  { %v1528_v4 = vpack.c.bf16 %v924_v62, %v921_v60  ;;  %v1529_v5 = vpack.c.bf16 %v1214_v63, %v1210_v61  ;;  %1135 = vmatmul.mubr.bf16.gmra.mrb[108].mxu1 %v5569_v23  ;;  %1478 = vmatmul.mubr.bf16.gmra.mrb[172].mxu0 %v5569_v23 }
 0x1b8   :  { %v1530_v6 = vpack.c.bf16 %v1216_v3, %v1212_v2  ;;  %1142 = vmatprep.mubr.bf16.mxu1 %v5222_v59  ;;  %1487 = vmatprep.mubr.bf16.mxu0 %v5222_v59 }
 0x1b9   :  { %v3748_v7 = vmul.bf16 3216621497, %v1528_v4 }
 0x1ba   :  { %v3780_v8 = vmul.bf16 3216621497, %v1530_v6  ;;  %v928_v9 = vpop.f32.mrb[4].mxu1  ;;  %v1219_v10 = vpop.f32.mrb[68].mxu0 }
 0x1bb   :  { %4790 = vpow.bf16 %v3748_v7  ;;  %v930_v11 = vpop.f32.mrb[5].mxu1  ;;  %v1221_v12 = vpop.f32.mrb[69].mxu0  ;;  %v929_v15 = vadd.f32 %v928_v9, %v5658_v50  ;;  %v1220_v16 = vadd.f32 %v1219_v10, %v5660_v51 }
 0x1bc   :  { %4792 = vpow.bf16 %v3780_v8  ;;  %v931_v13 = vpop.f32.mrb[6].mxu1  ;;  %v1223_v14 = vpop.f32.mrb[70].mxu0  ;;  %v1222_v21 = vadd.f32 %v1221_v12, %v5662_v54 }
 0x1bd   :  { %v932_v17 = vadd.f32 %v931_v13, %v5658_v50  ;;  %v1224_v18 = vadd.f32 %v1223_v14, %v5660_v51  ;;  %v933_v19 = vpop.f32.mrb[7].mxu1  ;;  %v1225_v20 = vpop.f32.mrb[71].mxu0 }
 0x1be   :  { %v1226_v22 = vadd.f32 %v1225_v20, %v5662_v54 }
 0x1bf   :  { %v1531_v23 = vpack.c.bf16 %v932_v17, %v929_v15  ;;  %v1532_v24 = vpack.c.bf16 %v1224_v18, %v1220_v16  ;;  %1143 = vmatmul.mubr.bf16.gmra.mrb[112].mxu1 %v5579_v31  ;;  %1488 = vmatmul.mubr.bf16.gmra.mrb[176].mxu0 %v5579_v31 }
 0x1c0   :  { %v1533_v25 = vpack.c.bf16 %v1226_v22, %v1222_v21  ;;  %1150 = vmatprep.mubr.bf16.mxu1 %v5222_v59  ;;  %1497 = vmatprep.mubr.bf16.mxu0 %v5222_v59 }
 0x1c1   :  { %v3749_v26 = vmul.bf16 3216621497, %v1531_v23 }
 0x1c2   :  { %v3781_v27 = vmul.bf16 3216621497, %v1533_v25  ;;  %v936_v28 = vpop.f32.mrb[8].mxu1  ;;  %v1229_v30 = vpop.f32.mrb[72].mxu0 }
 0x1c3   :  { %4794 = vpow.bf16 %v3749_v26  ;;  %v938_v32 = vpop.f32.mrb[9].mxu1  ;;  %v1231_v33 = vpop.f32.mrb[73].mxu0  ;;  %v937_v38 = vadd.f32 %v936_v28, %v5658_v50  ;;  %v1230_v39 = vadd.f32 %v1229_v30, %v5660_v51 }
 0x1c4   :  { %4796 = vpow.bf16 %v3781_v27  ;;  %v939_v34 = vpop.f32.mrb[10].mxu1  ;;  %v1233_v36 = vpop.f32.mrb[74].mxu0  ;;  %v1232_v44 = vadd.f32 %v1231_v33, %v5662_v54 }
 0x1c5   :  { %v940_v31 = vadd.f32 %v939_v34, %v5658_v50  ;;  %v1234_v40 = vadd.f32 %v1233_v36, %v5660_v51  ;;  %v941_v41 = vpop.f32.mrb[11].mxu1  ;;  %v1235_v42 = vpop.f32.mrb[75].mxu0  ;;  %4798 = vtanh.bf16 %v1529_v5 }
 0x1c6   :  { %v4791_v43 = vpop.eup %4790  ;;  %v1236_v45 = vadd.f32 %v1235_v42, %v5662_v54 }
 0x1c7   :  { %v4793_v46 = vpop.eup %4792  ;;  %v1752_v47 = vadd.bf16 1065369472, %v4791_v43  ;;  %v1534_v48 = vpack.c.bf16 %v940_v31, %v937_v38  ;;  %v1535_v49 = vpack.c.bf16 %v1234_v40, %v1230_v39  ;;  %1151 = vmatmul.mubr.bf16.gmra.mrb[116].mxu1 %v5577_v29  ;;  %1498 = vmatmul.mubr.bf16.gmra.mrb[180].mxu0 %v5577_v29 }
 0x1c8   :  { %v2136_v52 = vadd.bf16 1065369472, %v4793_v46  ;;  %v1536_v53 = vpack.c.bf16 %v1236_v45, %v1232_v44  ;;  %1158 = vmatprep.mubr.bf16.mxu1 %v5222_v59  ;;  %1507 = vmatprep.mubr.bf16.mxu0 %v5222_v59 }
 0x1c9   :  { %4800 = vrcp.bf16 %v1752_v47  ;;  %v3750_v55 = vmul.bf16 3216621497, %v1534_v48 }
 0x1ca   :  { %4802 = vtanh.bf16 %v1532_v24  ;;  %v3782_v56 = vmul.bf16 3216621497, %v1536_v53  ;;  %v944_v57 = vpop.f32.mrb[12].mxu1  ;;  %v1239_v58 = vpop.f32.mrb[76].mxu0 }
 0x1cb   :  { %4804 = vpow.bf16 %v3750_v55  ;;  %v946_v60 = vpop.f32.mrb[13].mxu1  ;;  %v1241_v61 = vpop.f32.mrb[77].mxu0  ;;  %v945_v29 = vadd.f32 %v944_v57, %v5658_v50  ;;  %v1240_v0 = vadd.f32 %v1239_v58, %v5660_v51 }
 0x1cc   :  { %4806 = vrcp.bf16 %v2136_v52  ;;  %v947_v62 = vpop.f32.mrb[14].mxu1  ;;  %v1243_v63 = vpop.f32.mrb[78].mxu0  ;;  %v1242_v5 = vadd.f32 %v1241_v61, %v5662_v54 }
 0x1cd   :  { %4808 = vpow.bf16 %v3782_v56  ;;  %v948_v1 = vadd.f32 %v947_v62, %v5658_v50  ;;  %v949_v2 = vpop.f32.mrb[15].mxu1  ;;  %v1245_v3 = vpop.f32.mrb[79].mxu0  ;;  %v1244_v6 = vadd.f32 %v1243_v63, %v5660_v51 }
 0x1ce   :  { %v4795_v4 = vpop.eup %4794  ;;  %4810 = vtanh.bf16 %v1535_v49  ;;  %v1246_v7 = vadd.f32 %v1245_v3, %v5662_v54 }
 0x1cf   :  { %v4797_v8 = vpop.eup %4796  ;;  %v1753_v9 = vadd.bf16 1065369472, %v4795_v4  ;;  %v1537_v10 = vpack.c.bf16 %v948_v1, %v945_v29  ;;  %1159 = vmatmul.mubr.bf16.gmra.mrb[120].mxu1 %v5587_v37  ;;  %1508 = vmatmul.mubr.bf16.gmra.mrb[184].mxu0 %v5587_v37  ;;  %v1538_v12 = vpack.c.bf16 %v1244_v6, %v1240_v0 }
 0x1d0   :  { %v2137_v11 = vadd.bf16 1065369472, %v4797_v8  ;;  %v1539_v13 = vpack.c.bf16 %v1246_v7, %v1242_v5  ;;  %1166 = vmatprep.mubr.bf16.mxu1 %v5222_v59  ;;  %1517 = vmatprep.mubr.bf16.mxu0 %v5222_v59  ;;  %v4799_v14 = vpop.eup %4798 }
 0x1d1   :  { %4812 = vrcp.bf16 %v1753_v9  ;;  %v3751_v15 = vmul.bf16 3216621497, %v1537_v10  ;;  %v1944_v22 = vunpack.c.l.bf16 %v4799_v14  ;;  %v1945_v37 = vunpack.c.h.bf16 %v4799_v14 }
 0x1d2   :  { %4814 = vrcp.bf16 %v2137_v11  ;;  %v3783_v16 = vmul.bf16 3216621497, %v1539_v13  ;;  %v952_v17 = vpop.f32.mrb[16].mxu1  ;;  %v1249_v18 = vpop.f32.mrb[80].mxu0 }
 0x1d3   :  { %4816 = vpow.bf16 %v3751_v15  ;;  %v954_v19 = vpop.f32.mrb[17].mxu1  ;;  %v1251_v20 = vpop.f32.mrb[81].mxu0  ;;  %v953_v23 = vadd.f32 %v952_v17, %v5658_v50  ;;  %v1250_v34 = vadd.f32 %v1249_v18, %v5660_v51 }
 0x1d4   :  { %v4801_v21 = vpop.eup %4800  ;;  %v955_v24 = vpop.f32.mrb[18].mxu1  ;;  %4818 = vpow.bf16 %v3783_v16  ;;  %v1252_v36 = vadd.f32 %v1251_v20, %v5662_v54 }
 0x1d5   :  { %v1253_v25 = vpop.f32.mrb[82].mxu0  ;;  %v5705_v26 = vpop.eup %4802  ;;  %v1785_v59 = vmul.bf16 1065369472, %v4801_v21  ;;  %v956_v27 = vadd.f32 %v955_v24, %v5658_v50  ;;  %4820 = vtanh.bf16 %v1538_v12 }
 0x1d6   :  { %v1254_v28 = vadd.f32 %v1253_v25, %v5660_v51  ;;  %v957_v30 = vpop.f32.mrb[19].mxu1  ;;  %v1255_v32 = vpop.f32.mrb[83].mxu0  ;;  %v1946_v58 = vunpack.c.l.bf16 %v5705_v26  ;;  %v1947_v62 = vunpack.c.h.bf16 %v5705_v26 }
 0x1d7   :  { %v4805_v33 = vpop.eup %4804  ;;  %v1256_v38 = vadd.f32 %v1255_v32, %v5662_v54  ;;  %v1848_v31 = vunpack.c.l.bf16 %v1785_v59  ;;  %v1849_v40 = vunpack.c.h.bf16 %v1785_v59  ;;  %v1540_v42 = vpack.c.bf16 %v956_v27, %v953_v23  ;;  %1167 = vmatmul.mubr.bf16.gmra.mrb[124].mxu1 %v5585_v35  ;;  %1518 = vmatmul.mubr.bf16.gmra.mrb[188].mxu0 %v5585_v35 }
 0x1d8   :  { %v5712_v39 = vpop.eup %4806  ;;  %v1754_v41 = vadd.bf16 1065369472, %v4805_v33  ;;  %v1541_v44 = vpack.c.bf16 %v1254_v28, %v1250_v34 }
 0x1d9   :  { %v4809_v43 = vpop.eup %4808  ;;  %v1542_v45 = vpack.c.bf16 %v1256_v38, %v1252_v36  ;;  %v2296_v47 = vmul.f32 %v1944_v22, %v1848_v31  ;;  %v2297_v48 = vmul.f32 %v1945_v37, %v1849_v40  ;;  %v3752_v52 = vmul.bf16 3216621497, %v1540_v42 }
 0x1da   :  { %v5716_v46 = vpop.eup %4810  ;;  %4822 = vrcp.bf16 %v1754_v41  ;;  %v2138_v49 = vadd.bf16 1065369472, %v4809_v43  ;;  %v960_v55 = vpop.f32.mrb[20].mxu1  ;;  %v2169_v1 = vmul.bf16 1065369472, %v5712_v39 }
 0x1db   :  { %4824 = vtanh.bf16 %v1541_v44  ;;  %v3784_v53 = vmul.bf16 3216621497, %v1542_v45  ;;  %v1259_v56 = vpop.f32.mrb[84].mxu0  ;;  %v2360_v57 = vpack.c.bf16 %v2297_v48, %v2296_v47  ;;  %3552 = vst [vmem:[#allocation4] sm:$0xff] %v2296_v47  ;;  %3553 = vst [vmem:[#allocation4 + $0x8] sm:$0xff] %v2297_v48  ;;  %v962_v35 = vpop.f32.mrb[21].mxu1  ;;  %v1948_v63 = vunpack.c.l.bf16 %v5716_v46 }
 0x1dc   :  { %4826 = vrcp.bf16 %v2138_v49  ;;  %v1261_v60 = vpop.f32.mrb[85].mxu0  ;;  %v4813_v61 = vpop.eup %4812  ;;  %v961_v4 = vadd.f32 %v960_v55, %v5658_v50  ;;  %v1949_v17 = vunpack.c.h.bf16 %v5716_v46  ;;  %v1260_v18 = vadd.f32 %v1259_v56, %v5660_v51 }
 0x1dd   :  { %4828 = vpow.bf16 %v3752_v52  ;;  %v963_v29 = vpop.f32.mrb[22].mxu1  ;;  %v1263_v0 = vpop.f32.mrb[86].mxu0  ;;  %v1787_v3 = vmul.bf16 1065369472, %v4813_v61  ;;  %v1262_v19 = vadd.f32 %v1261_v60, %v5662_v54  ;;  %v5729_v20 = vunpack.c.l.bf16 %v2169_v1 }
 0x1de   :  { %v4815_v2 = vpop.eup %4814  ;;  %4830 = vtanh.bf16 %v2360_v57  ;;  %v964_v5 = vadd.f32 %v963_v29, %v5658_v50  ;;  %v965_v6 = vpop.f32.mrb[23].mxu1  ;;  %v1264_v10 = vadd.f32 %v1263_v0, %v5660_v51  ;;  %v5733_v28 = vunpack.c.h.bf16 %v2169_v1 }
 0x1df   :  { %v1265_v7 = vpop.f32.mrb[87].mxu0  ;;  %v4817_v8 = vpop.eup %4816  ;;  %v2171_v9 = vmul.bf16 1065369472, %v4815_v2  ;;  %4832 = vpow.bf16 %v3784_v53  ;;  %v1850_v12 = vunpack.c.l.bf16 %v1787_v3  ;;  %v1851_v13 = vunpack.c.h.bf16 %v1787_v3 }
 0x1e0   :  { %v1266_v11 = vadd.f32 %v1265_v7, %v5662_v54  ;;  %v1755_v14 = vadd.bf16 1065369472, %v4817_v8  ;;  %v1543_v15 = vpack.c.bf16 %v964_v5, %v961_v4  ;;  %v4819_v16 = vpop.eup %4818  ;;  %v1544_v25 = vpack.c.bf16 %v1264_v10, %v1260_v18 }
 0x1e1   :  { %v5731_v21 = vpop.eup %4820  ;;  %v2298_v22 = vmul.f32 %v1946_v58, %v1850_v12  ;;  %v2299_v37 = vmul.f32 %v1947_v62, %v1851_v13  ;;  %v2139_v23 = vadd.bf16 1065369472, %v4819_v16  ;;  %v5735_v32 = vunpack.c.l.bf16 %v2171_v9 }
 0x1e2   :  { %4834 = vrcp.bf16 %v1755_v14  ;;  %v3753_v24 = vmul.bf16 3216621497, %v1543_v15  ;;  %v1545_v26 = vpack.c.bf16 %v1266_v11, %v1262_v19  ;;  %v968_v59 = vpop.f32.mrb[24].mxu1  ;;  %v1269_v27 = vpop.f32.mrb[88].mxu0  ;;  %v5737_v33 = vunpack.c.h.bf16 %v2171_v9 }
 0x1e3   :  { %v2361_v30 = vpack.c.bf16 %v2299_v37, %v2298_v22  ;;  %3554 = vst [vmem:[#allocation4 + $0x10] sm:$0xff] %v2298_v22  ;;  %3555 = vst [vmem:[#allocation4 + $0x18] sm:$0xff] %v2299_v37  ;;  %4836 = vrcp.bf16 %v2139_v23  ;;  %v970_v34 = vpop.f32.mrb[25].mxu1  ;;  %v1271_v36 = vpop.f32.mrb[89].mxu0  ;;  %v1950_v39 = vunpack.c.l.bf16 %v5731_v21  ;;  %v1951_v31 = vunpack.c.h.bf16 %v5731_v21 }
 0x1e4   :  { %4838 = vpow.bf16 %v3753_v24  ;;  %v3785_v40 = vmul.bf16 3216621497, %v1545_v26  ;;  %v971_v41 = vpop.f32.mrb[26].mxu1  ;;  %v1273_v42 = vpop.f32.mrb[90].mxu0  ;;  %v969_v45 = vadd.f32 %v968_v59, %v5658_v50  ;;  %v5751_v55 = vadd.f32 %v1269_v27, %v5660_v51 }
 0x1e5   :  { %v4823_v38 = vpop.eup %4822  ;;  %v972_v47 = vadd.f32 %v971_v41, %v5658_v50  ;;  %v5746_v48 = vadd.f32 %v1273_v42, %v5660_v51  ;;  %v973_v49 = vpop.f32.mrb[27].mxu1  ;;  %4840 = vtanh.bf16 %v2361_v30  ;;  %v1272_v56 = vadd.f32 %v1271_v36, %v5662_v54 }
 0x1e6   :  { %v5741_v43 = vpop.eup %4824  ;;  %v1789_v44 = vmul.bf16 1065369472, %v4823_v38  ;;  %v1275_v52 = vpop.f32.mrb[91].mxu0  ;;  %4842 = vpow.bf16 %v3785_v40 }
 0x1e7   :  { %v5748_v53 = vpop.eup %4826  ;;  %v1276_v57 = vadd.f32 %v1275_v52, %v5662_v54  ;;  %v1546_v61 = vpack.c.bf16 %v972_v47, %v969_v45  ;;  %4844 = vtanh.bf16 %v1544_v25  ;;  %v1547_v0 = vpack.c.bf16 %v5746_v48, %v5751_v55 }
 0x1e8   :  { %v4829_v58 = vpop.eup %4828  ;;  %v1852_v35 = vunpack.c.l.bf16 %v1789_v44  ;;  %v1853_v60 = vunpack.c.h.bf16 %v1789_v44  ;;  %v1952_v7 = vunpack.c.l.bf16 %v5741_v43  ;;  %v2173_v46 = vmul.bf16 1065369472, %v5748_v53 }
 0x1e9   :  { %v4831_v62 = vpop.eup %4830  ;;  %v1756_v29 = vadd.bf16 1065369472, %v4829_v58  ;;  %v1548_v1 = vpack.c.bf16 %v1276_v57, %v1272_v56  ;;  %v3754_v5 = vmul.bf16 3216621497, %v1546_v61  ;;  %v1953_v52 = vunpack.c.h.bf16 %v5741_v43 }
 0x1ea   :  { %v4833_v2 = vpop.eup %4832  ;;  %v2300_v3 = vmul.f32 %v1948_v63, %v1852_v35  ;;  %v2301_v4 = vmul.f32 %v1949_v17, %v1853_v60  ;;  %v2424_v6 = vunpack.c.l.bf16 %v4831_v62  ;;  %v976_v9 = vpop.f32.mrb[28].mxu1  ;;  %v2425_v11 = vunpack.c.h.bf16 %v4831_v62 }
 0x1eb   :  { %4846 = vrcp.bf16 %v1756_v29  ;;  %v2140_v8 = vadd.bf16 1065369472, %v4833_v2  ;;  %v1279_v10 = vpop.f32.mrb[92].mxu0  ;;  %v3786_v13 = vmul.bf16 3216621497, %v1548_v1  ;;  %v978_v14 = vpop.f32.mrb[29].mxu1  ;;  %v977_v16 = vadd.f32 %v976_v9, %v5658_v50 }
 0x1ec   :  { %v2362_v12 = vpack.c.bf16 %v2301_v4, %v2300_v3  ;;  %3556 = vst [vmem:[#allocation4 + $0x20] sm:$0xff] %v2300_v3  ;;  %3557 = vst [vmem:[#allocation4 + $0x28] sm:$0xff] %v2301_v4  ;;  %4848 = vpow.bf16 %v3754_v5  ;;  %v1281_v15 = vpop.f32.mrb[93].mxu0  ;;  %v1280_v17 = vadd.f32 %v1279_v10, %v5660_v51  ;;  %v979_v18 = vpop.f32.mrb[30].mxu1  ;;  %v2488_v22 = vmul.f32 %v2424_v6, %v5729_v20 }
 0x1ed   :  { %v4835_v63 = vpop.eup %4834  ;;  %v1283_v19 = vpop.f32.mrb[94].mxu0  ;;  %v2489_v37 = vmul.f32 %v2425_v11, %v5733_v28  ;;  %4850 = vrcp.bf16 %v2140_v8  ;;  %v980_v24 = vadd.f32 %v979_v18, %v5658_v50  ;;  %v1282_v30 = vadd.f32 %v1281_v15, %v5662_v54 }
 0x1ee   :  { %v1791_v23 = vmul.bf16 1065369472, %v4835_v63  ;;  %v1284_v25 = vadd.f32 %v1283_v19, %v5660_v51  ;;  %v981_v26 = vpop.f32.mrb[31].mxu1  ;;  %v1285_v59 = vpop.f32.mrb[95].mxu0  ;;  %4852 = vtanh.bf16 %v2362_v12  ;;  %v5778_v60 = vunpack.c.l.bf16 %v2173_v46 }
 0x1ef   :  { %v4837_v27 = vpop.eup %4836  ;;  %v1286_v34 = vadd.f32 %v1285_v59, %v5662_v54  ;;  %v2552_v36 = vpack.c.bf16 %v2489_v37, %v2488_v22  ;;  %4854 = vpow.bf16 %v3786_v13  ;;  %v1549_v42 = vpack.c.bf16 %v980_v24, %v977_v16 }
 0x1f0   :  { %v4839_v38 = vpop.eup %4838  ;;  %v1854_v40 = vunpack.c.l.bf16 %v1791_v23  ;;  %v1855_v20 = vunpack.c.h.bf16 %v1791_v23  ;;  %v2175_v41 = vmul.bf16 1065369472, %v4837_v27  ;;  %v1550_v44 = vpack.c.bf16 %v1284_v25, %v1280_v17 }
 0x1f1   :  { %v1757_v28 = vadd.bf16 1065369472, %v4839_v38  ;;  %v1551_v45 = vpack.c.bf16 %v1286_v34, %v1282_v30  ;;  %4614 = vmatprep.mubr.bf16.mxu0 %v2552_v36  ;;  %4241 = vst [vmem:[#allocation2] sm:$0xff] %v2552_v36   ;;  %v4841_v47 = vpop.eup %4840  ;;  %4856 = vtanh.bf16 %v1547_v0  ;;  %v3755_v57 = vmul.bf16 3216621497, %v1549_v42 }
 0x1f2   :  { %v2302_v48 = vmul.f32 %v1950_v39, %v1854_v40  ;;  %v2303_v49 = vmul.f32 %v1951_v31, %v1855_v20  ;;  %v4843_v55 = vpop.eup %4842  ;;  %v5774_v56 = vunpack.c.l.bf16 %v2175_v41  ;;  %v984_v58 = vpop.f32.mrb[32].mxu1  ;;  %v5782_v21 = vunpack.c.h.bf16 %v2175_v41 }
 0x1f3   :  { %4858 = vrcp.bf16 %v1757_v28  ;;  %v1289_v35 = vpop.f32.mrb[96].mxu0  ;;  %v5780_v61 = vpop.eup %4844  ;;  %v3787_v31 = vmul.bf16 3216621497, %v1551_v45  ;;  %v2141_v0 = vadd.bf16 1065369472, %v4843_v55  ;;  %v985_v1 = vadd.f32 %v984_v58, %v5658_v50 }
 0x1f4   :  { %v2363_v39 = vpack.c.bf16 %v2303_v49, %v2302_v48  ;;  %3558 = vst [vmem:[#allocation4 + $0x30] sm:$0xff] %v2302_v48  ;;  %3559 = vst [vmem:[#allocation4 + $0x38] sm:$0xff] %v2303_v49  ;;  %4860 = vtanh.bf16 %v1550_v44  ;;  %v986_v62 = vpop.f32.mrb[33].mxu1  ;;  %v1291_v29 = vpop.f32.mrb[97].mxu0  ;;  %v1290_v2 = vadd.f32 %v1289_v35, %v5660_v51  ;;  %v2426_v12 = vunpack.c.l.bf16 %v4841_v47 }
 0x1f5   :  { %4862 = vpow.bf16 %v3755_v57  ;;  %v987_v3 = vpop.f32.mrb[34].mxu1  ;;  %v1293_v4 = vpop.f32.mrb[98].mxu0  ;;  %v1292_v6 = vadd.f32 %v1291_v29, %v5662_v54  ;;  %v2427_v63 = vunpack.c.h.bf16 %v4841_v47  ;;  %v1954_v26 = vunpack.c.l.bf16 %v5780_v61 }
 0x1f6   :  { %v4847_v5 = vpop.eup %4846  ;;  %v988_v8 = vadd.f32 %v987_v3, %v5658_v50  ;;  %v1294_v9 = vadd.f32 %v1293_v4, %v5660_v51  ;;  %v989_v10 = vpop.f32.mrb[35].mxu1  ;;  %4864 = vtanh.bf16 %v2363_v39  ;;  %v2490_v24 = vmul.f32 %v2426_v12, %v5735_v32 }
 0x1f7   :  { %v1295_v11 = vpop.f32.mrb[99].mxu0  ;;  %v4849_v13 = vpop.eup %4848  ;;  %v1793_v14 = vmul.bf16 1065369472, %v4847_v5  ;;  %4866 = vpow.bf16 %v3787_v31  ;;  %v2491_v27 = vmul.f32 %v2427_v63, %v5737_v33  ;;  %v1955_v38 = vunpack.c.h.bf16 %v5780_v61 }
 0x1f8   :  { %v1296_v15 = vadd.f32 %v1295_v11, %v5662_v54  ;;  %v1758_v16 = vadd.bf16 1065369472, %v4849_v13  ;;  %v1552_v17 = vpack.c.bf16 %v988_v8, %v985_v1  ;;  %v1553_v18 = vpack.c.bf16 %v1294_v9, %v1290_v2  ;;  %v5790_v19 = vpop.eup %4850 }
 0x1f9   :  { %v1856_v22 = vunpack.c.l.bf16 %v1793_v14  ;;  %v1857_v37 = vunpack.c.h.bf16 %v1793_v14  ;;  %v5793_v25 = vpop.eup %4852  ;;  %v2553_v28 = vpack.c.bf16 %v2491_v27, %v2490_v24  ;;  %v2237_v48 = vunpack.c.h.bf16 %v2173_v46 }
 0x1fa   :  { %v1554_v23 = vpack.c.bf16 %v1296_v15, %v1292_v6  ;;  %4868 = vrcp.bf16 %v1758_v16  ;;  %v3756_v59 = vmul.bf16 3216621497, %v1552_v17  ;;  %v4855_v30 = vpop.eup %4854  ;;  %v992_v40 = vpop.f32.mrb[36].mxu1  ;;  %v2428_v53 = vunpack.c.l.bf16 %v5793_v25 }
 0x1fb   :  { %v2304_v34 = vmul.f32 %v1952_v7, %v1856_v22  ;;  %v2305_v36 = vmul.f32 %v1953_v52, %v1857_v37  ;;  %4870 = vrcp.bf16 %v2141_v0  ;;  %v1299_v20 = vpop.f32.mrb[100].mxu0  ;;  %v2142_v41 = vadd.bf16 1065369472, %v4855_v30  ;;  %v994_v42 = vpop.f32.mrb[37].mxu1  ;;  %4615 = vmatmul.mubr.bf16.vlgmr.msra.gmra.mrb[192].mxu0 %v2553_v28  ;;  %4428 = vst [vmem:[#allocation2 + $0x8] sm:$0xff] %v2553_v28  }
 0x1fc   :  { %4872 = vpow.bf16 %v3756_v59  ;;  %v3788_v32 = vmul.bf16 3216621497, %v1554_v23  ;;  %v1301_v44 = vpop.f32.mrb[101].mxu0  ;;  %v5800_v45 = vpop.eup %4856  ;;  %v993_v33 = vadd.f32 %v992_v40, %v5658_v50  ;;  %v1300_v52 = vadd.f32 %v1299_v20, %v5660_v51 }
 0x1fd   :  { %v2364_v47 = vpack.c.bf16 %v2305_v36, %v2304_v34  ;;  %3560 = vst [vmem:[#allocation4 + $0x40] sm:$0xff] %v2304_v34  ;;  %3561 = vst [vmem:[#allocation4 + $0x48] sm:$0xff] %v2305_v36  ;;  %4874 = vtanh.bf16 %v1553_v18  ;;  %v995_v43 = vpop.f32.mrb[38].mxu1  ;;  %v1303_v7 = vpop.f32.mrb[102].mxu0  ;;  %v1956_v62 = vunpack.c.l.bf16 %v5800_v45  ;;  %v1302_v29 = vadd.f32 %v1301_v44, %v5662_v54 }
 0x1fe   :  { %v4859_v49 = vpop.eup %4858  ;;  %4876 = vrcp.bf16 %v2142_v41  ;;  %v996_v55 = vadd.f32 %v995_v43, %v5658_v50  ;;  %v1304_v57 = vadd.f32 %v1303_v7, %v5660_v51  ;;  %v997_v58 = vpop.f32.mrb[39].mxu1  ;;  %v2429_v9 = vunpack.c.h.bf16 %v5793_v25 }
 0x1ff   :  { %v1305_v35 = vpop.f32.mrb[103].mxu0  ;;  %v5808_v61 = vpop.eup %4860  ;;  %4878 = vtanh.bf16 %v2364_v47  ;;  %v1795_v39 = vmul.bf16 1065369472, %v4859_v49  ;;  %v2492_v10 = vmul.f32 %v2428_v53, %v5778_v60  ;;  %v1957_v14 = vunpack.c.h.bf16 %v5800_v45 }
 0x200   :  { %v1306_v31 = vadd.f32 %v1305_v35, %v5662_v54  ;;  %v4863_v46 = vpop.eup %4862  ;;  %4880 = vpow.bf16 %v3788_v32  ;;  %v1555_v0 = vpack.c.bf16 %v996_v55, %v993_v33  ;;  %v1556_v4 = vpack.c.bf16 %v1304_v57, %v1300_v52 }
 0x201   :  { %v1858_v1 = vunpack.c.l.bf16 %v1795_v39  ;;  %v1859_v2 = vunpack.c.h.bf16 %v1795_v39  ;;  %v1759_v3 = vadd.bf16 1065369472, %v4863_v46  ;;  %v5814_v5 = vpop.eup %4864  ;;  %v1958_v16 = vunpack.c.l.bf16 %v5808_v61 }
 0x202   :  { %v3757_v6 = vmul.bf16 3216621497, %v1555_v0  ;;  %v1557_v8 = vpack.c.bf16 %v1306_v31, %v1302_v29  ;;  %v4867_v11 = vpop.eup %4866  ;;  %v1000_v15 = vpop.f32.mrb[40].mxu1  ;;  %v2493_v18 = vmul.f32 %v2429_v9, %v2237_v48  ;;  %v2430_v59 = vunpack.c.l.bf16 %v5814_v5 }
 0x203   :  { %v2306_v12 = vmul.f32 %v1954_v26, %v1858_v1  ;;  %v2307_v13 = vmul.f32 %v1955_v38, %v1859_v2  ;;  %4882 = vrcp.bf16 %v1759_v3  ;;  %v1309_v63 = vpop.f32.mrb[104].mxu0  ;;  %v1002_v22 = vpop.f32.mrb[41].mxu1  ;;  %v2143_v60 = vadd.bf16 1065369472, %v4867_v11 }
 0x204   :  { %4884 = vpow.bf16 %v3757_v6  ;;  %v3789_v17 = vmul.bf16 3216621497, %v1557_v8  ;;  %v1311_v37 = vpop.f32.mrb[105].mxu0  ;;  %v1003_v25 = vpop.f32.mrb[42].mxu1  ;;  %v2554_v34 = vpack.c.bf16 %v2493_v18, %v2492_v10  ;;  %v1001_v36 = vadd.f32 %v1000_v15, %v5658_v50 }
 0x205   :  { %v4869_v23 = vpop.eup %4868  ;;  %v2365_v24 = vpack.c.bf16 %v2307_v13, %v2306_v12  ;;  %3562 = vst [vmem:[#allocation4 + $0x50] sm:$0xff] %v2306_v12  ;;  %3563 = vst [vmem:[#allocation4 + $0x58] sm:$0xff] %v2307_v13  ;;  %4886 = vtanh.bf16 %v1556_v4  ;;  %v1313_v26 = vpop.f32.mrb[106].mxu0  ;;  %v1310_v38 = vadd.f32 %v1309_v63, %v5660_v51  ;;  %v1312_v32 = vadd.f32 %v1311_v37, %v5662_v54 }
 0x206   :  { %v5821_v27 = vpop.eup %4870  ;;  %v1797_v30 = vmul.bf16 1065369472, %v4869_v23  ;;  %v1005_v40 = vpop.f32.mrb[43].mxu1  ;;  %v1004_v28 = vadd.f32 %v1003_v25, %v5658_v50  ;;  %v1314_v42 = vadd.f32 %v1313_v26, %v5660_v51  ;;  %4888 = vpow.bf16 %v3789_v17  ;;  %4618 = vmatprep.mubr.bf16.mxu1 %v2554_v34  ;;  %4429 = vst [vmem:[#allocation2 + $0x10] sm:$0xff] %v2554_v34  }
 0x207   :  { %v1315_v20 = vpop.f32.mrb[107].mxu0  ;;  %v4873_v41 = vpop.eup %4872  ;;  %v1959_v48 = vunpack.c.h.bf16 %v5808_v61  ;;  %4890 = vrcp.bf16 %v2143_v60  ;;  %v2431_v53 = vunpack.c.h.bf16 %v5814_v5  ;;  %v2494_v46 = vmul.f32 %v2430_v59, %v5774_v56 }
 0x208   :  { %v1316_v44 = vadd.f32 %v1315_v20, %v5662_v54  ;;  %v5829_v45 = vpop.eup %4874  ;;  %v1860_v47 = vunpack.c.l.bf16 %v1797_v30  ;;  %v1861_v33 = vunpack.c.h.bf16 %v1797_v30  ;;  %v1760_v43 = vadd.bf16 1065369472, %v4873_v41 }
 0x209   :  { %v5831_v7 = vpop.eup %4876  ;;  %v1558_v49 = vpack.c.bf16 %v1004_v28, %v1001_v36  ;;  %v1559_v52 = vpack.c.bf16 %v1314_v42, %v1310_v38  ;;  %v2495_v6 = vmul.f32 %v2431_v53, %v5782_v21  ;;  %v2177_v22 = vmul.bf16 1065369472, %v5790_v19 }
 0x20a   :  { %v5834_v55 = vpop.eup %4878  ;;  %v2308_v57 = vmul.f32 %v1956_v62, %v1860_v47  ;;  %v2309_v58 = vmul.f32 %v1957_v14, %v1861_v33  ;;  %4892 = vrcp.bf16 %v1760_v43  ;;  %v1560_v35 = vpack.c.bf16 %v1316_v44, %v1312_v32  ;;  %v1008_v29 = vpop.f32.mrb[44].mxu1 }
 0x20b   :  { %v4881_v39 = vpop.eup %4880  ;;  %4894 = vtanh.bf16 %v2365_v24  ;;  %v3758_v31 = vmul.bf16 3216621497, %v1558_v49  ;;  %v1319_v0 = vpop.f32.mrb[108].mxu0  ;;  %v1009_v8 = vadd.f32 %v1008_v29, %v5658_v50  ;;  %v2555_v18 = vpack.c.bf16 %v2495_v6, %v2494_v46 }
 0x20c   :  { %v2366_v1 = vpack.c.bf16 %v2309_v58, %v2308_v57  ;;  %3564 = vst [vmem:[#allocation4 + $0x60] sm:$0xff] %v2308_v57  ;;  %3565 = vst [vmem:[#allocation4 + $0x68] sm:$0xff] %v2309_v58  ;;  %v2144_v2 = vadd.bf16 1065369472, %v4881_v39  ;;  %4896 = vtanh.bf16 %v1559_v52  ;;  %v3790_v3 = vmul.bf16 3216621497, %v1560_v35 }
 0x20d   :  { %v1010_v4 = vpop.f32.mrb[45].mxu1  ;;  %v1321_v62 = vpop.f32.mrb[109].mxu0  ;;  %4898 = vpow.bf16 %v3758_v31  ;;  %v1320_v9 = vadd.f32 %v1319_v0, %v5660_v51  ;;  %v1960_v59 = vunpack.c.l.bf16 %v5829_v45  ;;  %4619 = vmatmul.mubr.bf16.vlgmr.msra.gmra.mrb[128].mxu1 %v2555_v18  ;;  %4430 = vst [vmem:[#allocation2 + $0x18] sm:$0xff] %v2555_v18   ;;  %v1961_v30 = vunpack.c.h.bf16 %v5829_v45 }
 0x20e   :  { %v1011_v5 = vpop.f32.mrb[46].mxu1  ;;  %v1323_v10 = vpop.f32.mrb[110].mxu0  ;;  %4900 = vtanh.bf16 %v2366_v1  ;;  %v1322_v11 = vadd.f32 %v1321_v62, %v5662_v54  ;;  %v2240_v41 = vunpack.c.l.bf16 %v2177_v22  ;;  %v2432_v45 = vunpack.c.l.bf16 %v5834_v55 }
 0x20f   :  { %v4883_v56 = vpop.eup %4882  ;;  %v1012_v12 = vadd.f32 %v1011_v5, %v5658_v50  ;;  %v1324_v13 = vadd.f32 %v1323_v10, %v5660_v51  ;;  %v1013_v14 = vpop.f32.mrb[47].mxu1  ;;  %4902 = vrcp.bf16 %v2144_v2 }
 0x210   :  { %v1325_v15 = vpop.f32.mrb[111].mxu0  ;;  %v4885_v63 = vpop.eup %4884  ;;  %v1799_v17 = vmul.bf16 1065369472, %v4883_v56  ;;  %4904 = vpow.bf16 %v3790_v3  ;;  %v2496_v31 = vmul.f32 %v2432_v45, %v2240_v41  ;;  %v2179_v14 = vmul.bf16 1065369472, %v5821_v27 }
 0x211   :  { %v1326_v21 = vadd.f32 %v1325_v15, %v5662_v54  ;;  %v5846_v37 = vpop.eup %4886  ;;  %v1761_v23 = vadd.bf16 1065369472, %v4885_v63  ;;  %v1561_v24 = vpack.c.bf16 %v1012_v12, %v1009_v8  ;;  %v1562_v60 = vpack.c.bf16 %v1324_v13, %v1320_v9 }
 0x212   :  { %v1862_v25 = vunpack.c.l.bf16 %v1799_v17  ;;  %v1863_v26 = vunpack.c.h.bf16 %v1799_v17  ;;  %v4889_v38 = vpop.eup %4888  ;;  %v1962_v20 = vunpack.c.l.bf16 %v5846_v37  ;;  %v1016_v32 = vpop.f32.mrb[48].mxu1  ;;  %v1963_v61 = vunpack.c.h.bf16 %v5846_v37 }
 0x213   :  { %4906 = vrcp.bf16 %v1761_v23  ;;  %v3759_v34 = vmul.bf16 3216621497, %v1561_v24  ;;  %v1563_v36 = vpack.c.bf16 %v1326_v21, %v1322_v11  ;;  %v1329_v28 = vpop.f32.mrb[112].mxu0  ;;  %v5853_v42 = vpop.eup %4890  ;;  %v2145_v44 = vadd.bf16 1065369472, %v4889_v38 }
 0x214   :  { %v2310_v19 = vmul.f32 %v1958_v16, %v1862_v25  ;;  %v2311_v40 = vmul.f32 %v1959_v48, %v1863_v26  ;;  %v1018_v33 = vpop.f32.mrb[49].mxu1  ;;  %v1331_v43 = vpop.f32.mrb[113].mxu0  ;;  %v2241_v16 = vunpack.c.h.bf16 %v2177_v22  ;;  %v2433_v48 = vunpack.c.h.bf16 %v5834_v55 }
 0x215   :  { %4908 = vpow.bf16 %v3759_v34  ;;  %v3791_v47 = vmul.bf16 3216621497, %v1563_v36  ;;  %v4893_v49 = vpop.eup %4892  ;;  %v1019_v57 = vpop.f32.mrb[50].mxu1  ;;  %v1017_v53 = vadd.f32 %v1016_v32, %v5658_v50  ;;  %v1330_v2 = vadd.f32 %v1329_v28, %v5660_v51 }
 0x216   :  { %v2367_v52 = vpack.c.bf16 %v2311_v40, %v2310_v19  ;;  %3566 = vst [vmem:[#allocation4 + $0x70] sm:$0xff] %v2310_v19  ;;  %3567 = vst [vmem:[#allocation4 + $0x78] sm:$0xff] %v2311_v40  ;;  %v1333_v58 = vpop.f32.mrb[114].mxu0  ;;  %v4895_v35 = vpop.eup %4894  ;;  %v1801_v39 = vmul.bf16 1065369472, %v4893_v49  ;;  %4910 = vtanh.bf16 %v1562_v60  ;;  %v2497_v1 = vmul.f32 %v2433_v48, %v2241_v16 }
 0x217   :  { %v1021_v46 = vpop.f32.mrb[51].mxu1  ;;  %v1335_v29 = vpop.f32.mrb[115].mxu0  ;;  %4912 = vrcp.bf16 %v2145_v44  ;;  %v1332_v3 = vadd.f32 %v1331_v43, %v5662_v54  ;;  %v1020_v6 = vadd.f32 %v1019_v57, %v5658_v50  ;;  %v1334_v10 = vadd.f32 %v1333_v58, %v5660_v51 }
 0x218   :  { %v5859_v0 = vpop.eup %4896  ;;  %v1864_v55 = vunpack.c.l.bf16 %v1801_v39  ;;  %v1865_v62 = vunpack.c.h.bf16 %v1801_v39  ;;  %4914 = vpow.bf16 %v3791_v47  ;;  %v2556_v5 = vpack.c.bf16 %v2497_v1, %v2496_v31 }
 0x219   :  { %v4899_v4 = vpop.eup %4898  ;;  %v1336_v56 = vadd.f32 %v1335_v29, %v5662_v54  ;;  %v1564_v13 = vpack.c.bf16 %v1020_v6, %v1017_v53  ;;  %v1565_v63 = vpack.c.bf16 %v1334_v10, %v1330_v2  ;;  %v2434_v18 = vunpack.c.l.bf16 %v4895_v35 }
 0x21a   :  { %v5864_v8 = vpop.eup %4900  ;;  %v1762_v9 = vadd.bf16 1065369472, %v4899_v4  ;;  %v2312_v11 = vmul.f32 %v1960_v59, %v1864_v55  ;;  %v2313_v12 = vmul.f32 %v1961_v30, %v1865_v62  ;;  %4622 = vmatprep.mubr.bf16.mxu1 %v2556_v5  ;;  %4431 = vst [vmem:[#allocation2 + $0x20] sm:$0xff] %v2556_v5   ;;  %v1024_v21 = vpop.f32.mrb[52].mxu1  ;;  %v2242_v25 = vunpack.c.l.bf16 %v2179_v14 }
 0x21b   :  { %v5869_v15 = vpop.eup %4902  ;;  %v1566_v17 = vpack.c.bf16 %v1336_v56, %v1332_v3  ;;  %v1339_v22 = vpop.f32.mrb[116].mxu0  ;;  %v3760_v60 = vmul.bf16 3216621497, %v1564_v13  ;;  %v1964_v30 = vunpack.c.l.bf16 %v5859_v0  ;;  %v2243_v36 = vunpack.c.h.bf16 %v2179_v14 }
 0x21c   :  { %4916 = vrcp.bf16 %v1762_v9  ;;  %v4905_v23 = vpop.eup %4904  ;;  %v2368_v24 = vpack.c.bf16 %v2313_v12, %v2312_v11  ;;  %3568 = vst [vmem:[#allocation4 + $0x80] sm:$0xff] %v2312_v11  ;;  %3569 = vst [vmem:[#allocation4 + $0x88] sm:$0xff] %v2313_v12  ;;  %v1026_v26 = vpop.f32.mrb[53].mxu1  ;;  %v2435_v38 = vunpack.c.h.bf16 %v4895_v35  ;;  %v1965_v32 = vunpack.c.h.bf16 %v5859_v0 }
 0x21d   :  { %4918 = vtanh.bf16 %v2367_v52  ;;  %v1341_v59 = vpop.f32.mrb[117].mxu0  ;;  %v3792_v34 = vmul.bf16 3216621497, %v1566_v17  ;;  %v1027_v19 = vpop.f32.mrb[54].mxu1  ;;  %v2498_v28 = vmul.f32 %v2434_v18, %v2242_v25  ;;  %v2146_v33 = vadd.bf16 1065369472, %v4905_v23 }
 0x21e   :  { %v4907_v27 = vpop.eup %4906  ;;  %v1343_v40 = vpop.f32.mrb[118].mxu0  ;;  %4920 = vtanh.bf16 %v1565_v63  ;;  %v2499_v43 = vmul.f32 %v2435_v38, %v2243_v36  ;;  %v1025_v49 = vadd.f32 %v1024_v21, %v5658_v50  ;;  %v1340_v35 = vadd.f32 %v1339_v22, %v5660_v51 }
 0x21f   :  { %v1803_v41 = vmul.bf16 1065369472, %v4907_v27  ;;  %v1029_v44 = vpop.f32.mrb[55].mxu1  ;;  %v1345_v47 = vpop.f32.mrb[119].mxu0  ;;  %4922 = vtanh.bf16 %v2368_v24  ;;  %v1342_v39 = vadd.f32 %v1341_v59, %v5662_v54  ;;  %v1028_v29 = vadd.f32 %v1027_v19, %v5658_v50 }
 0x220   :  { %v4909_v45 = vpop.eup %4908  ;;  %4924 = vpow.bf16 %v3760_v60  ;;  %v2557_v58 = vpack.c.bf16 %v2499_v43, %v2498_v28  ;;  %v1344_v2 = vadd.f32 %v1343_v40, %v5660_v51  ;;  %v1346_v3 = vadd.f32 %v1345_v47, %v5662_v54 }
 0x221   :  { %v1866_v52 = vunpack.c.l.bf16 %v1803_v41  ;;  %v1867_v16 = vunpack.c.h.bf16 %v1803_v41  ;;  %v1763_v48 = vadd.bf16 1065369472, %v4909_v45  ;;  %v5874_v57 = vpop.eup %4910  ;;  %4926 = vpow.bf16 %v3792_v34 }
 0x222   :  { %v5878_v31 = vpop.eup %4912  ;;  %4623 = vmatmul.mubr.bf16.gmra.mrb[132].mxu1 %v2557_v58  ;;  %4432 = vst [vmem:[#allocation2 + $0x28] sm:$0xff] %v2557_v58   ;;  %v2181_v4 = vmul.bf16 1065369472, %v5831_v7  ;;  %v2436_v55 = vunpack.c.l.bf16 %v5864_v8  ;;  %v1032_v62 = vpop.f32.mrb[56].mxu1  ;;  %v1567_v37 = vpack.c.bf16 %v1028_v29, %v1025_v49  ;;  %v1568_v56 = vpack.c.bf16 %v1344_v2, %v1340_v35 }
 0x223   :  { %v2314_v53 = vmul.f32 %v1962_v20, %v1866_v52  ;;  %v2315_v46 = vmul.f32 %v1963_v61, %v1867_v16  ;;  %4928 = vrcp.bf16 %v1763_v48  ;;  %v4915_v1 = vpop.eup %4914  ;;  %v1349_v6 = vpop.f32.mrb[120].mxu0  ;;  %v2437_v61 = vunpack.c.h.bf16 %v5864_v8 }
 0x224   :  { %4930 = vrcp.bf16 %v2146_v33  ;;  %v1034_v9 = vpop.f32.mrb[57].mxu1  ;;  %v1351_v5 = vpop.f32.mrb[121].mxu0  ;;  %v2147_v10 = vadd.bf16 1065369472, %v4915_v1  ;;  %v1569_v11 = vpack.c.bf16 %v1346_v3, %v1342_v39  ;;  %v2244_v12 = vunpack.c.l.bf16 %v2181_v4 }
 0x225   :  { %v2369_v20 = vpack.c.bf16 %v2315_v46, %v2314_v53  ;;  %3570 = vst [vmem:[#allocation4 + $0x90] sm:$0xff] %v2314_v53  ;;  %3571 = vst [vmem:[#allocation4 + $0x98] sm:$0xff] %v2315_v46  ;;  %v1035_v13 = vpop.f32.mrb[58].mxu1  ;;  %v1353_v14 = vpop.f32.mrb[122].mxu0  ;;  %v1966_v63 = vunpack.c.l.bf16 %v5874_v57  ;;  %v3761_v17 = vmul.bf16 3216621497, %v1567_v37  ;;  %v2245_v18 = vunpack.c.h.bf16 %v2181_v4 }
 0x226   :  { %v1037_v21 = vpop.f32.mrb[59].mxu1  ;;  %v1355_v22 = vpop.f32.mrb[123].mxu0  ;;  %v3793_v60 = vmul.bf16 3216621497, %v1569_v11  ;;  %v2500_v8 = vmul.f32 %v2436_v55, %v2244_v12  ;;  %v1033_v25 = vadd.f32 %v1032_v62, %v5658_v50  ;;  %v5893_v59 = vadd.f32 %v1349_v6, %v5660_v51 }
 0x227   :  { %v4917_v7 = vpop.eup %4916  ;;  %4932 = vtanh.bf16 %v2369_v20  ;;  %v2501_v26 = vmul.f32 %v2437_v61, %v2245_v18  ;;  %v1036_v27 = vadd.f32 %v1035_v13, %v5658_v50  ;;  %v1352_v19 = vadd.f32 %v1351_v5, %v5662_v54 }
 0x228   :  { %v4919_v23 = vpop.eup %4918  ;;  %v1805_v24 = vmul.bf16 1065369472, %v4917_v7  ;;  %4934 = vpow.bf16 %v3761_v17  ;;  %v5902_v44 = vadd.f32 %v1353_v14, %v5660_v51  ;;  %v1356_v43 = vadd.f32 %v1355_v22, %v5662_v54 }
 0x229   :  { %v5896_v34 = vpop.eup %4920  ;;  %4936 = vrcp.bf16 %v2147_v10  ;;  %v2558_v41 = vpack.c.bf16 %v2501_v26, %v2500_v8  ;;  %v1570_v28 = vpack.c.bf16 %v1036_v27, %v1033_v25  ;;  %v2183_v39 = vmul.bf16 1065369472, %v5853_v42 }
 0x22a   :  { %v1868_v36 = vunpack.c.l.bf16 %v1805_v24  ;;  %v1869_v38 = vunpack.c.h.bf16 %v1805_v24  ;;  %v5899_v40 = vpop.eup %4922  ;;  %4938 = vtanh.bf16 %v1568_v56  ;;  %v1040_v49 = vpop.f32.mrb[60].mxu1  ;;  %v1571_v35 = vpack.c.bf16 %v5902_v44, %v5893_v59 }
 0x22b   :  { %v4925_v47 = vpop.eup %4924  ;;  %4940 = vpow.bf16 %v3793_v60  ;;  %v1359_v52 = vpop.f32.mrb[124].mxu0  ;;  %4626 = vmatprep.mubr.bf16.mxu1 %v2558_v41  ;;  %4433 = vst [vmem:[#allocation2 + $0x30] sm:$0xff] %v2558_v41   ;;  %v3762_v58 = vmul.bf16 3216621497, %v1570_v28  ;;  %v2438_v46 = vunpack.c.l.bf16 %v4919_v23  ;;  %v1967_v3 = vunpack.c.h.bf16 %v5874_v57 }
 0x22c   :  { %v2316_v45 = vmul.f32 %v1964_v30, %v1868_v36  ;;  %v2317_v33 = vmul.f32 %v1965_v32, %v1869_v38  ;;  %v4927_v16 = vpop.eup %4926  ;;  %v1764_v48 = vadd.bf16 1065369472, %v4925_v47  ;;  %v1572_v32 = vpack.c.bf16 %v1356_v43, %v1352_v19  ;;  %v1042_v29 = vpop.f32.mrb[61].mxu1 }
 0x22d   :  { %v2148_v0 = vadd.bf16 1065369472, %v4927_v16  ;;  %v1361_v1 = vpop.f32.mrb[125].mxu0  ;;  %v2246_v4 = vunpack.c.l.bf16 %v2183_v39  ;;  %v1043_v55 = vpop.f32.mrb[62].mxu1  ;;  %v2247_v20 = vunpack.c.h.bf16 %v2183_v39  ;;  %v2439_v37 = vunpack.c.h.bf16 %v4919_v23 }
 0x22e   :  { %v4929_v53 = vpop.eup %4928  ;;  %v2370_v30 = vpack.c.bf16 %v2317_v33, %v2316_v45  ;;  %3572 = vst [vmem:[#allocation4 + $0xa0] sm:$0xff] %v2316_v45  ;;  %3573 = vst [vmem:[#allocation4 + $0xa8] sm:$0xff] %v2317_v33  ;;  %4942 = vrcp.bf16 %v1764_v48  ;;  %v1363_v62 = vpop.f32.mrb[126].mxu0  ;;  %v3794_v42 = vmul.bf16 3216621497, %v1572_v32  ;;  %v1041_v13 = vadd.f32 %v1040_v49, %v5658_v50 }
 0x22f   :  { %v1807_v2 = vmul.bf16 1065369472, %v4929_v53  ;;  %v5913_v6 = vpop.eup %4930  ;;  %v1045_v61 = vpop.f32.mrb[63].mxu1  ;;  %v2502_v56 = vmul.f32 %v2438_v46, %v2246_v4  ;;  %v2503_v12 = vmul.f32 %v2439_v37, %v2247_v20  ;;  %v1360_v14 = vadd.f32 %v1359_v52, %v5660_v51 }
 0x230   :  { %4944 = vtanh.bf16 %v2370_v30  ;;  %v1365_v9 = vpop.f32.mrb[127].mxu0  ;;  %v1362_v18 = vadd.f32 %v1361_v1, %v5662_v54  ;;  %v1044_v21 = vadd.f32 %v1043_v55, %v5658_v50  ;;  %v1364_v24 = vadd.f32 %v1363_v62, %v5660_v51 }
 0x231   :  { %v1870_v5 = vunpack.c.l.bf16 %v1807_v2  ;;  %v1871_v10 = vunpack.c.h.bf16 %v1807_v2  ;;  %4946 = vrcp.bf16 %v2148_v0  ;;  %v2559_v23 = vpack.c.bf16 %v2503_v12, %v2502_v56 }
 0x232   :  { %v5915_v11 = vpop.eup %4932  ;;  %4948 = vpow.bf16 %v3762_v58  ;;  %v1366_v60 = vadd.f32 %v1365_v9, %v5662_v54  ;;  %v1048_v8 = vpop.f32.mrb[64].mxu1  ;;  %v2185_v27 = vmul.bf16 1065369472, %v5869_v15  ;;  %v1574_v41 = vpack.c.bf16 %v1364_v24, %v1360_v14 }
 0x233   :  { %v2318_v7 = vmul.f32 %v1966_v63, %v1870_v5  ;;  %v2319_v17 = vmul.f32 %v1967_v3, %v1871_v10  ;;  %v4935_v22 = vpop.eup %4934  ;;  %4950 = vpow.bf16 %v3794_v42  ;;  %v1369_v25 = vpop.f32.mrb[128].mxu0  ;;  %v1573_v63 = vpack.c.bf16 %v1044_v21, %v1041_v13  ;;  %4627 = vmatmul.mubr.bf16.gmra.mrb[136].mxu1 %v2559_v23  ;;  %4434 = vst [vmem:[#allocation2 + $0x38] sm:$0xff] %v2559_v23  }
 0x234   :  { %v5925_v26 = vpop.eup %4936  ;;  %v1765_v57 = vadd.bf16 1065369472, %v4935_v22  ;;  %v1050_v36 = vpop.f32.mrb[65].mxu1  ;;  %4952 = vtanh.bf16 %v1571_v35  ;;  %v1575_v28 = vpack.c.bf16 %v1366_v60, %v1362_v18  ;;  %v2440_v44 = vunpack.c.l.bf16 %v5899_v40 }
 0x235   :  { %v2371_v59 = vpack.c.bf16 %v2319_v17, %v2318_v7  ;;  %3574 = vst [vmem:[#allocation4 + $0xb0] sm:$0xff] %v2318_v7  ;;  %3575 = vst [vmem:[#allocation4 + $0xb8] sm:$0xff] %v2319_v17  ;;  %v1371_v38 = vpop.f32.mrb[129].mxu0  ;;  %v5928_v19 = vpop.eup %4938  ;;  %v1968_v43 = vunpack.c.l.bf16 %v5896_v34  ;;  %v3763_v49 = vmul.bf16 3216621497, %v1573_v63  ;;  %v2441_v15 = vunpack.c.h.bf16 %v5899_v40 }
 0x236   :  { %v1051_v47 = vpop.f32.mrb[66].mxu1  ;;  %v1373_v45 = vpop.f32.mrb[130].mxu0  ;;  %v1969_v48 = vunpack.c.h.bf16 %v5896_v34  ;;  %v3795_v58 = vmul.bf16 3216621497, %v1575_v28  ;;  %v2248_v35 = vunpack.c.l.bf16 %v2185_v27  ;;  %v2249_v53 = vunpack.c.h.bf16 %v2185_v27 }
 0x237   :  { %v4941_v33 = vpop.eup %4940  ;;  %4954 = vtanh.bf16 %v2371_v59  ;;  %v1053_v52 = vpop.f32.mrb[67].mxu1  ;;  %v1049_v30 = vadd.f32 %v1048_v8, %v5658_v50  ;;  %v1370_v46 = vadd.f32 %v1369_v25, %v5660_v51  ;;  %v1372_v29 = vadd.f32 %v1371_v38, %v5662_v54 }
 0x238   :  { %v1375_v16 = vpop.f32.mrb[131].mxu0  ;;  %4956 = vrcp.bf16 %v1765_v57  ;;  %v2149_v39 = vadd.bf16 1065369472, %v4941_v33  ;;  %v2504_v32 = vmul.f32 %v2440_v44, %v2248_v35  ;;  %v1052_v40 = vadd.f32 %v1051_v47, %v5658_v50 }
 0x239   :  { %4958 = vpow.bf16 %v3763_v49  ;;  %v4943_v0 = vpop.eup %4942  ;;  %v2505_v34 = vmul.f32 %v2441_v15, %v2249_v53  ;;  %v1374_v3 = vadd.f32 %v1373_v45, %v5660_v51  ;;  %v1376_v62 = vadd.f32 %v1375_v16, %v5662_v54 }
 0x23a   :  { %v1809_v2 = vmul.bf16 1065369472, %v4943_v0  ;;  %4960 = vtanh.bf16 %v1574_v41  ;;  %v1576_v55 = vpack.c.bf16 %v1052_v40, %v1049_v30  ;;  %v2187_v42 = vmul.bf16 1065369472, %v5878_v31  ;;  %v1056_v20 = vpop.f32.mrb[68].mxu1  ;;  %v1379_v37 = vpop.f32.mrb[132].mxu0 }
 0x23b   :  { %v5938_v1 = vpop.eup %4944  ;;  %4962 = vpow.bf16 %v3795_v58  ;;  %v2560_v10 = vpack.c.bf16 %v2505_v34, %v2504_v32  ;;  %v1577_v56 = vpack.c.bf16 %v1374_v3, %v1370_v46  ;;  %v1058_v12 = vpop.f32.mrb[69].mxu1  ;;  %v1970_v14 = vunpack.c.l.bf16 %v5928_v19 }
 0x23c   :  { %v5941_v4 = vpop.eup %4946  ;;  %v1872_v9 = vunpack.c.l.bf16 %v1809_v2  ;;  %v1873_v5 = vunpack.c.h.bf16 %v1809_v2  ;;  %v1381_v13 = vpop.f32.mrb[133].mxu0  ;;  %v3764_v17 = vmul.bf16 3216621497, %v1576_v55  ;;  %v1578_v18 = vpack.c.bf16 %v1376_v62, %v1372_v29 }
 0x23d   :  { %v4949_v61 = vpop.eup %4948  ;;  %v1059_v21 = vpop.f32.mrb[70].mxu1  ;;  %4964 = vrcp.bf16 %v2149_v39  ;;  %4630 = vmatprep.mubr.bf16.mxu1 %v2560_v10  ;;  %4435 = vst [vmem:[#allocation2 + $0x40] sm:$0xff] %v2560_v10   ;;  %v2250_v31 = vunpack.c.l.bf16 %v2187_v42  ;;  %v2251_v63 = vunpack.c.h.bf16 %v2187_v42  ;;  %v2442_v38 = vunpack.c.l.bf16 %v5915_v11 }
 0x23e   :  { %v1766_v7 = vadd.bf16 1065369472, %v4949_v61  ;;  %v1383_v22 = vpop.f32.mrb[134].mxu0  ;;  %v4951_v23 = vpop.eup %4950  ;;  %v2320_v24 = vmul.f32 %v1968_v43, %v1872_v9  ;;  %v2321_v60 = vmul.f32 %v1969_v48, %v1873_v5  ;;  %v3796_v57 = vmul.bf16 3216621497, %v1578_v18 }
 0x23f   :  { %v1061_v8 = vpop.f32.mrb[71].mxu1  ;;  %v1385_v25 = vpop.f32.mrb[135].mxu0  ;;  %v2150_v59 = vadd.bf16 1065369472, %v4951_v23  ;;  %v2443_v41 = vunpack.c.h.bf16 %v5915_v11  ;;  %v1971_v44 = vunpack.c.h.bf16 %v5928_v19  ;;  %v1057_v47 = vadd.f32 %v1056_v20, %v5658_v50 }
 0x240   :  { %4966 = vrcp.bf16 %v1766_v7  ;;  %v5946_v27 = vpop.eup %4952  ;;  %v2372_v36 = vpack.c.bf16 %v2321_v60, %v2320_v24  ;;  %3576 = vst [vmem:[#allocation4 + $0xc0] sm:$0xff] %v2320_v24  ;;  %3577 = vst [vmem:[#allocation4 + $0xc8] sm:$0xff] %v2321_v60  ;;  %v1380_v45 = vadd.f32 %v1379_v37, %v5660_v51  ;;  %v2506_v43 = vmul.f32 %v2442_v38, %v2250_v31 }
 0x241   :  { %4968 = vpow.bf16 %v3764_v17  ;;  %v2507_v49 = vmul.f32 %v2443_v41, %v2251_v63  ;;  %v1382_v15 = vadd.f32 %v1381_v13, %v5662_v54  ;;  %v1060_v52 = vadd.f32 %v1059_v21, %v5658_v50 }
 0x242   :  { %v5950_v28 = vpop.eup %4954  ;;  %4970 = vrcp.bf16 %v2150_v59  ;;  %v1384_v11 = vadd.f32 %v1383_v22, %v5660_v51  ;;  %v1386_v58 = vadd.f32 %v1385_v25, %v5662_v54  ;;  %v1064_v35 = vpop.f32.mrb[72].mxu1  ;;  %v1972_v20 = vunpack.c.l.bf16 %v5946_v27 }
 0x243   :  { %v4957_v33 = vpop.eup %4956  ;;  %4972 = vtanh.bf16 %v1577_v56  ;;  %v1389_v39 = vpop.f32.mrb[136].mxu0  ;;  %v2561_v30 = vpack.c.bf16 %v2507_v49, %v2506_v43  ;;  %v1579_v0 = vpack.c.bf16 %v1060_v52, %v1057_v47  ;;  %v1973_v37 = vunpack.c.h.bf16 %v5946_v27 }
 0x244   :  { %v4959_v16 = vpop.eup %4958  ;;  %v1811_v48 = vmul.bf16 1065369472, %v4957_v33  ;;  %4974 = vpow.bf16 %v3796_v57  ;;  %v1066_v32 = vpop.f32.mrb[73].mxu1  ;;  %v1580_v34 = vpack.c.bf16 %v1384_v11, %v1380_v45  ;;  %v1581_v3 = vpack.c.bf16 %v1386_v58, %v1382_v15 }
 0x245   :  { %v1767_v53 = vadd.bf16 1065369472, %v4959_v16  ;;  %v1391_v46 = vpop.f32.mrb[137].mxu0  ;;  %v5959_v29 = vpop.eup %4960  ;;  %4631 = vmatmul.mubr.bf16.gmra.mrb[140].mxu1 %v2561_v30  ;;  %4436 = vst [vmem:[#allocation2 + $0x48] sm:$0xff] %v2561_v30   ;;  %v3765_v61 = vmul.bf16 3216621497, %v1579_v0  ;;  %v2444_v17 = vunpack.c.l.bf16 %v5938_v1  ;;  %v2445_v23 = vunpack.c.h.bf16 %v5938_v1 }
 0x246   :  { %v1874_v40 = vunpack.c.l.bf16 %v1811_v48  ;;  %v1875_v2 = vunpack.c.h.bf16 %v1811_v48  ;;  %v1067_v55 = vpop.f32.mrb[74].mxu1  ;;  %v1393_v62 = vpop.f32.mrb[138].mxu0  ;;  %v1974_v12 = vunpack.c.l.bf16 %v5959_v29  ;;  %v3797_v13 = vmul.bf16 3216621497, %v1581_v3 }
 0x247   :  { %v4963_v42 = vpop.eup %4962  ;;  %4976 = vrcp.bf16 %v1767_v53  ;;  %v1069_v9 = vpop.f32.mrb[75].mxu1  ;;  %v2189_v7 = vmul.bf16 1065369472, %v5913_v6  ;;  %v1065_v60 = vadd.f32 %v1064_v35, %v5658_v50  ;;  %v1390_v6 = vadd.f32 %v1389_v39, %v5660_v51 }
 0x248   :  { %v1395_v5 = vpop.f32.mrb[139].mxu0  ;;  %4978 = vtanh.bf16 %v2372_v36  ;;  %v2322_v10 = vmul.f32 %v1970_v14, %v1874_v40  ;;  %v2323_v56 = vmul.f32 %v1971_v44, %v1875_v2  ;;  %v5968_v18 = vpop.eup %4964  ;;  %v2151_v22 = vadd.bf16 1065369472, %v4963_v42 }
 0x249   :  { %4980 = vpow.bf16 %v3765_v61  ;;  %v2252_v14 = vunpack.c.l.bf16 %v2189_v7  ;;  %v2253_v24 = vunpack.c.h.bf16 %v2189_v7  ;;  %v1392_v25 = vadd.f32 %v1391_v46, %v5662_v54 }
 0x24a   :  { %v2373_v21 = vpack.c.bf16 %v2323_v56, %v2322_v10  ;;  %3578 = vst [vmem:[#allocation4 + $0xd0] sm:$0xff] %v2322_v10  ;;  %3579 = vst [vmem:[#allocation4 + $0xd8] sm:$0xff] %v2323_v56  ;;  %4982 = vtanh.bf16 %v1580_v34  ;;  %v1068_v59 = vadd.f32 %v1067_v55, %v5658_v50  ;;  %v5975_v57 = vpop.f32.mrb[76].mxu1  ;;  %v5977_v63 = vpop.f32.mrb[140].mxu0  ;;  %v1394_v41 = vadd.f32 %v1393_v62, %v5660_v51 }
 0x24b   :  { %v4967_v19 = vpop.eup %4966  ;;  %4984 = vpow.bf16 %v3797_v13  ;;  %v2508_v36 = vmul.f32 %v2444_v17, %v2252_v14  ;;  %v2509_v38 = vmul.f32 %v2445_v23, %v2253_v24  ;;  %v1074_v44 = vpop.f32.mrb[77].mxu1  ;;  %v1396_v49 = vadd.f32 %v1395_v5, %v5662_v54 }
 0x24c   :  { %v4969_v31 = vpop.eup %4968  ;;  %v1813_v8 = vmul.bf16 1065369472, %v4967_v19  ;;  %v5982_v47 = vpop.f32.mrb[141].mxu0  ;;  %v1582_v43 = vpack.c.bf16 %v1068_v59, %v1065_v60  ;;  %v1583_v11 = vpack.c.bf16 %v1394_v41, %v1390_v6  ;;  %v2191_v58 = vmul.bf16 1065369472, %v5925_v26 }
 0x24d   :  { %v5979_v27 = vpop.eup %4970  ;;  %v1768_v1 = vadd.bf16 1065369472, %v4969_v31  ;;  %v1075_v15 = vpop.f32.mrb[78].mxu1  ;;  %v2562_v48 = vpack.c.bf16 %v2509_v38, %v2508_v36  ;;  %v1975_v32 = vunpack.c.h.bf16 %v5959_v29  ;;  %v1584_v2 = vpack.c.bf16 %v1396_v49, %v1392_v25 }
 0x24e   :  { %v1876_v45 = vunpack.c.l.bf16 %v1813_v8  ;;  %v1877_v33 = vunpack.c.h.bf16 %v1813_v8  ;;  %v1403_v52 = vpop.f32.mrb[142].mxu0  ;;  %v5985_v16 = vpop.eup %4972  ;;  %v3766_v40 = vmul.bf16 3216621497, %v1582_v43  ;;  %v2254_v26 = vunpack.c.l.bf16 %v2191_v58 }
 0x24f   :  { %4986 = vrcp.bf16 %v1768_v1  ;;  %v1077_v35 = vpop.f32.mrb[79].mxu1  ;;  %v1405_v39 = vpop.f32.mrb[143].mxu0  ;;  %4634 = vmatprep.mubr.bf16.mxu1 %v2562_v48  ;;  %4437 = vst [vmem:[#allocation2 + $0x50] sm:$0xff] %v2562_v48   ;;  %v2446_v55 = vunpack.c.l.bf16 %v5950_v28  ;;  %v1976_v9 = vunpack.c.l.bf16 %v5985_v16  ;;  %v2255_v5 = vunpack.c.h.bf16 %v2191_v58 }
 0x250   :  { %v4975_v53 = vpop.eup %4974  ;;  %v2324_v30 = vmul.f32 %v1972_v20, %v1876_v45  ;;  %v2325_v0 = vmul.f32 %v1973_v37, %v1877_v33  ;;  %4988 = vrcp.bf16 %v2151_v22  ;;  %v3798_v20 = vmul.bf16 3216621497, %v1584_v2 }
 0x251   :  { %4990 = vtanh.bf16 %v2373_v21  ;;  %v2152_v46 = vadd.bf16 1065369472, %v4975_v53  ;;  %v2447_v37 = vunpack.c.h.bf16 %v5950_v28  ;;  %v2510_v10 = vmul.f32 %v2446_v55, %v2254_v26 }
 0x252   :  { %v4977_v34 = vpop.eup %4976  ;;  %v2374_v3 = vpack.c.bf16 %v2325_v0, %v2324_v30  ;;  %3580 = vst [vmem:[#allocation4 + $0xe0] sm:$0xff] %v2324_v30  ;;  %3581 = vst [vmem:[#allocation4 + $0xe8] sm:$0xff] %v2325_v0  ;;  %4992 = vtanh.bf16 %v1583_v11  ;;  %v1080_v56 = vpop.f32.mrb[80].mxu1  ;;  %v1977_v28 = vunpack.c.h.bf16 %v5985_v16  ;;  %v1073_v60 = vadd.f32 %v5975_v57, %v5658_v50 }
 0x253   :  { %v5990_v62 = vpop.eup %4978  ;;  %v1815_v42 = vmul.bf16 1065369472, %v4977_v34  ;;  %4994 = vrcp.bf16 %v2152_v46  ;;  %v5994_v13 = vpop.f32.mrb[144].mxu0  ;;  %v2511_v24 = vmul.f32 %v2447_v37, %v2255_v5  ;;  %v1400_v59 = vadd.f32 %v5977_v63, %v5660_v51 }
 0x254   :  { %v4981_v61 = vpop.eup %4980  ;;  %4996 = vtanh.bf16 %v2374_v3  ;;  %v1082_v23 = vpop.f32.mrb[81].mxu1  ;;  %v1076_v44 = vadd.f32 %v1075_v15, %v5658_v50  ;;  %v1404_v57 = vadd.f32 %v1403_v52, %v5660_v51  ;;  %v1402_v29 = vadd.f32 %v5982_v47, %v5662_v54 }
 0x255   :  { %v5996_v7 = vpop.eup %4982  ;;  %v1878_v17 = vunpack.c.l.bf16 %v1815_v42  ;;  %v1879_v21 = vunpack.c.h.bf16 %v1815_v42  ;;  %v1769_v22 = vadd.bf16 1065369472, %v4981_v61  ;;  %4998 = vpow.bf16 %v3766_v40  ;;  %v1411_v19 = vpop.f32.mrb[145].mxu0 }
 0x256   :  { %v4985_v14 = vpop.eup %4984  ;;  %5000 = vpow.bf16 %v3798_v20  ;;  %v1083_v31 = vpop.f32.mrb[82].mxu1  ;;  %v2563_v41 = vpack.c.bf16 %v2511_v24, %v2510_v10  ;;  %v2193_v63 = vmul.bf16 1065369472, %v5941_v4  ;;  %v1585_v43 = vpack.c.bf16 %v1076_v44, %v1073_v60 }
 0x257   :  { %v1413_v8 = vpop.f32.mrb[146].mxu0  ;;  %v6003_v6 = vmul.f32 %v1974_v12, %v1878_v17  ;;  %v6005_v25 = vmul.f32 %v1975_v32, %v1879_v21  ;;  %5002 = vrcp.bf16 %v1769_v22  ;;  %v1085_v1 = vpop.f32.mrb[83].mxu1  ;;  %v2153_v38 = vadd.bf16 1065369472, %v4985_v14 }
 0x258   :  { %v1415_v36 = vpop.f32.mrb[147].mxu0  ;;  %v1406_v12 = vadd.f32 %v1405_v39, %v5662_v54  ;;  %4635 = vmatmul.mubr.bf16.gmra.mrb[144].mxu1 %v2563_v41  ;;  %4438 = vst [vmem:[#allocation2 + $0x58] sm:$0xff] %v2563_v41   ;;  %v1586_v49 = vpack.c.bf16 %v1404_v57, %v1400_v59  ;;  %v2448_v15 = vunpack.c.l.bf16 %v5990_v62  ;;  %v2449_v52 = vunpack.c.h.bf16 %v5990_v62 }
 0x259   :  { %v2375_v45 = vpack.c.bf16 %v6005_v25, %v6003_v6  ;;  %3582 = vst [vmem:[#allocation4 + $0xf0] sm:$0xff] %v6003_v6  ;;  %3583 = vst [vmem:[#allocation4 + $0xf8] sm:$0xff] %v6005_v25  ;;  %v1978_v58 = vunpack.c.l.bf16 %v5996_v7  ;;  %v1979_v47 = vunpack.c.h.bf16 %v5996_v7  ;;  %5004 = vrcp.bf16 %v2153_v38 }
 0x25a   :  { %v4987_v33 = vpop.eup %4986  ;;  %v1587_v35 = vpack.c.bf16 %v1406_v12, %v1402_v29  ;;  %v3767_v4 = vmul.bf16 3216621497, %v1585_v43  ;;  %v2256_v53 = vunpack.c.l.bf16 %v2193_v63  ;;  %v2257_v30 = vunpack.c.h.bf16 %v2193_v63  ;;  %v6027_v0 = vpop.f32.mrb[84].mxu1 }
 0x25b   :  { %v6021_v48 = vpop.eup %4988  ;;  %v1817_v11 = vmul.bf16 1065369472, %v4987_v33  ;;  %v6029_v32 = vpop.f32.mrb[148].mxu0  ;;  %5006 = vtanh.bf16 %v1586_v49  ;;  %v1081_v34 = vadd.f32 %v1080_v56, %v5658_v50  ;;  %v1410_v56 = vadd.f32 %v5994_v13, %v5660_v51 }
 0x25c   :  { %v6025_v39 = vpop.eup %4990  ;;  %v1090_v3 = vpop.f32.mrb[85].mxu1  ;;  %5008 = vpow.bf16 %v3767_v4  ;;  %v3799_v62 = vmul.bf16 3216621497, %v1587_v35  ;;  %v2512_v42 = vmul.f32 %v2448_v15, %v2256_v53  ;;  %v2513_v20 = vmul.f32 %v2449_v52, %v2257_v30 }
 0x25d   :  { %v6031_v46 = vpop.eup %4992  ;;  %v1880_v40 = vunpack.c.l.bf16 %v1817_v11  ;;  %v1881_v2 = vunpack.c.h.bf16 %v1817_v11  ;;  %v6034_v26 = vpop.f32.mrb[149].mxu0  ;;  %v1412_v21 = vadd.f32 %v1411_v19, %v5662_v54  ;;  %v1084_v60 = vadd.f32 %v1083_v31, %v5658_v50 }
 0x25e   :  { %v6036_v55 = vpop.eup %4994  ;;  %v6038_v37 = vpop.f32.mrb[86].mxu1  ;;  %5010 = vpow.bf16 %v3799_v62  ;;  %v2564_v24 = vpack.c.bf16 %v2513_v20, %v2512_v42  ;;  %v1414_v6 = vadd.f32 %v1413_v8, %v5660_v51  ;;  %v2195_v13 = vmul.bf16 1065369472, %v5968_v18 }
 0x25f   :  { %v6040_v61 = vpop.f32.mrb[150].mxu0  ;;  %v6042_v5 = vpop.eup %4996  ;;  %v2328_v10 = vmul.f32 %v1976_v9, %v1880_v40  ;;  %v2329_v17 = vmul.f32 %v1977_v28, %v1881_v2  ;;  %v1416_v9 = vadd.f32 %v1415_v36, %v5662_v54  ;;  %5012 = vtanh.bf16 %v2375_v45 }
 0x260   :  { %v1093_v22 = vpop.f32.mrb[87].mxu1  ;;  %v6049_v23 = vpop.f32.mrb[151].mxu0  ;;  %4638 = vmatprep.mubr.bf16.mxu1 %v2564_v24  ;;  %4439 = vst [vmem:[#allocation2 + $0x60] sm:$0xff] %v2564_v24   ;;  %v1588_v28 = vpack.c.bf16 %v1084_v60, %v1081_v34  ;;  %v1589_v1 = vpack.c.bf16 %v1414_v6, %v1410_v56  ;;  %v2450_v38 = vunpack.c.l.bf16 %v6025_v39  ;;  %v1980_v8 = vunpack.c.l.bf16 %v6031_v46 }
 0x261   :  { %v4999_v14 = vpop.eup %4998  ;;  %v2376_v59 = vpack.c.bf16 %v2329_v17, %v2328_v10  ;;  %3584 = vst [vmem:[#allocation4 + $0x100] sm:$0xff] %v2328_v10  ;;  %3585 = vst [vmem:[#allocation4 + $0x108] sm:$0xff] %v2329_v17  ;;  %v1590_v41 = vpack.c.bf16 %v1416_v9, %v1412_v21  ;;  %v2258_v44 = vunpack.c.l.bf16 %v2195_v13  ;;  %v2259_v29 = vunpack.c.h.bf16 %v2195_v13 }
 0x262   :  { %v5001_v25 = vpop.eup %5000  ;;  %v1770_v16 = vadd.bf16 1065369472, %v4999_v14  ;;  %v3768_v57 = vmul.bf16 3216621497, %v1588_v28  ;;  %v2451_v36 = vunpack.c.h.bf16 %v6025_v39  ;;  %v1096_v12 = vpop.f32.mrb[88].mxu1  ;;  %v1981_v15 = vunpack.c.h.bf16 %v6031_v46 }
 0x263   :  { %v5003_v19 = vpop.eup %5002  ;;  %v6058_v18 = vpop.f32.mrb[152].mxu0  ;;  %v3800_v33 = vmul.bf16 3216621497, %v1590_v41  ;;  %v2514_v52 = vmul.f32 %v2450_v38, %v2258_v44  ;;  %v2154_v40 = vadd.bf16 1065369472, %v5001_v25  ;;  %v1089_v42 = vadd.f32 %v6027_v0, %v5658_v50 }
 0x264   :  { %v1819_v31 = vmul.bf16 1065369472, %v5003_v19  ;;  %5014 = vrcp.bf16 %v1770_v16  ;;  %v1098_v43 = vpop.f32.mrb[89].mxu1  ;;  %v6060_v49 = vpop.f32.mrb[153].mxu0  ;;  %v2515_v11 = vmul.f32 %v2451_v36, %v2259_v29  ;;  %v1420_v20 = vadd.f32 %v6029_v32, %v5660_v51 }
 0x265   :  { %5016 = vtanh.bf16 %v2376_v59  ;;  %v1099_v35 = vpop.f32.mrb[90].mxu1  ;;  %v1433_v4 = vpop.f32.mrb[154].mxu0  ;;  %v1422_v7 = vadd.f32 %v6034_v26, %v5662_v54  ;;  %v1426_v0 = vadd.f32 %v6049_v23, %v5662_v54  ;;  %v2197_v32 = vmul.bf16 1065369472, %v5979_v27 }
 0x266   :  { %v1882_v45 = vunpack.c.l.bf16 %v1819_v31  ;;  %v1883_v63 = vunpack.c.h.bf16 %v1819_v31  ;;  %5018 = vpow.bf16 %v3768_v57  ;;  %v6063_v53 = vpop.eup %5004  ;;  %v1101_v2 = vpop.f32.mrb[91].mxu1  ;;  %v2565_v62 = vpack.c.bf16 %v2515_v11, %v2514_v52 }
 0x267   :  { %5020 = vtanh.bf16 %v1589_v1  ;;  %v1435_v34 = vpop.f32.mrb[155].mxu0  ;;  %v6069_v3 = vpop.eup %5006  ;;  %v2452_v21 = vunpack.c.l.bf16 %v6042_v5  ;;  %v2453_v24 = vunpack.c.h.bf16 %v6042_v5  ;;  %v2260_v60 = vunpack.c.l.bf16 %v2197_v32 }
 0x268   :  { %v2330_v39 = vmul.f32 %v1978_v58, %v1882_v45  ;;  %v2331_v30 = vmul.f32 %v1979_v47, %v1883_v63  ;;  %5022 = vpow.bf16 %v3800_v33  ;;  %v5009_v10 = vpop.eup %5008  ;;  %v1092_v58 = vadd.f32 %v6038_v37, %v5658_v50  ;;  %4639 = vmatmul.mubr.bf16.gmra.mrb[148].mxu1 %v2565_v62  ;;  %4440 = vst [vmem:[#allocation2 + $0x68] sm:$0xff] %v2565_v62  }
 0x269   :  { %v1424_v47 = vadd.f32 %v6040_v61, %v5660_v51  ;;  %v1771_v56 = vadd.bf16 1065369472, %v5009_v10  ;;  %v5011_v22 = vpop.eup %5010  ;;  %5024 = vrcp.bf16 %v2154_v40  ;;  %v1982_v37 = vunpack.c.l.bf16 %v6069_v3 }
 0x26a   :  { %v2377_v17 = vpack.c.bf16 %v2331_v30, %v2330_v39  ;;  %3586 = vst [vmem:[#allocation4 + $0x110] sm:$0xff] %v2330_v39  ;;  %3587 = vst [vmem:[#allocation4 + $0x118] sm:$0xff] %v2331_v30  ;;  %v1591_v14 = vpack.c.bf16 %v1092_v58, %v1089_v42  ;;  %v1593_v61 = vpack.c.bf16 %v1426_v0, %v1422_v7  ;;  %v6087_v6 = vpop.f32.mrb[92].mxu1  ;;  %v6089_v25 = vpop.f32.mrb[156].mxu0  ;;  %v2155_v27 = vadd.bf16 1065369472, %v5011_v22 }
 0x26b   :  { %v1592_v26 = vpack.c.bf16 %v1424_v47, %v1420_v20  ;;  %5026 = vrcp.bf16 %v1771_v56  ;;  %v6091_v23 = vpop.eup %5012  ;;  %v2261_v16 = vunpack.c.h.bf16 %v2197_v32  ;;  %v1106_v9 = vpop.f32.mrb[93].mxu1  ;;  %v2516_v19 = vmul.f32 %v2452_v21, %v2260_v60 }
 0x26c   :  { %5028 = vtanh.bf16 %v2377_v17  ;;  %v3769_v59 = vmul.bf16 3216621497, %v1591_v14  ;;  %v6093_v13 = vpop.f32.mrb[157].mxu0  ;;  %v3801_v5 = vmul.bf16 3216621497, %v1593_v61  ;;  %v1097_v28 = vadd.f32 %v1096_v12, %v5658_v50  ;;  %v6096_v1 = vpop.f32.mrb[94].mxu1 }
 0x26d   :  { %5030 = vtanh.bf16 %v1592_v26  ;;  %v6098_v38 = vpop.f32.mrb[158].mxu0  ;;  %v2517_v41 = vmul.f32 %v2453_v24, %v2261_v16  ;;  %v1430_v44 = vadd.f32 %v6058_v18, %v5660_v51  ;;  %v1100_v57 = vadd.f32 %v1099_v35, %v5658_v50  ;;  %v1109_v29 = vpop.f32.mrb[95].mxu1 }
 0x26e   :  { %5032 = vpow.bf16 %v3769_v59  ;;  %v6103_v36 = vpop.f32.mrb[159].mxu0  ;;  %v1434_v12 = vadd.f32 %v1433_v4, %v5660_v51  ;;  %v1436_v33 = vadd.f32 %v1435_v34, %v5662_v54  ;;  %v1432_v11 = vadd.f32 %v6060_v49, %v5662_v54 }
 0x26f   :  { %v5015_v31 = vpop.eup %5014  ;;  %5034 = vpow.bf16 %v3801_v5  ;;  %v2566_v52 = vpack.c.bf16 %v2517_v41, %v2516_v19  ;;  %v1594_v39 = vpack.c.bf16 %v1100_v57, %v1097_v28  ;;  %v2199_v18 = vmul.bf16 1065369472, %v6021_v48 }
 0x270   :  { %v6105_v45 = vpop.eup %5016  ;;  %v1821_v63 = vmul.bf16 1065369472, %v5015_v31  ;;  %v1595_v62 = vpack.c.bf16 %v1434_v12, %v1430_v44  ;;  %5036 = vrcp.bf16 %v2155_v27  ;;  %v1596_v34 = vpack.c.bf16 %v1436_v33, %v1432_v11 }
 0x271   :  { %v5019_v43 = vpop.eup %5018  ;;  %4642 = vmatprep.mubr.bf16.mxu1 %v2566_v52  ;;  %4441 = vst [vmem:[#allocation2 + $0x70] sm:$0xff] %v2566_v52   ;;  %v3770_v4 = vmul.bf16 3216621497, %v1594_v39  ;;  %v2454_v20 = vunpack.c.l.bf16 %v6091_v23  ;;  %v1983_v58 = vunpack.c.h.bf16 %v6069_v3  ;;  %v2262_v56 = vunpack.c.l.bf16 %v2199_v18 }
 0x272   :  { %v6112_v35 = vpop.eup %5020  ;;  %v1884_v30 = vunpack.c.l.bf16 %v1821_v63  ;;  %v1885_v40 = vunpack.c.h.bf16 %v1821_v63  ;;  %v1772_v2 = vadd.bf16 1065369472, %v5019_v43  ;;  %v6119_v17 = vpop.f32.mrb[96].mxu1  ;;  %v3802_v47 = vmul.bf16 3216621497, %v1596_v34 }
 0x273   :  { %v5023_v42 = vpop.eup %5022  ;;  %v6121_v7 = vpop.f32.mrb[160].mxu0  ;;  %v2263_v46 = vunpack.c.h.bf16 %v2199_v18  ;;  %v1984_v24 = vunpack.c.l.bf16 %v6112_v35  ;;  %v2518_v61 = vmul.f32 %v2454_v20, %v2262_v56  ;;  %v1105_v60 = vadd.f32 %v6087_v6, %v5658_v50 }
 0x274   :  { %v2332_v49 = vmul.f32 %v1980_v8, %v1884_v30  ;;  %v2333_v48 = vmul.f32 %v1981_v15, %v1885_v40  ;;  %5038 = vrcp.bf16 %v1772_v2  ;;  %v2156_v10 = vadd.bf16 1065369472, %v5023_v42  ;;  %v1114_v0 = vpop.f32.mrb[97].mxu1  ;;  %v6124_v32 = vpop.f32.mrb[161].mxu0 }
 0x275   :  { %5040 = vpow.bf16 %v3770_v4  ;;  %v6126_v21 = vpop.eup %5024  ;;  %v2455_v15 = vunpack.c.h.bf16 %v6091_v23  ;;  %v6129_v22 = vpop.f32.mrb[98].mxu1  ;;  %v1108_v5 = vadd.f32 %v6096_v1, %v5658_v50  ;;  %v1440_v28 = vadd.f32 %v6089_v25, %v5660_v51 }
 0x276   :  { %v2378_v8 = vpack.c.bf16 %v2333_v48, %v2332_v49  ;;  %3588 = vst [vmem:[#allocation4 + $0x120] sm:$0xff] %v2332_v49  ;;  %3589 = vst [vmem:[#allocation4 + $0x128] sm:$0xff] %v2333_v48  ;;  %5042 = vrcp.bf16 %v2156_v10  ;;  %v6131_v14 = vpop.f32.mrb[162].mxu0  ;;  %v5027_v26 = vpop.eup %5026  ;;  %v1442_v6 = vadd.f32 %v6093_v13, %v5662_v54  ;;  %v1444_v31 = vadd.f32 %v6098_v38, %v5660_v51 }
 0x277   :  { %5044 = vtanh.bf16 %v1595_v62  ;;  %v1117_v27 = vpop.f32.mrb[99].mxu1  ;;  %v6136_v59 = vpop.f32.mrb[163].mxu0  ;;  %v1823_v9 = vmul.bf16 1065369472, %v5027_v26  ;;  %v2519_v23 = vmul.f32 %v2455_v15, %v2263_v46  ;;  %v1597_v63 = vpack.c.bf16 %v1108_v5, %v1105_v60 }
 0x278   :  { %v6138_v16 = vpop.eup %5028  ;;  %5046 = vtanh.bf16 %v2378_v8  ;;  %v1598_v1 = vpack.c.bf16 %v1444_v31, %v1440_v28  ;;  %v1446_v43 = vadd.f32 %v6103_v36, %v5662_v54  ;;  %v2201_v52 = vmul.bf16 1065369472, %v6036_v55 }
 0x279   :  { %v6142_v19 = vpop.eup %5030  ;;  %5048 = vpow.bf16 %v3802_v47  ;;  %v1886_v44 = vunpack.c.l.bf16 %v1823_v9  ;;  %v1887_v57 = vunpack.c.h.bf16 %v1823_v9  ;;  %v2567_v29 = vpack.c.bf16 %v2519_v23, %v2518_v61 }
 0x27a   :  { %v5033_v41 = vpop.eup %5032  ;;  %v3771_v38 = vmul.bf16 3216621497, %v1597_v63  ;;  %v6155_v39 = vpop.f32.mrb[100].mxu1  ;;  %v1599_v30 = vpack.c.bf16 %v1446_v43, %v1442_v6  ;;  %v2264_v40 = vunpack.c.l.bf16 %v2201_v52  ;;  %v2265_v2 = vunpack.c.h.bf16 %v2201_v52 }
 0x27b   :  { %v5035_v12 = vpop.eup %5034  ;;  %v1773_v33 = vadd.bf16 1065369472, %v5033_v41  ;;  %v2334_v25 = vmul.f32 %v1982_v37, %v1886_v44  ;;  %v2335_v13 = vmul.f32 %v1983_v58, %v1887_v57  ;;  %4643 = vmatmul.mubr.bf16.gmra.mrb[152].mxu1 %v2567_v29  ;;  %4442 = vst [vmem:[#allocation2 + $0x78] sm:$0xff] %v2567_v29   ;;  %v6157_v18 = vpop.f32.mrb[164].mxu0  ;;  %v2456_v37 = vunpack.c.l.bf16 %v6105_v45 }
 0x27c   :  { %v2157_v11 = vadd.bf16 1065369472, %v5035_v12  ;;  %v1122_v62 = vpop.f32.mrb[101].mxu1  ;;  %v6159_v36 = vpop.f32.mrb[165].mxu0  ;;  %v2457_v42 = vunpack.c.h.bf16 %v6105_v45  ;;  %v1985_v49 = vunpack.c.h.bf16 %v6112_v35  ;;  %v1986_v48 = vunpack.c.l.bf16 %v6142_v19 }
 0x27d   :  { %5050 = vrcp.bf16 %v1773_v33  ;;  %v6161_v55 = vpop.eup %5036  ;;  %v2379_v3 = vpack.c.bf16 %v2335_v13, %v2334_v25  ;;  %3590 = vst [vmem:[#allocation4 + $0x130] sm:$0xff] %v2334_v25  ;;  %3591 = vst [vmem:[#allocation4 + $0x138] sm:$0xff] %v2335_v13  ;;  %v6165_v4 = vpop.f32.mrb[102].mxu1  ;;  %v3803_v10 = vmul.bf16 3216621497, %v1599_v30  ;;  %v2520_v8 = vmul.f32 %v2456_v37, %v2264_v40 }
 0x27e   :  { %5052 = vrcp.bf16 %v2157_v11  ;;  %v6167_v34 = vpop.f32.mrb[166].mxu0  ;;  %v1125_v58 = vpop.f32.mrb[103].mxu1  ;;  %v2521_v46 = vmul.f32 %v2457_v42, %v2265_v2  ;;  %v1113_v26 = vadd.f32 %v6119_v17, %v5658_v50  ;;  %v1116_v61 = vadd.f32 %v6129_v22, %v5658_v50 }
 0x27f   :  { %v5039_v20 = vpop.eup %5038  ;;  %5054 = vpow.bf16 %v3771_v38  ;;  %v6171_v47 = vpop.f32.mrb[167].mxu0  ;;  %v1450_v28 = vadd.f32 %v6121_v7, %v5660_v51  ;;  %v1452_v6 = vadd.f32 %v6124_v32, %v5662_v54  ;;  %v1454_v44 = vadd.f32 %v6131_v14, %v5660_v51 }
 0x280   :  { %v5041_v56 = vpop.eup %5040  ;;  %5056 = vtanh.bf16 %v2379_v3  ;;  %v1825_v0 = vmul.bf16 1065369472, %v5039_v20  ;;  %v2568_v23 = vpack.c.bf16 %v2521_v46, %v2520_v8  ;;  %v1600_v31 = vpack.c.bf16 %v1116_v61, %v1113_v26 }
 0x281   :  { %v6173_v45 = vpop.eup %5042  ;;  %v1774_v15 = vadd.bf16 1065369472, %v5041_v56  ;;  %5058 = vtanh.bf16 %v1598_v1  ;;  %v1456_v57 = vadd.f32 %v6136_v59, %v5662_v54  ;;  %v2203_v12 = vmul.bf16 1065369472, %v6063_v53 }
 0x282   :  { %v6179_v60 = vpop.eup %5044  ;;  %v1888_v27 = vunpack.c.l.bf16 %v1825_v0  ;;  %v1889_v9 = vunpack.c.h.bf16 %v1825_v0  ;;  %5060 = vpow.bf16 %v3803_v10  ;;  %4646 = vmatprep.mubr.bf16.mxu1 %v2568_v23  ;;  %4443 = vst [vmem:[#allocation2 + $0x80] sm:$0xff] %v2568_v23   ;;  %v6195_v29 = vpop.f32.mrb[104].mxu1  ;;  %v3772_v63 = vmul.bf16 3216621497, %v1600_v31 }
 0x283   :  { %v6181_v5 = vpop.eup %5046  ;;  %5062 = vrcp.bf16 %v1774_v15  ;;  %v6197_v7 = vpop.f32.mrb[168].mxu0  ;;  %v2458_v35 = vunpack.c.l.bf16 %v6138_v16  ;;  %v1601_v33 = vpack.c.bf16 %v1454_v44, %v1450_v28  ;;  %v1602_v14 = vpack.c.bf16 %v1456_v57, %v1452_v6 }
 0x284   :  { %v5049_v17 = vpop.eup %5048  ;;  %v6189_v22 = vmul.f32 %v1984_v24, %v1888_v27  ;;  %v2337_v41 = vmul.f32 %v1985_v49, %v1889_v9  ;;  %v2459_v1 = vunpack.c.h.bf16 %v6138_v16  ;;  %v1130_v59 = vpop.f32.mrb[105].mxu1  ;;  %v1987_v52 = vunpack.c.h.bf16 %v6142_v19 }
 0x285   :  { %v2158_v32 = vadd.bf16 1065369472, %v5049_v17  ;;  %v6204_v43 = vpop.f32.mrb[169].mxu0  ;;  %v2266_v25 = vunpack.c.l.bf16 %v2203_v12  ;;  %v2267_v13 = vunpack.c.h.bf16 %v2203_v12  ;;  %v6207_v53 = vpop.f32.mrb[106].mxu1  ;;  %v3804_v30 = vmul.bf16 3216621497, %v1602_v14 }
 0x286   :  { %v2380_v24 = vpack.c.bf16 %v2337_v41, %v6189_v22  ;;  %3592 = vst [vmem:[#allocation4 + $0x140] sm:$0xff] %v6189_v22  ;;  %3593 = vst [vmem:[#allocation4 + $0x148] sm:$0xff] %v2337_v41  ;;  %v6209_v11 = vpop.f32.mrb[170].mxu0  ;;  %v1121_v40 = vadd.f32 %v6155_v39, %v5658_v50  ;;  %v1460_v16 = vadd.f32 %v6157_v18, %v5660_v51  ;;  %v1133_v62 = vpop.f32.mrb[107].mxu1  ;;  %v1988_v28 = vunpack.c.l.bf16 %v6179_v60 }
 0x287   :  { %5064 = vrcp.bf16 %v2158_v32  ;;  %v1462_v2 = vadd.f32 %v6159_v36, %v5662_v54  ;;  %v6217_v3 = vpop.f32.mrb[171].mxu0  ;;  %v2522_v20 = vmul.f32 %v2458_v35, %v2266_v25  ;;  %v2523_v49 = vmul.f32 %v2459_v1, %v2267_v13 }
 0x288   :  { %v5051_v38 = vpop.eup %5050  ;;  %5066 = vpow.bf16 %v3772_v63  ;;  %v1124_v39 = vadd.f32 %v6165_v4, %v5658_v50  ;;  %v1464_v18 = vadd.f32 %v6167_v34, %v5660_v51  ;;  %v1466_v36 = vadd.f32 %v6171_v47, %v5662_v54 }
 0x289   :  { %v6219_v37 = vpop.eup %5052  ;;  %v1827_v42 = vmul.bf16 1065369472, %v5051_v38  ;;  %5068 = vtanh.bf16 %v1601_v33  ;;  %v2569_v15 = vpack.c.bf16 %v2523_v49, %v2522_v20  ;;  %v1989_v22 = vunpack.c.h.bf16 %v6179_v60 }
 0x28a   :  { %v5055_v10 = vpop.eup %5054  ;;  %5070 = vpow.bf16 %v3804_v30  ;;  %v1603_v26 = vpack.c.bf16 %v1124_v39, %v1121_v40  ;;  %v1604_v61 = vpack.c.bf16 %v1464_v18, %v1460_v16  ;;  %v1605_v27 = vpack.c.bf16 %v1466_v36, %v1462_v2  ;;  %v6231_v9 = vpop.f32.mrb[108].mxu1 }
 0x28b   :  { %v6227_v58 = vpop.eup %5056  ;;  %v1890_v56 = vunpack.c.l.bf16 %v1827_v42  ;;  %v1891_v0 = vunpack.c.h.bf16 %v1827_v42  ;;  %v1775_v8 = vadd.bf16 1065369472, %v5055_v10  ;;  %v6233_v4 = vpop.f32.mrb[172].mxu0  ;;  %4647 = vmatmul.mubr.bf16.gmra.mrb[156].mxu1 %v2569_v15  ;;  %4444 = vst [vmem:[#allocation2 + $0x88] sm:$0xff] %v2569_v15   ;;  %v2205_v12 = vmul.bf16 1065369472, %v6126_v21 }
 0x28c   :  { %v6229_v46 = vpop.eup %5058  ;;  %v1138_v6 = vpop.f32.mrb[109].mxu1  ;;  %v3773_v44 = vmul.bf16 3216621497, %v1603_v26  ;;  %v3805_v63 = vmul.bf16 3216621497, %v1605_v27  ;;  %v2460_v60 = vunpack.c.l.bf16 %v6181_v5  ;;  %v1129_v21 = vadd.f32 %v6195_v29, %v5658_v50 }
 0x28d   :  { %v5061_v34 = vpop.eup %5060  ;;  %v2338_v47 = vmul.f32 %v1986_v48, %v1890_v56  ;;  %v2339_v23 = vmul.f32 %v1987_v52, %v1891_v0  ;;  %5072 = vrcp.bf16 %v1775_v8  ;;  %v6238_v31 = vpop.f32.mrb[173].mxu0  ;;  %v1990_v35 = vunpack.c.l.bf16 %v6229_v46 }
 0x28e   :  { %v5063_v17 = vpop.eup %5062  ;;  %5074 = vtanh.bf16 %v2380_v24  ;;  %v2159_v41 = vadd.bf16 1065369472, %v5061_v34  ;;  %v6241_v57 = vpop.f32.mrb[110].mxu1  ;;  %v2461_v24 = vunpack.c.h.bf16 %v6181_v5  ;;  %v2268_v52 = vunpack.c.l.bf16 %v2205_v12 }
 0x28f   :  { %v6243_v32 = vpop.f32.mrb[174].mxu0  ;;  %v2381_v19 = vpack.c.bf16 %v2339_v23, %v2338_v47  ;;  %3594 = vst [vmem:[#allocation4 + $0x150] sm:$0xff] %v2338_v47  ;;  %3595 = vst [vmem:[#allocation4 + $0x158] sm:$0xff] %v2339_v23  ;;  %v1829_v48 = vmul.bf16 1065369472, %v5063_v17  ;;  %5076 = vtanh.bf16 %v1604_v61  ;;  %v1141_v33 = vpop.f32.mrb[111].mxu1  ;;  %v2269_v13 = vunpack.c.h.bf16 %v2205_v12 }
 0x290   :  { %v6249_v14 = vpop.f32.mrb[175].mxu0  ;;  %5078 = vrcp.bf16 %v2159_v41  ;;  %v1470_v38 = vadd.f32 %v6197_v7, %v5660_v51  ;;  %v2524_v5 = vmul.f32 %v2460_v60, %v2268_v52  ;;  %v1132_v62 = vadd.f32 %v6207_v53, %v5658_v50 }
 0x291   :  { %v1892_v1 = vunpack.c.l.bf16 %v1829_v48  ;;  %v1893_v59 = vunpack.c.h.bf16 %v1829_v48  ;;  %5080 = vpow.bf16 %v3773_v44  ;;  %v2525_v2 = vmul.f32 %v2461_v24, %v2269_v13 }
 0x292   :  { %v6251_v25 = vpop.eup %5064  ;;  %5082 = vpow.bf16 %v3805_v63  ;;  %v1474_v42 = vadd.f32 %v6209_v11, %v5660_v51  ;;  %v1476_v20 = vadd.f32 %v6217_v3, %v5662_v54  ;;  %v6263_v49 = vpop.f32.mrb[112].mxu1  ;;  %v1472_v18 = vadd.f32 %v6204_v43, %v5662_v54 }
 0x293   :  { %v2340_v30 = vmul.f32 %v1988_v28, %v1892_v1  ;;  %v2341_v40 = vmul.f32 %v1989_v22, %v1893_v59  ;;  %v5067_v16 = vpop.eup %5066  ;;  %v6265_v29 = vpop.f32.mrb[176].mxu0  ;;  %v2207_v53 = vmul.bf16 1065369472, %v6161_v55  ;;  %5084 = vtanh.bf16 %v2381_v19 }
 0x294   :  { %v6267_v7 = vpop.eup %5068  ;;  %v1776_v39 = vadd.bf16 1065369472, %v5067_v16  ;;  %v1146_v36 = vpop.f32.mrb[113].mxu1  ;;  %v2570_v3 = vpack.c.bf16 %v2525_v2, %v2524_v5  ;;  %v1606_v0 = vpack.c.bf16 %v1132_v62, %v1129_v21  ;;  %v2462_v8 = vunpack.c.l.bf16 %v6227_v58 }
 0x295   :  { %v2382_v10 = vpack.c.bf16 %v2341_v40, %v2340_v30  ;;  %3596 = vst [vmem:[#allocation4 + $0x160] sm:$0xff] %v2340_v30  ;;  %3597 = vst [vmem:[#allocation4 + $0x168] sm:$0xff] %v2341_v40  ;;  %v6272_v11 = vpop.f32.mrb[177].mxu0  ;;  %v5071_v56 = vpop.eup %5070  ;;  %v1607_v27 = vpack.c.bf16 %v1474_v42, %v1470_v38  ;;  %v1608_v34 = vpack.c.bf16 %v1476_v20, %v1472_v18  ;;  %v2270_v28 = vunpack.c.l.bf16 %v2207_v53 }
 0x296   :  { %v6275_v15 = vpop.f32.mrb[114].mxu1  ;;  %v6277_v26 = vpop.f32.mrb[178].mxu0  ;;  %v2160_v61 = vadd.bf16 1065369472, %v5071_v56  ;;  %4650 = vmatprep.mubr.bf16.mxu1 %v2570_v3  ;;  %4445 = vst [vmem:[#allocation2 + $0x90] sm:$0xff] %v2570_v3   ;;  %v2271_v6 = vunpack.c.h.bf16 %v2207_v53  ;;  %v2463_v44 = vunpack.c.h.bf16 %v6227_v58  ;;  %v1991_v19 = vunpack.c.h.bf16 %v6229_v46 }
 0x297   :  { %5086 = vtanh.bf16 %v2382_v10  ;;  %v1149_v43 = vpop.f32.mrb[115].mxu1  ;;  %v6279_v47 = vpop.f32.mrb[179].mxu0  ;;  %v3774_v23 = vmul.bf16 3216621497, %v1606_v0  ;;  %v3806_v41 = vmul.bf16 3216621497, %v1608_v34  ;;  %v1992_v48 = vunpack.c.l.bf16 %v6267_v7 }
 0x298   :  { %v5073_v55 = vpop.eup %5072  ;;  %5088 = vrcp.bf16 %v1776_v39  ;;  %v2526_v63 = vmul.f32 %v2462_v8, %v2270_v28  ;;  %v2527_v33 = vmul.f32 %v2463_v44, %v2271_v6  ;;  %v1137_v59 = vadd.f32 %v6231_v9, %v5658_v50 }
 0x299   :  { %v5075_v17 = vpop.eup %5074  ;;  %v1831_v22 = vmul.bf16 1065369472, %v5073_v55  ;;  %5090 = vrcp.bf16 %v2160_v61  ;;  %v6292_v58 = vadd.f32 %v6233_v4, %v5660_v51  ;;  %v1482_v52 = vadd.f32 %v6238_v31, %v5662_v54 }
 0x29a   :  { %5092 = vpow.bf16 %v3774_v23  ;;  %v6284_v12 = vpop.eup %5076  ;;  %v6296_v13 = vpop.f32.mrb[116].mxu1  ;;  %v2571_v5 = vpack.c.bf16 %v2527_v33, %v2526_v63  ;;  %v1140_v9 = vadd.f32 %v6241_v57, %v5658_v50  ;;  %v1484_v31 = vadd.f32 %v6243_v32, %v5660_v51 }
 0x29b   :  { %v1894_v60 = vunpack.c.l.bf16 %v1831_v22  ;;  %v1895_v24 = vunpack.c.h.bf16 %v1831_v22  ;;  %5094 = vtanh.bf16 %v1607_v27  ;;  %v6286_v1 = vpop.eup %5078  ;;  %v6298_v21 = vpop.f32.mrb[180].mxu0  ;;  %v1486_v42 = vadd.f32 %v6249_v14, %v5662_v54 }
 0x29c   :  { %5096 = vpow.bf16 %v3806_v41  ;;  %v5081_v38 = vpop.eup %5080  ;;  %v1154_v16 = vpop.f32.mrb[117].mxu1  ;;  %v2209_v20 = vmul.bf16 1065369472, %v6173_v45  ;;  %4651 = vmatmul.mubr.bf16.gmra.mrb[160].mxu1 %v2571_v5  ;;  %4446 = vst [vmem:[#allocation2 + $0x98] sm:$0xff] %v2571_v5   ;;  %v1609_v39 = vpack.c.bf16 %v1140_v9, %v1137_v59  ;;  %v2464_v18 = vunpack.c.l.bf16 %v5075_v17 }
 0x29d   :  { %v2342_v30 = vmul.f32 %v1990_v35, %v1894_v60  ;;  %v2343_v40 = vmul.f32 %v1991_v19, %v1895_v24  ;;  %v6304_v2 = vpop.f32.mrb[181].mxu0  ;;  %v5083_v4 = vpop.eup %5082  ;;  %v1777_v62 = vadd.bf16 1065369472, %v5081_v38  ;;  %v1610_v32 = vpack.c.bf16 %v1484_v31, %v6292_v58 }
 0x29e   :  { %v6311_v46 = vpop.f32.mrb[118].mxu1  ;;  %v6313_v35 = vpop.f32.mrb[182].mxu0  ;;  %v2161_v57 = vadd.bf16 1065369472, %v5083_v4  ;;  %v1611_v14 = vpack.c.bf16 %v1486_v42, %v1482_v52  ;;  %v2272_v45 = vunpack.c.l.bf16 %v2209_v20  ;;  %v3775_v3 = vmul.bf16 3216621497, %v1609_v39 }
 0x29f   :  { %v2383_v10 = vpack.c.bf16 %v2343_v40, %v2342_v30  ;;  %3598 = vst [vmem:[#allocation4 + $0x170] sm:$0xff] %v2342_v30  ;;  %3599 = vst [vmem:[#allocation4 + $0x178] sm:$0xff] %v2343_v40  ;;  %v1157_v53 = vpop.f32.mrb[119].mxu1  ;;  %v6315_v36 = vpop.f32.mrb[183].mxu0  ;;  %5098 = vrcp.bf16 %v1777_v62  ;;  %v2273_v0 = vunpack.c.h.bf16 %v2209_v20  ;;  %v2465_v8 = vunpack.c.h.bf16 %v5075_v17 }
 0x2a0   :  { %v6318_v56 = vpop.eup %5084  ;;  %v1993_v27 = vunpack.c.h.bf16 %v6267_v7  ;;  %v3807_v34 = vmul.bf16 3216621497, %v1611_v14  ;;  %v2528_v43 = vmul.f32 %v2464_v18, %v2272_v45  ;;  %v1145_v28 = vadd.f32 %v6263_v49, %v5658_v50 }
 0x2a1   :  { %5100 = vtanh.bf16 %v2383_v10  ;;  %v2529_v23 = vmul.f32 %v2465_v8, %v2273_v0  ;;  %v1490_v6 = vadd.f32 %v6265_v29, %v5660_v51  ;;  %v1492_v17 = vadd.f32 %v6272_v11, %v5662_v54 }
 0x2a2   :  { %v6320_v61 = vpop.eup %5086  ;;  %5102 = vrcp.bf16 %v2161_v57  ;;  %v1148_v44 = vadd.f32 %v6275_v15, %v5658_v50  ;;  %v1494_v19 = vadd.f32 %v6277_v26, %v5660_v51  ;;  %v6335_v63 = vpop.f32.mrb[120].mxu1  ;;  %v1496_v29 = vadd.f32 %v6279_v47, %v5662_v54 }
 0x2a3   :  { %v5089_v55 = vpop.eup %5088  ;;  %5104 = vpow.bf16 %v3775_v3  ;;  %v6337_v60 = vpop.f32.mrb[184].mxu0  ;;  %v2572_v24 = vpack.c.bf16 %v2529_v23, %v2528_v43  ;;  %v2211_v33 = vmul.bf16 1065369472, %v6219_v37  ;;  %v1994_v9 = vunpack.c.l.bf16 %v6284_v12 }
 0x2a4   :  { %v6327_v22 = vpop.eup %5090  ;;  %v1833_v41 = vmul.bf16 1065369472, %v5089_v55  ;;  %5106 = vpow.bf16 %v3807_v34  ;;  %v1162_v59 = vpop.f32.mrb[121].mxu1  ;;  %v1612_v38 = vpack.c.bf16 %v1148_v44, %v1145_v28  ;;  %v1613_v37 = vpack.c.bf16 %v1494_v19, %v1490_v6 }
 0x2a5   :  { %v5093_v49 = vpop.eup %5092  ;;  %v6342_v11 = vpop.f32.mrb[185].mxu0  ;;  %5108 = vtanh.bf16 %v1610_v32  ;;  %4654 = vmatprep.mubr.bf16.mxu1 %v2572_v24  ;;  %4447 = vst [vmem:[#allocation2 + $0xa0] sm:$0xff] %v2572_v24   ;;  %v1614_v47 = vpack.c.bf16 %v1496_v29, %v1492_v17  ;;  %v1995_v20 = vunpack.c.h.bf16 %v6284_v12  ;;  %v2274_v18 = vunpack.c.l.bf16 %v2211_v33 }
 0x2a6   :  { %v6344_v58 = vpop.eup %5094  ;;  %v1896_v15 = vunpack.c.l.bf16 %v1833_v41  ;;  %v1897_v52 = vunpack.c.h.bf16 %v1833_v41  ;;  %v1778_v26 = vadd.bf16 1065369472, %v5093_v49  ;;  %v6346_v30 = vpop.f32.mrb[122].mxu1  ;;  %v3776_v10 = vmul.bf16 3216621497, %v1612_v38 }
 0x2a7   :  { %v6348_v40 = vpop.f32.mrb[186].mxu0  ;;  %v5097_v5 = vpop.eup %5096  ;;  %v3808_v57 = vmul.bf16 3216621497, %v1614_v47  ;;  %v2466_v53 = vunpack.c.l.bf16 %v6318_v56  ;;  %v2275_v14 = vunpack.c.h.bf16 %v2211_v33  ;;  %v2467_v7 = vunpack.c.h.bf16 %v6318_v56 }
 0x2a8   :  { %v1165_v16 = vpop.f32.mrb[123].mxu1  ;;  %v6351_v4 = vpop.f32.mrb[187].mxu0  ;;  %v2344_v62 = vmul.f32 %v1992_v48, %v1896_v15  ;;  %v2345_v31 = vmul.f32 %v1993_v27, %v1897_v52  ;;  %5110 = vrcp.bf16 %v1778_v26  ;;  %v2162_v42 = vadd.bf16 1065369472, %v5097_v5 }
 0x2a9   :  { %5112 = vtanh.bf16 %v1613_v37  ;;  %v1153_v48 = vadd.f32 %v6296_v13, %v5658_v50  ;;  %v2530_v3 = vmul.f32 %v2466_v53, %v2274_v18  ;;  %v1500_v0 = vadd.f32 %v6298_v21, %v5660_v51 }
 0x2aa   :  { %v2384_v39 = vpack.c.bf16 %v2345_v31, %v2344_v62  ;;  %3600 = vst [vmem:[#allocation4 + $0x180] sm:$0xff] %v2344_v62  ;;  %3601 = vst [vmem:[#allocation4 + $0x188] sm:$0xff] %v2345_v31  ;;  %5114 = vrcp.bf16 %v2162_v42  ;;  %v5099_v32 = vpop.eup %5098  ;;  %v1502_v8 = vadd.f32 %v6304_v2, %v5662_v54  ;;  %v6366_v27 = vpop.f32.mrb[124].mxu1  ;;  %v2531_v56 = vmul.f32 %v2467_v7, %v2275_v14 }
 0x2ab   :  { %5116 = vpow.bf16 %v3776_v10  ;;  %v1835_v12 = vmul.bf16 1065369472, %v5099_v32  ;;  %v6368_v34 = vpop.f32.mrb[188].mxu0  ;;  %v1156_v13 = vadd.f32 %v6311_v46, %v5658_v50  ;;  %v1504_v55 = vadd.f32 %v6313_v35, %v5660_v51  ;;  %v1170_v23 = vpop.f32.mrb[125].mxu1 }
 0x2ac   :  { %v6360_v45 = vpop.eup %5100  ;;  %5118 = vpow.bf16 %v3808_v57  ;;  %v6376_v28 = vpop.f32.mrb[189].mxu0  ;;  %v1506_v41 = vadd.f32 %v6315_v36, %v5662_v54  ;;  %v2213_v17 = vmul.bf16 1065369472, %v6251_v25  ;;  %v2573_v46 = vpack.c.bf16 %v2531_v56, %v2530_v3 }
 0x2ad   :  { %v6370_v43 = vpop.eup %5102  ;;  %v1898_v6 = vunpack.c.l.bf16 %v1835_v12  ;;  %v1899_v2 = vunpack.c.h.bf16 %v1835_v12  ;;  %v6381_v44 = vpop.f32.mrb[126].mxu1  ;;  %v1615_v24 = vpack.c.bf16 %v1156_v13, %v1153_v48  ;;  %v1616_v29 = vpack.c.bf16 %v1504_v55, %v1500_v0 }
 0x2ae   :  { %v5105_v21 = vpop.eup %5104  ;;  %v6383_v19 = vpop.f32.mrb[190].mxu0  ;;  %5120 = vtanh.bf16 %v2384_v39  ;;  %4655 = vmatmul.mubr.bf16.gmra.mrb[164].mxu1 %v2573_v46  ;;  %4448 = vst [vmem:[#allocation2 + $0xa8] sm:$0xff] %v2573_v46   ;;  %v1617_v36 = vpack.c.bf16 %v1506_v41, %v1502_v8  ;;  %v1996_v37 = vunpack.c.l.bf16 %v6344_v58  ;;  %v2276_v16 = vunpack.c.l.bf16 %v2213_v17 }
 0x2af   :  { %v1779_v49 = vadd.bf16 1065369472, %v5105_v21  ;;  %v1173_v35 = vpop.f32.mrb[127].mxu1  ;;  %v6385_v33 = vpop.f32.mrb[191].mxu0  ;;  %v2346_v15 = vmul.f32 %v1994_v9, %v1898_v6  ;;  %v2347_v52 = vmul.f32 %v1995_v20, %v1899_v2  ;;  %v3777_v25 = vmul.bf16 3216621497, %v1615_v24 }
 0x2b0   :  { %v5107_v59 = vpop.eup %5106  ;;  %v2468_v9 = vunpack.c.l.bf16 %v6320_v61  ;;  %v2469_v62 = vunpack.c.h.bf16 %v6320_v61  ;;  %v1997_v20 = vunpack.c.h.bf16 %v6344_v58  ;;  %v2277_v10 = vunpack.c.h.bf16 %v2213_v17 }
 0x2b1   :  { %5122 = vrcp.bf16 %v1779_v49  ;;  %v2163_v26 = vadd.bf16 1065369472, %v5107_v59  ;;  %v6387_v38 = vpop.eup %5108  ;;  %v2385_v5 = vpack.c.bf16 %v2347_v52, %v2346_v15  ;;  %3602 = vst [vmem:[#allocation4 + $0x190] sm:$0xff] %v2346_v15  ;;  %3603 = vst [vmem:[#allocation4 + $0x198] sm:$0xff] %v2347_v52  ;;  %v3809_v39 = vmul.bf16 3216621497, %v1617_v36 }
 0x2b2   :  { %5124 = vtanh.bf16 %v1616_v29  ;;  %v2532_v18 = vmul.f32 %v2468_v9, %v2276_v16  ;;  %v1161_v53 = vadd.f32 %v6335_v63, %v5658_v50  ;;  %v2533_v48 = vmul.f32 %v2469_v62, %v2277_v10 }
 0x2b3   :  { %v5111_v47 = vpop.eup %5110  ;;  %5126 = vrcp.bf16 %v2163_v26  ;;  %v6401_v61 = vadd.f32 %v6337_v60, %v5660_v51  ;;  %v1512_v58 = vadd.f32 %v6342_v11, %v5662_v54  ;;  %v1164_v3 = vadd.f32 %v6346_v30, %v5658_v50 }
 0x2b4   :  { %v6392_v31 = vpop.eup %5112  ;;  %5128 = vtanh.bf16 %v2385_v5  ;;  %v1837_v42 = vmul.bf16 1065369472, %v5111_v47  ;;  %v6409_v0 = vadd.f32 %v6348_v40, %v5660_v51  ;;  %v2574_v13 = vpack.c.bf16 %v2533_v48, %v2532_v18 }
 0x2b5   :  { %v6395_v57 = vpop.eup %5114  ;;  %5130 = vpow.bf16 %v3777_v25  ;;  %v1516_v55 = vadd.f32 %v6351_v4, %v5662_v54  ;;  %v1618_v23 = vpack.c.bf16 %v1164_v3, %v1161_v53  ;;  %v2215_v40 = vmul.bf16 1065369472, %v6286_v1 }
 0x2b6   :  { %v5117_v32 = vpop.eup %5116  ;;  %v1900_v14 = vunpack.c.l.bf16 %v1837_v42  ;;  %v1901_v7 = vunpack.c.h.bf16 %v1837_v42  ;;  %v1619_v11 = vpack.c.bf16 %v6409_v0, %v6401_v61  ;;  %4658 = vmatprep.mubr.bf16.mxu1 %v2574_v13  ;;  %4449 = vst [vmem:[#allocation2 + $0xb0] sm:$0xff] %v2574_v13   ;;  %v2470_v6 = vunpack.c.l.bf16 %v6360_v45 }
 0x2b7   :  { %v1780_v12 = vadd.bf16 1065369472, %v5117_v32  ;;  %v5119_v63 = vpop.eup %5118  ;;  %v1620_v30 = vpack.c.bf16 %v1516_v55, %v1512_v58  ;;  %v3778_v4 = vmul.bf16 3216621497, %v1618_v23  ;;  %v2471_v41 = vunpack.c.h.bf16 %v6360_v45 }
 0x2b8   :  { %v2348_v8 = vmul.f32 %v1996_v37, %v1900_v14  ;;  %v2349_v56 = vmul.f32 %v1997_v20, %v1901_v7  ;;  %v2164_v60 = vadd.bf16 1065369472, %v5119_v63  ;;  %v1998_v49 = vunpack.c.l.bf16 %v6387_v38 }
 0x2b9   :  { %5132 = vrcp.bf16 %v1780_v12  ;;  %v6417_v2 = vpop.eup %5120  ;;  %v1999_v46 = vunpack.c.h.bf16 %v6387_v38  ;;  %v2278_v24 = vunpack.c.l.bf16 %v2215_v40  ;;  %v2279_v1 = vunpack.c.h.bf16 %v2215_v40 }
 0x2ba   :  { %v2386_v21 = vpack.c.bf16 %v2349_v56, %v2348_v8  ;;  %3604 = vst [vmem:[#allocation4 + $0x1a0] sm:$0xff] %v2348_v8  ;;  %3605 = vst [vmem:[#allocation4 + $0x1a8] sm:$0xff] %v2349_v56  ;;  %5134 = vpow.bf16 %v3809_v39  ;;  %v1169_v59 = vadd.f32 %v6366_v27, %v5658_v50  ;;  %v3810_v52 = vmul.bf16 3216621497, %v1620_v30 }
 0x2bb   :  { %5136 = vrcp.bf16 %v2164_v60  ;;  %v2534_v45 = vmul.f32 %v2470_v6, %v2278_v24  ;;  %v6430_v26 = vadd.f32 %v6368_v34, %v5660_v51  ;;  %v2535_v5 = vmul.f32 %v2471_v41, %v2279_v1 }
 0x2bc   :  { %v5123_v17 = vpop.eup %5122  ;;  %5138 = vpow.bf16 %v3778_v4  ;;  %v1522_v37 = vadd.f32 %v6376_v28, %v5662_v54  ;;  %v1172_v27 = vadd.f32 %v6381_v44, %v5658_v50  ;;  %v6438_v16 = vadd.f32 %v6383_v19, %v5660_v51 }
 0x2bd   :  { %v6422_v29 = vpop.eup %5124  ;;  %v1839_v35 = vmul.bf16 1065369472, %v5123_v17  ;;  %5140 = vtanh.bf16 %v2386_v21  ;;  %v1526_v9 = vadd.f32 %v6385_v33, %v5662_v54  ;;  %v2217_v34 = vmul.bf16 1065369472, %v6327_v22 }
 0x2be   :  { %v6426_v15 = vpop.eup %5126  ;;  %v2575_v10 = vpack.c.bf16 %v2535_v5, %v2534_v45  ;;  %5142 = vpow.bf16 %v3810_v52  ;;  %v1621_v39 = vpack.c.bf16 %v1172_v27, %v1169_v59  ;;  %v1622_v28 = vpack.c.bf16 %v6438_v16, %v6430_v26 }
 0x2bf   :  { %v5129_v25 = vpop.eup %5128  ;;  %v1902_v36 = vunpack.c.l.bf16 %v1839_v35  ;;  %v1903_v38 = vunpack.c.h.bf16 %v1839_v35  ;;  %v1623_v18 = vpack.c.bf16 %v1526_v9, %v1522_v37  ;;  %v2000_v51 = vunpack.c.l.bf16 %v6392_v31 }
 0x2c0   :  { %v5131_v47 = vpop.eup %5130  ;;  %4659 = vmatmul.mubr.bf16.gmra.mrb[168].mxu1 %v2575_v10  ;;  %4450 = vst [vmem:[#allocation2 + $0xb8] sm:$0xff] %v2575_v10   ;;  %v3779_v22 = vmul.bf16 3216621497, %v1621_v39  ;;  %v2280_v44 = vunpack.c.l.bf16 %v2217_v34  ;;  %v2281_v19 = vunpack.c.h.bf16 %v2217_v34  ;;  %v2472_v33 = vunpack.c.l.bf16 %v6417_v2  ;;  %v6462_v10 = vld [vmem:[%s6657_s5] ss:$0 sm:$0xff] }
 0x2c1   :  { %v2350_v62 = vmul.f32 %v1998_v49, %v1902_v36  ;;  %v2351_v42 = vmul.f32 %v1999_v46, %v1903_v38  ;;  %v1781_v20 = vadd.bf16 1065369472, %v5131_v47  ;;  %v2473_v32 = vunpack.c.h.bf16 %v6417_v2 }
 0x2c2   :  { %v2219_v14 = vmul.bf16 1065369472, %v6370_v43  ;;  %v2536_v48 = vmul.f32 %v2472_v33, %v2280_v44  ;;  %v2474_v12 = vunpack.c.l.bf16 %v5129_v25  ;;  %v2475_v58 = vunpack.c.h.bf16 %v5129_v25 }
 0x2c3   :  { %v2387_v50 = vpack.c.bf16 %v2351_v42, %v2350_v62  ;;  %3606 = vst [vmem:[#allocation4 + $0x1b0] sm:$0xff] %v2350_v62  ;;  %3607 = vst [vmem:[#allocation4 + $0x1b8] sm:$0xff] %v2351_v42  ;;  %5144 = vrcp.bf16 %v1781_v20  ;;  %v2001_v56 = vunpack.c.h.bf16 %v6392_v31  ;;  %v2537_v13 = vmul.f32 %v2473_v32, %v2281_v19 }
 0x2c4   :  { %v5133_v54 = vpop.eup %5132  ;;  %v2282_v60 = vunpack.c.l.bf16 %v2219_v14  ;;  %v2283_v23 = vunpack.c.h.bf16 %v2219_v14  ;;  %v2221_v43 = vmul.bf16 1065369472, %v6395_v57  ;;  %v3811_v31 = vmul.bf16 3216621497, %v1623_v18 }
 0x2c5   :  { %5146 = vtanh.bf16 %v2387_v50  ;;  %v1841_v53 = vmul.bf16 1065369472, %v5133_v54  ;;  %v5135_v7 = vpop.eup %5134  ;;  %v2576_v2 = vpack.c.bf16 %v2537_v13, %v2536_v48  ;;  %v2223_v52 = vmul.bf16 1065369472, %v6426_v15 }
 0x2c6   :  { %5148 = vpow.bf16 %v3779_v22  ;;  %v6449_v3 = vpop.eup %5136  ;;  %v2165_v4 = vadd.bf16 1065369472, %v5135_v7  ;;  %v2538_v41 = vmul.f32 %v2474_v12, %v2282_v60  ;;  %v2539_v17 = vmul.f32 %v2475_v58, %v2283_v23 }
 0x2c7   :  { %v1904_v63 = vunpack.c.l.bf16 %v1841_v53  ;;  %v1905_v8 = vunpack.c.h.bf16 %v1841_v53  ;;  %v5139_v55 = vpop.eup %5138  ;;  %5150 = vtanh.bf16 %v1619_v11  ;;  %4662 = vmatprep.mubr.bf16.mxu1 %v2576_v2  ;;  %4451 = vst [vmem:[#allocation2 + $0xc0] sm:$0xff] %v2576_v2   ;;  %v2284_v61 = vunpack.c.l.bf16 %v2221_v43 }
 0x2c8   :  { %v5141_v21 = vpop.eup %5140  ;;  %v1782_v6 = vadd.bf16 1065369472, %v5139_v55  ;;  %v2577_v0 = vpack.c.bf16 %v2539_v17, %v2538_v41  ;;  %v2285_v11 = vunpack.c.h.bf16 %v2221_v43  ;;  %v2002_v36 = vunpack.c.l.bf16 %v6422_v29 }
 0x2c9   :  { %v2352_v30 = vmul.f32 %v2000_v51, %v1904_v63  ;;  %v2353_v40 = vmul.f32 %v2001_v56, %v1905_v8  ;;  %v2476_v46 = vunpack.c.l.bf16 %v5141_v21  ;;  %v2477_v57 = vunpack.c.h.bf16 %v5141_v21  ;;  %v5143_v24 = vpop.eup %5142 }
 0x2ca   :  { %5152 = vrcp.bf16 %v1782_v6  ;;  %4663 = vmatmul.mubr.bf16.gmra.mrb[172].mxu1 %v2577_v0  ;;  %4452 = vst [vmem:[#allocation2 + $0xc8] sm:$0xff] %v2577_v0   ;;  %v2003_v38 = vunpack.c.h.bf16 %v6422_v29  ;;  %v2286_v42 = vunpack.c.l.bf16 %v2223_v52  ;;  %v2287_v20 = vunpack.c.h.bf16 %v2223_v52 }
 0x2cb   :  { %v2388_v49 = vpack.c.bf16 %v2353_v40, %v2352_v30  ;;  %3608 = vst [vmem:[#allocation4 + $0x1c0] sm:$0xff] %v2352_v30  ;;  %3609 = vst [vmem:[#allocation4 + $0x1c8] sm:$0xff] %v2353_v40  ;;  %v2540_v1 = vmul.f32 %v2476_v46, %v2284_v61  ;;  %v2541_v59 = vmul.f32 %v2477_v57, %v2285_v11  ;;  %v2166_v50 = vadd.bf16 1065369472, %v5143_v24 }
 0x2cc   :  { %v2225_v19 = vmul.bf16 1065369472, %v6449_v3 }
 0x2cd   :  { %5154 = vtanh.bf16 %v2388_v49  ;;  %v2578_v5 = vpack.c.bf16 %v2541_v59, %v2540_v1 }
 0x2ce   :  { %v5145_v35 = vpop.eup %5144  ;;  %5156 = vrcp.bf16 %v2165_v4  ;;  %v4616_v15 = vpop.f32.mrb[192].mxu0  ;;  %v2288_v56 = vunpack.c.l.bf16 %v2225_v19  ;;  %v2289_v13 = vunpack.c.h.bf16 %v2225_v19 }
 0x2cf   :  { %v1843_v45 = vmul.bf16 1065369472, %v5145_v35  ;;  %5158 = vpow.bf16 %v3811_v31  ;;  %4666 = vmatprep.mubr.bf16.mxu1 %v2578_v5  ;;  %4453 = vst [vmem:[#allocation2 + $0xd0] sm:$0xff] %v2578_v5   ;;  %v2689_v51 = vpop.f32.mrb[193].mxu0  ;;  %v2698_v53 = vadd.f32 %v4616_v15, %v6462_v10 }
 0x2d0   :  { %v5147_v25 = vpop.eup %5146  ;;  %5160 = vtanh.bf16 %v1622_v28  ;;  %v4617_v44 = vpop.f32.mrb[194].mxu0  ;;  %v2690_v26 = vadd.f32 %v6462_v10, %v2689_v51 }
 0x2d1   :  { %v5149_v37 = vpop.eup %5148  ;;  %v1906_v47 = vunpack.c.l.bf16 %v1843_v45  ;;  %v1907_v27 = vunpack.c.h.bf16 %v1843_v45  ;;  %v2478_v9 = vunpack.c.l.bf16 %v5147_v25  ;;  %v2479_v34 = vunpack.c.h.bf16 %v5147_v25  ;;  %v2692_v14 = vpop.f32.mrb[195].mxu0 }
 0x2d2   :  { %v1783_v62 = vadd.bf16 1065369472, %v5149_v37  ;;  %v5151_v39 = vpop.eup %5150  ;;  %v2701_v32 = vadd.f32 %v4617_v44, %v6462_v10  ;;  %v2693_v16 = vadd.f32 %v6462_v10, %v2692_v14 }
 0x2d3   :  { %v2354_v29 = vmul.f32 %v2002_v36, %v1906_v47  ;;  %v2355_v18 = vmul.f32 %v2003_v38, %v1907_v27  ;;  %v2542_v54 = vmul.f32 %v2478_v9, %v2286_v42  ;;  %v2543_v22 = vmul.f32 %v2479_v34, %v2287_v20 }
 0x2d4   :  { %5162 = vrcp.bf16 %v1783_v62  ;;  %v2004_v48 = vunpack.c.l.bf16 %v5151_v39  ;;  %v2005_v58 = vunpack.c.h.bf16 %v5151_v39  ;;  %v4085_v63 = vpack.c.bf16 %v2701_v32, %v2698_v53 }
 0x2d5   :  { %v2389_v33 = vpack.c.bf16 %v2355_v18, %v2354_v29  ;;  %3610 = vst [vmem:[#allocation4 + $0x1d0] sm:$0xff] %v2354_v29  ;;  %3611 = vst [vmem:[#allocation4 + $0x1d8] sm:$0xff] %v2355_v18  ;;  %v5153_v7 = vpop.eup %5152  ;;  %v2579_v12 = vpack.c.bf16 %v2543_v22, %v2542_v54  ;;  %v4080_v8 = vpack.c.bf16 %v2693_v16, %v2690_v26 }
 0x2d6   :  { %v1845_v28 = vmul.bf16 1065369472, %v5153_v7  ;;  %4397 = vst [vmem:[%s6658_s6 + $0x8] sm:$0xff] %v4085_v63  }
 0x2d7   :  { %5164 = vtanh.bf16 %v2389_v33  ;;  %4667 = vmatmul.mubr.bf16.gmra.mrb[176].mxu1 %v2579_v12  ;;  %4454 = vst [vmem:[#allocation2 + $0xd8] sm:$0xff] %v2579_v12   ;;  %4081 = vst [vmem:[%s6658_s6] sm:$0xff] %v4080_v8  }
 0x2d8   :  { %v5155_v3 = vpop.eup %5154  ;;  %5166 = vrcp.bf16 %v2166_v50  ;;  %v1908_v55 = vunpack.c.l.bf16 %v1845_v28  ;;  %v1909_v60 = vunpack.c.h.bf16 %v1845_v28 }
 0x2d9   :  { %v2480_v23 = vunpack.c.l.bf16 %v5155_v3  ;;  %v2481_v43 = vunpack.c.h.bf16 %v5155_v3  ;;  %v5157_v21 = vpop.eup %5156 }
 0x2da   :  { %v5159_v30 = vpop.eup %5158  ;;  %v2356_v40 = vmul.f32 %v2004_v48, %v1908_v55  ;;  %v2357_v6 = vmul.f32 %v2005_v58, %v1909_v60  ;;  %v2227_v0 = vmul.bf16 1065369472, %v5157_v21 }
 0x2db   :  { %v2544_v2 = vmul.f32 %v2480_v23, %v2288_v56  ;;  %v2545_v4 = vmul.f32 %v2481_v43, %v2289_v13  ;;  %v5161_v49 = vpop.eup %5160  ;;  %v2167_v31 = vadd.bf16 1065369472, %v5159_v30 }
 0x2dc   :  { %v2390_v41 = vpack.c.bf16 %v2357_v6, %v2356_v40  ;;  %3612 = vst [vmem:[#allocation4 + $0x1e0] sm:$0xff] %v2356_v40  ;;  %3613 = vst [vmem:[#allocation4 + $0x1e8] sm:$0xff] %v2357_v6  ;;  %v2006_v46 = vunpack.c.l.bf16 %v5161_v49  ;;  %v2007_v1 = vunpack.c.h.bf16 %v5161_v49  ;;  %v2290_v52 = vunpack.c.l.bf16 %v2227_v0 }
 0x2dd   :  { %v2580_v17 = vpack.c.bf16 %v2545_v4, %v2544_v2  ;;  %v2291_v45 = vunpack.c.h.bf16 %v2227_v0 }
 0x2de   :  { %5168 = vtanh.bf16 %v2390_v41 }
 0x2df   :  { %v5163_v61 = vpop.eup %5162  ;;  %4670 = vmatprep.mubr.bf16.mxu1 %v2580_v17  ;;  %4455 = vst [vmem:[#allocation2 + $0xe0] sm:$0xff] %v2580_v17   ;;  %5170 = vrcp.bf16 %v2167_v31 }
 0x2e0   :  { %v1847_v11 = vmul.bf16 1065369472, %v5163_v61  ;;  %v4620_v27 = vpop.f32.mrb[128].mxu1 }
 0x2e1   :  { %v2705_v34 = vpop.f32.mrb[129].mxu1  ;;  %v2714_v15 = vadd.f32 %v4620_v27, %v6462_v10 }
 0x2e2   :  { %v5165_v57 = vpop.eup %5164  ;;  %v1910_v24 = vunpack.c.l.bf16 %v1847_v11  ;;  %v1911_v35 = vunpack.c.h.bf16 %v1847_v11  ;;  %v4621_v20 = vpop.f32.mrb[130].mxu1  ;;  %v2706_v18 = vadd.f32 %v6462_v10, %v2705_v34 }
 0x2e3   :  { %v5167_v59 = vpop.eup %5166  ;;  %v2482_v25 = vunpack.c.l.bf16 %v5165_v57  ;;  %v2483_v36 = vunpack.c.h.bf16 %v5165_v57  ;;  %v2717_v39 = vadd.f32 %v4621_v20, %v6462_v10  ;;  %v2708_v29 = vpop.f32.mrb[131].mxu1 }
 0x2e4   :  { %v2358_v38 = vmul.f32 %v2006_v46, %v1910_v24  ;;  %v2359_v5 = vmul.f32 %v2007_v1, %v1911_v35  ;;  %v2229_v62 = vmul.bf16 1065369472, %v5167_v59  ;;  %v2709_v50 = vadd.f32 %v6462_v10, %v2708_v29 }
 0x2e5   :  { %v2546_v37 = vmul.f32 %v2482_v25, %v2290_v52  ;;  %v2547_v47 = vmul.f32 %v2483_v36, %v2291_v45  ;;  %v4095_v54 = vpack.c.bf16 %v2717_v39, %v2714_v15 }
 0x2e6   :  { %v2391_v9 = vpack.c.bf16 %v2359_v5, %v2358_v38  ;;  %3614 = vst [vmem:[#allocation4 + $0x1f0] sm:$0xff] %v2358_v38  ;;  %3615 = vst [vmem:[#allocation4 + $0x1f8] sm:$0xff] %v2359_v5  ;;  %v2292_v22 = vunpack.c.l.bf16 %v2229_v62  ;;  %v4090_v44 = vpack.c.bf16 %v2709_v50, %v2706_v18  ;;  %v2293_v19 = vunpack.c.h.bf16 %v2229_v62 }
 0x2e7   :  { %v2581_v42 = vpack.c.bf16 %v2547_v47, %v2546_v37  ;;  %4399 = vst [vmem:[%s6658_s6 + $0x18] sm:$0xff] %v4095_v54  }
 0x2e8   :  { %5172 = vtanh.bf16 %v2391_v9  ;;  %4398 = vst [vmem:[%s6658_s6 + $0x10] sm:$0xff] %v4090_v44  }
 0x2e9   :  { %4671 = vmatmul.mubr.bf16.gmra.mrb[180].mxu1 %v2581_v42  ;;  %4456 = vst [vmem:[#allocation2 + $0xe8] sm:$0xff] %v2581_v42   ;;  %v5169_v51 = vpop.eup %5168 }
 0x2ea   :  { %v2484_v33 = vunpack.c.l.bf16 %v5169_v51  ;;  %v2485_v53 = vunpack.c.h.bf16 %v5169_v51  ;;  %v5171_v32 = vpop.eup %5170 }
 0x2eb   :  { %v2231_v12 = vmul.bf16 1065369472, %v5171_v32 }
 0x2ec   :  { %v2548_v14 = vmul.f32 %v2484_v33, %v2292_v22  ;;  %v2549_v7 = vmul.f32 %v2485_v53, %v2293_v19 }
 0x2ed   :  { %v2294_v16 = vunpack.c.l.bf16 %v2231_v12  ;;  %v2295_v28 = vunpack.c.h.bf16 %v2231_v12 }
 0x2ee   :  { %v2582_v48 = vpack.c.bf16 %v2549_v7, %v2548_v14 }
 0x2f0   :  { %4674 = vmatprep.mubr.bf16.mxu1 %v2582_v48  ;;  %4457 = vst [vmem:[#allocation2 + $0xf0] sm:$0xff] %v2582_v48  }
 0x2f3   :  { %v5173_v26 = vpop.eup %5172 }
 0x2f4   :  { %v2486_v58 = vunpack.c.l.bf16 %v5173_v26  ;;  %v2487_v63 = vunpack.c.h.bf16 %v5173_v26 }
 0x2f5   :  { %v4624_v56 = vpop.f32.mrb[132].mxu1 }
 0x2f6   :  { %v2550_v3 = vmul.f32 %v2486_v58, %v2294_v16  ;;  %v2551_v8 = vmul.f32 %v2487_v63, %v2295_v28  ;;  %v2721_v55 = vpop.f32.mrb[133].mxu1  ;;  %v2730_v23 = vadd.f32 %v4624_v56, %v6462_v10 }
 0x2f7   :  { %v4625_v60 = vpop.f32.mrb[134].mxu1  ;;  %v2722_v30 = vadd.f32 %v6462_v10, %v2721_v55 }
 0x2f8   :  { %v2583_v13 = vpack.c.bf16 %v2551_v8, %v2550_v3  ;;  %v2733_v43 = vadd.f32 %v4625_v60, %v6462_v10  ;;  %v2724_v21 = vpop.f32.mrb[135].mxu1 }
 0x2f9   :  { %v2725_v40 = vadd.f32 %v6462_v10, %v2724_v21 }
 0x2fa   :  { %4675 = vmatmul.mubr.bf16.gmra.mrb[184].mxu1 %v2583_v13  ;;  %4458 = vst [vmem:[#allocation2 + $0xf8] sm:$0xff] %v2583_v13   ;;  %v4105_v6 = vpack.c.bf16 %v2733_v43, %v2730_v23 }
 0x2fb   :  { %v4100_v2 = vpack.c.bf16 %v2725_v40, %v2722_v30 }
 0x2fc   :  { %4401 = vst [vmem:[%s6658_s6 + $0x28] sm:$0xff] %v4105_v6  }
 0x2fd   :  { %4400 = vst [vmem:[%s6658_s6 + $0x20] sm:$0xff] %v4100_v2  }
 0x306   :  { %v4628_v4 = vpop.f32.mrb[136].mxu1 }
 0x307   :  { %v2737_v41 = vpop.f32.mrb[137].mxu1  ;;  %v2746_v49 = vadd.f32 %v4628_v4, %v6462_v10 }
 0x308   :  { %v4629_v17 = vpop.f32.mrb[138].mxu1  ;;  %v2738_v0 = vadd.f32 %v6462_v10, %v2737_v41 }
 0x309   :  { %v2749_v31 = vadd.f32 %v4629_v17, %v6462_v10  ;;  %v2740_v61 = vpop.f32.mrb[139].mxu1 }
 0x30a   :  { %v2741_v11 = vadd.f32 %v6462_v10, %v2740_v61 }
 0x30b   :  { %v4115_v46 = vpack.c.bf16 %v2749_v31, %v2746_v49 }
 0x30c   :  { %v4110_v57 = vpack.c.bf16 %v2741_v11, %v2738_v0 }
 0x30d   :  { %4403 = vst [vmem:[%s6658_s6 + $0x38] sm:$0xff] %v4115_v46  }
 0x30e   :  { %4402 = vst [vmem:[%s6658_s6 + $0x30] sm:$0xff] %v4110_v57  }
 0x318   :  { %v4632_v24 = vpop.f32.mrb[140].mxu1 }
 0x319   :  { %v2753_v35 = vpop.f32.mrb[141].mxu1  ;;  %v2762_v59 = vadd.f32 %v4632_v24, %v6462_v10 }
 0x31a   :  { %v4633_v1 = vpop.f32.mrb[142].mxu1  ;;  %v2754_v25 = vadd.f32 %v6462_v10, %v2753_v35 }
 0x31b   :  { %v2765_v52 = vadd.f32 %v4633_v1, %v6462_v10  ;;  %v2756_v45 = vpop.f32.mrb[143].mxu1 }
 0x31c   :  { %v2757_v36 = vadd.f32 %v6462_v10, %v2756_v45 }
 0x31d   :  { %v4125_v38 = vpack.c.bf16 %v2765_v52, %v2762_v59 }
 0x31e   :  { %v4120_v5 = vpack.c.bf16 %v2757_v36, %v2754_v25 }
 0x31f   :  { %4405 = vst [vmem:[%s6658_s6 + $0x48] sm:$0xff] %v4125_v38  }
 0x320   :  { %4404 = vst [vmem:[%s6658_s6 + $0x40] sm:$0xff] %v4120_v5  }
 0x32b   :  { %v4636_v37 = vpop.f32.mrb[144].mxu1 }
 0x32c   :  { %v2769_v47 = vpop.f32.mrb[145].mxu1  ;;  %v2778_v9 = vadd.f32 %v4636_v37, %v6462_v10 }
 0x32d   :  { %v4637_v27 = vpop.f32.mrb[146].mxu1  ;;  %v2770_v42 = vadd.f32 %v6462_v10, %v2769_v47 }
 0x32e   :  { %v2781_v34 = vadd.f32 %v4637_v27, %v6462_v10  ;;  %v2772_v62 = vpop.f32.mrb[147].mxu1 }
 0x32f   :  { %v2773_v20 = vadd.f32 %v6462_v10, %v2772_v62 }
 0x330   :  { %v4135_v15 = vpack.c.bf16 %v2781_v34, %v2778_v9 }
 0x331   :  { %v4130_v39 = vpack.c.bf16 %v2773_v20, %v2770_v42 }
 0x332   :  { %4407 = vst [vmem:[%s6658_s6 + $0x58] sm:$0xff] %v4135_v15  }
 0x333   :  { %4406 = vst [vmem:[%s6658_s6 + $0x50] sm:$0xff] %v4130_v39  }
 0x33b   :  { %v4640_v29 = vpop.f32.mrb[148].mxu1 }
 0x33c   :  { %v2785_v18 = vpop.f32.mrb[149].mxu1  ;;  %v2794_v51 = vadd.f32 %v4640_v29, %v6462_v10 }
 0x33d   :  { %v4641_v50 = vpop.f32.mrb[150].mxu1  ;;  %v2786_v44 = vadd.f32 %v6462_v10, %v2785_v18 }
 0x33e   :  { %v2797_v54 = vadd.f32 %v4641_v50, %v6462_v10  ;;  %v2788_v22 = vpop.f32.mrb[151].mxu1 }
 0x33f   :  { %v2789_v19 = vadd.f32 %v6462_v10, %v2788_v22 }
 0x340   :  { %v4145_v33 = vpack.c.bf16 %v2797_v54, %v2794_v51 }
 0x341   :  { %v4140_v53 = vpack.c.bf16 %v2789_v19, %v2786_v44 }
 0x342   :  { %4409 = vst [vmem:[%s6658_s6 + $0x68] sm:$0xff] %v4145_v33  }
 0x343   :  { %4408 = vst [vmem:[%s6658_s6 + $0x60] sm:$0xff] %v4140_v53  }
 0x34e   :  { %v4644_v32 = vpop.f32.mrb[152].mxu1 }
 0x34f   :  { %v2801_v14 = vpop.f32.mrb[153].mxu1  ;;  %v2810_v48 = vadd.f32 %v4644_v32, %v6462_v10 }
 0x350   :  { %v4645_v7 = vpop.f32.mrb[154].mxu1  ;;  %v2802_v16 = vadd.f32 %v6462_v10, %v2801_v14 }
 0x351   :  { %v2813_v12 = vadd.f32 %v4645_v7, %v6462_v10  ;;  %v2804_v26 = vpop.f32.mrb[155].mxu1 }
 0x352   :  { %v2805_v28 = vadd.f32 %v6462_v10, %v2804_v26 }
 0x353   :  { %v4155_v58 = vpack.c.bf16 %v2813_v12, %v2810_v48 }
 0x354   :  { %v4150_v63 = vpack.c.bf16 %v2805_v28, %v2802_v16 }
 0x355   :  { %4411 = vst [vmem:[%s6658_s6 + $0x78] sm:$0xff] %v4155_v58  }
 0x356   :  { %4410 = vst [vmem:[%s6658_s6 + $0x70] sm:$0xff] %v4150_v63  }
 0x357   :  { %5185 = shalt.err (!%p5182_p4)
}
 0x358   :  { %s5186_s18 = scalar_lea.hbm %s6659_s7, 4096 }
 0x359   :  { %p5187_p5 = scmp.ne.s32.totalorder %s6659_s7, %s5186_s18  ;;  %p5190_p6 = scmp.lt.u32.totalorder %s5186_s18, %s6659_s7 }
 0x35b   :  { %p5192_p7 = pnand %p5190_p6, %p5187_p5 }
 0x35d   :  { %5195 = shalt.err (!%p5192_p7)
}
 0x35e   :  { %s5224_s23 = smov 64   ;;  %s5225_s24 = smov 4  }
 0x35f   :  { %3629 = dma.vmem_to_hbm [thread:$0]  %s3624_s13, 4096, %s6659_s7, [#allocation3], %s5224_s23, %s5224_s23, %s5225_s24  }
 0x360   :  { %s5226_s27 = smov [#allocation4]  }
 0x361   :  { %s3635_s28 = sshll.u32 %s5226_s27, 4  ;;  %s3636_s28 = int_to_ptr.vmem [resolvable:$true] %s3635_s28 }
 0x362   :  { %s5196_s29 = scalar_lea.vmem %s3636_s28, 8192  ;;  %p5201_p9 = scmp.lt.s32.totalorder %s3636_s28, %s3636_s28 }
 0x363   :  { %p5197_p8 = scmp.ne.s32.totalorder %s3636_s28, %s5196_s29  ;;  %p5202_p10 = scmp.lt.s32.totalorder %s5196_s29, %s5196_s29 }
 0x365   :  { %p5203_p11 = por %p5202_p10, %p5201_p9 }
 0x367   :  { %p5204_p12 = pnand %p5203_p11, %p5197_p8 }
 0x369   :  { %5207 = shalt.err (!%p5204_p12)
}
 0x36a   :  { %s5208_s9 = scalar_lea.hbm %s6660_s8, 8192 }
 0x36b   :  { %p5209_p13 = scmp.ne.s32.totalorder %s6660_s8, %s5208_s9  ;;  %p5212_p0 = scmp.lt.u32.totalorder %s5208_s9, %s6660_s8 }
 0x36d   :  { %p5214_p1 = pnand %p5212_p0, %p5209_p13 }
 0x36f   :  { %5217 = shalt.err (!%p5214_p1)
}
 0x370   :  { %s5227_s11 = smov 128   ;;  %s5228_s5 = smov 8   ;;  %v4648_v3 = vpop.f32.mrb[156].mxu1 }
 0x371   :  { %3641 = dma.vmem_to_hbm [thread:$0]  %s3636_s28, 8192, %s6660_s8, [#allocation5], %s5227_s11, %s5227_s11, %s5228_s5   ;;  %v2817_v8 = vpop.f32.mrb[157].mxu1  ;;  %v2826_v13 = vadd.f32 %v4648_v3, %v6462_v10 }
 0x372   :  { %v4649_v56 = vpop.f32.mrb[158].mxu1  ;;  %v2818_v23 = vadd.f32 %v6462_v10, %v2817_v8 }
 0x373   :  { %v2829_v55 = vadd.f32 %v4649_v56, %v6462_v10  ;;  %v2820_v60 = vpop.f32.mrb[159].mxu1 }
 0x374   :  { %v2821_v43 = vadd.f32 %v6462_v10, %v2820_v60  ;;  %v4652_v40 = vpop.f32.mrb[160].mxu1 }
 0x375   :  { %v4165_v21 = vpack.c.bf16 %v2829_v55, %v2826_v13  ;;  %v2833_v6 = vpop.f32.mrb[161].mxu1  ;;  %v2842_v4 = vadd.f32 %v4652_v40, %v6462_v10 }
 0x376   :  { %v4160_v30 = vpack.c.bf16 %v2821_v43, %v2818_v23  ;;  %v4653_v2 = vpop.f32.mrb[162].mxu1  ;;  %v2834_v49 = vadd.f32 %v6462_v10, %v2833_v6 }
 0x377   :  { %4413 = vst [vmem:[%s6658_s6 + $0x88] sm:$0xff] %v4165_v21   ;;  %v2845_v41 = vadd.f32 %v4653_v2, %v6462_v10  ;;  %v2836_v17 = vpop.f32.mrb[163].mxu1 }
 0x378   :  { %4412 = vst [vmem:[%s6658_s6 + $0x80] sm:$0xff] %v4160_v30   ;;  %v2837_v31 = vadd.f32 %v6462_v10, %v2836_v17 }
 0x379   :  { %v4175_v61 = vpack.c.bf16 %v2845_v41, %v2842_v4 }
 0x37a   :  { %v4170_v0 = vpack.c.bf16 %v2837_v31, %v2834_v49 }
 0x37b   :  { %4415 = vst [vmem:[%s6658_s6 + $0x98] sm:$0xff] %v4175_v61  }
 0x37c   :  { %4414 = vst [vmem:[%s6658_s6 + $0x90] sm:$0xff] %v4170_v0  }
 0x381   :  { %v4656_v11 = vpop.f32.mrb[164].mxu1 }
 0x382   :  { %v2849_v46 = vpop.f32.mrb[165].mxu1  ;;  %v2858_v24 = vadd.f32 %v4656_v11, %v6462_v10 }
 0x383   :  { %v4657_v57 = vpop.f32.mrb[166].mxu1  ;;  %v2850_v59 = vadd.f32 %v6462_v10, %v2849_v46 }
 0x384   :  { %v2861_v35 = vadd.f32 %v4657_v57, %v6462_v10  ;;  %v2852_v1 = vpop.f32.mrb[167].mxu1 }
 0x385   :  { %v2853_v52 = vadd.f32 %v6462_v10, %v2852_v1 }
 0x386   :  { %v4185_v45 = vpack.c.bf16 %v2861_v35, %v2858_v24 }
 0x387   :  { %v4180_v25 = vpack.c.bf16 %v2853_v52, %v2850_v59 }
 0x388   :  { %4417 = vst [vmem:[%s6658_s6 + $0xa8] sm:$0xff] %v4185_v45  }
 0x389   :  { %4416 = vst [vmem:[%s6658_s6 + $0xa0] sm:$0xff] %v4180_v25  }
 0x393   :  { %v4660_v36 = vpop.f32.mrb[168].mxu1 }
 0x394   :  { %v2865_v38 = vpop.f32.mrb[169].mxu1  ;;  %v2874_v37 = vadd.f32 %v4660_v36, %v6462_v10 }
 0x395   :  { %v4661_v5 = vpop.f32.mrb[170].mxu1  ;;  %v2866_v9 = vadd.f32 %v6462_v10, %v2865_v38 }
 0x396   :  { %v2877_v47 = vadd.f32 %v4661_v5, %v6462_v10  ;;  %v2868_v27 = vpop.f32.mrb[171].mxu1 }
 0x397   :  { %v2869_v34 = vadd.f32 %v6462_v10, %v2868_v27 }
 0x398   :  { %v4195_v62 = vpack.c.bf16 %v2877_v47, %v2874_v37 }
 0x399   :  { %v4190_v42 = vpack.c.bf16 %v2869_v34, %v2866_v9 }
 0x39a   :  { %4419 = vst [vmem:[%s6658_s6 + $0xb8] sm:$0xff] %v4195_v62  }
 0x39b   :  { %4418 = vst [vmem:[%s6658_s6 + $0xb0] sm:$0xff] %v4190_v42  }
 0x39d   :  { %v4664_v20 = vpop.f32.mrb[172].mxu1 }
 0x39e   :  { %v2881_v15 = vpop.f32.mrb[173].mxu1  ;;  %v2890_v29 = vadd.f32 %v4664_v20, %v6462_v10 }
 0x39f   :  { %v4665_v39 = vpop.f32.mrb[174].mxu1  ;;  %v2882_v51 = vadd.f32 %v6462_v10, %v2881_v15 }
 0x3a0   :  { %v2893_v18 = vadd.f32 %v4665_v39, %v6462_v10  ;;  %v2884_v50 = vpop.f32.mrb[175].mxu1 }
 0x3a1   :  { %v2885_v54 = vadd.f32 %v6462_v10, %v2884_v50 }
 0x3a2   :  { %v4205_v22 = vpack.c.bf16 %v2893_v18, %v2890_v29 }
 0x3a3   :  { %v4200_v44 = vpack.c.bf16 %v2885_v54, %v2882_v51 }
 0x3a4   :  { %4421 = vst [vmem:[%s6658_s6 + $0xc8] sm:$0xff] %v4205_v22  }
 0x3a5   :  { %4420 = vst [vmem:[%s6658_s6 + $0xc0] sm:$0xff] %v4200_v44  }
 0x3aa   :  { %v4668_v19 = vpop.f32.mrb[176].mxu1 }
 0x3ab   :  { %v2897_v33 = vpop.f32.mrb[177].mxu1  ;;  %v2906_v32 = vadd.f32 %v4668_v19, %v6462_v10 }
 0x3ac   :  { %v4669_v53 = vpop.f32.mrb[178].mxu1  ;;  %v2898_v48 = vadd.f32 %v6462_v10, %v2897_v33 }
 0x3ad   :  { %v2909_v14 = vadd.f32 %v4669_v53, %v6462_v10  ;;  %v2900_v7 = vpop.f32.mrb[179].mxu1 }
 0x3ae   :  { %v2901_v12 = vadd.f32 %v6462_v10, %v2900_v7 }
 0x3af   :  { %v4215_v26 = vpack.c.bf16 %v2909_v14, %v2906_v32 }
 0x3b0   :  { %v4210_v16 = vpack.c.bf16 %v2901_v12, %v2898_v48 }
 0x3b1   :  { %4423 = vst [vmem:[%s6658_s6 + $0xd8] sm:$0xff] %v4215_v26  }
 0x3b2   :  { %4422 = vst [vmem:[%s6658_s6 + $0xd0] sm:$0xff] %v4210_v16  }
 0x3bc   :  { %v4672_v28 = vpop.f32.mrb[180].mxu1 }
 0x3bd   :  { %v2913_v58 = vpop.f32.mrb[181].mxu1  ;;  %v2922_v3 = vadd.f32 %v4672_v28, %v6462_v10 }
 0x3be   :  { %v4673_v63 = vpop.f32.mrb[182].mxu1  ;;  %v2914_v13 = vadd.f32 %v6462_v10, %v2913_v58 }
 0x3bf   :  { %v2925_v8 = vadd.f32 %v4673_v63, %v6462_v10  ;;  %v2916_v56 = vpop.f32.mrb[183].mxu1 }
 0x3c0   :  { %v2917_v55 = vadd.f32 %v6462_v10, %v2916_v56 }
 0x3c1   :  { %v4225_v60 = vpack.c.bf16 %v2925_v8, %v2922_v3 }
 0x3c2   :  { %v4220_v23 = vpack.c.bf16 %v2917_v55, %v2914_v13 }
 0x3c3   :  { %4425 = vst [vmem:[%s6658_s6 + $0xe8] sm:$0xff] %v4225_v60  }
 0x3c4   :  { %4424 = vst [vmem:[%s6658_s6 + $0xe0] sm:$0xff] %v4220_v23  }
 0x3cd   :  { %v4676_v43 = vpop.f32.mrb[184].mxu1 }
 0x3ce   :  { %v2929_v21 = vpop.f32.mrb[185].mxu1  ;;  %v2938_v40 = vadd.f32 %v4676_v43, %v6462_v10 }
 0x3cf   :  { %v4677_v30 = vpop.f32.mrb[186].mxu1  ;;  %v2930_v4 = vadd.f32 %v6462_v10, %v2929_v21 }
 0x3d0   :  { %v2941_v6 = vadd.f32 %v4677_v30, %v6462_v10  ;;  %v2932_v2 = vpop.f32.mrb[187].mxu1 }
 0x3d1   :  { %v2933_v41 = vadd.f32 %v6462_v10, %v2932_v2 }
 0x3d2   :  { %v4235_v17 = vpack.c.bf16 %v2941_v6, %v2938_v40 }
 0x3d3   :  { %v4230_v49 = vpack.c.bf16 %v2933_v41, %v2930_v4 }
 0x3d4   :  { %4427 = vst [vmem:[%s6658_s6 + $0xf8] sm:$0xff] %v4235_v17  }
 0x3d5   :  { %4426 = vst [vmem:[%s6658_s6 + $0xf0] sm:$0xff] %v4230_v49  }
 0x3d6   :  { %5218 = dma.done.wait [#allocation3], 4096  }
 0x3d7   :  { %5219 = vsyncadd [#allocation3], 4294963200 }
 0x3d8   :  { %5220 = dma.done.wait [#allocation5], 8192  }
 0x3d9   :  { %5221 = vsyncadd [#allocation5], 4294959104 }
 0x3da   :  { %3650 = vsyncpa [#allocation3], 1 }
 0x3db   :  { %3651 = vsyncpa [#allocation5], 1 }

</bundles_post_ra>
